<compile_context>
chip_gen: v7x
topology: tpu7x:2x2x1
jax: 0.10.0
libtpu: 0.0.40
codegen_flags: <defaults>
</compile_context>

<pallas_src>
import math

import jax
import jax.numpy as jnp
from jax.experimental import pallas as pl
from jax.experimental.pallas import tpu as pltpu

LANE = 128


def _round_up(n, m):
    return ((n + m - 1) // m) * m


# --------------------------------------------------------------------------------------
# Parameter construction (torch.nn.Linear-style init, weights stored (in, out))
# --------------------------------------------------------------------------------------
def init_mlp2_params(key, *, input_dim, condition_dim, output_dim1, output_dim2,
                     hidden_dim=256, hidden_layers=8):
    """Returns (weights, biases, n_fcs1, n_fcs2). Weights are (in_features, out_features)
    (transposed vs torch), biases are (out_features,)."""
    mid_layers = math.ceil(hidden_layers / 2.0)
    layer_dims = [(input_dim, hidden_dim)]
    for i in range(mid_layers):
        out_d = hidden_dim + output_dim1 if i == mid_layers - 1 else hidden_dim
        layer_dims.append((hidden_dim, out_d))
    n_fcs1 = len(layer_dims)
    n_fcs2 = hidden_layers - 1 - mid_layers
    for i in range(n_fcs2):
        in_d = hidden_dim + condition_dim if i == 0 else hidden_dim
        layer_dims.append((in_d, hidden_dim))
    layer_dims.append((hidden_dim, output_dim2))          # output_linear

    weights, biases = [], []
    for fan_in, fan_out in layer_dims:
        key, kw, kb = jax.random.split(key, 3)
        bound = 1.0 / math.sqrt(fan_in)
        weights.append(jax.random.uniform(kw, (fan_in, fan_out), jnp.float32, -bound, bound))
        biases.append(jax.random.uniform(kb, (fan_out,), jnp.float32, -bound, bound))
    return weights, biases, n_fcs1, n_fcs2


def pad_mlp2_params(weights, biases, n_fcs1, n_fcs2, cfg):
    """Zero-pad every feature dim to a multiple of 128 lanes, cast weights to bf16.

    The last fcs1 layer's `oup1` columns are relocated to lanes [hid_pad:], and the
    first fcs2 layer is split into (Wh, Wc) so the kernel never concatenates."""
    input_dim, condition_dim = cfg["input_dim"], cfg["condition_dim"]
    output_dim1, output_dim2 = cfg["output_dim1"], cfg["output_dim2"]
    hidden_dim = cfg["hidden_dim"]
    assert n_fcs2 >= 1, "kernel assumes at least one fcs2 layer (hidden_layers >= 4)"

    in_pad = _round_up(input_dim, LANE)
    hid_pad = _round_up(hidden_dim, LANE)
    out1_pad = _round_up(output_dim1, LANE)
    out2_pad = _round_up(output_dim2, LANE)
    cond_pad = _round_up(condition_dim, LANE)

    def wpad(w, rp, cp):
        return jnp.zeros((rp, cp), jnp.float32).at[:w.shape[0], :w.shape[1]].set(w)

    def bpad(b, cp):
        return jnp.zeros((1, cp), jnp.float32).at[0, :b.shape[0]].set(b)

    flat = []

    def push(w, b):
        flat.append(w.astype(jnp.bfloat16))   # bf16 weights -> native MXU path
        flat.append(b)                        # f32 biases (added after f32 accumulation)

    # fcs1[0]: input -> hidden
    push(wpad(weights[0], in_pad, hid_pad), bpad(biases[0], hid_pad))
    # fcs1[1 .. n_fcs1-2]: hidden -> hidden
    for li in range(1, n_fcs1 - 1):
        push(wpad(weights[li], hid_pad, hid_pad), bpad(biases[li], hid_pad))
    # fcs1[last]: hidden -> hidden + output_dim1 ; oup1 columns live in lanes [hid_pad:]
    w, b = weights[n_fcs1 - 1], biases[n_fcs1 - 1]
    wl = jnp.zeros((hid_pad, hid_pad + out1_pad), jnp.float32)
    wl = wl.at[:hidden_dim, :hidden_dim].set(w[:, :hidden_dim])
    wl = wl.at[:hidden_dim, hid_pad:hid_pad + output_dim1].set(w[:, hidden_dim:])
    bl = jnp.zeros((1, hid_pad + out1_pad), jnp.float32)
    bl = bl.at[0, :hidden_dim].set(b[:hidden_dim])
    bl = bl.at[0, hid_pad:hid_pad + output_dim1].set(b[hidden_dim:])
    push(wl, bl)
    # fcs2[0]: [hidden, condition] -> hidden, split into two matmuls
    w, b = weights[n_fcs1], biases[n_fcs1]
    flat.append(wpad(w[:hidden_dim, :], hid_pad, hid_pad).astype(jnp.bfloat16))    # Wh
    flat.append(wpad(w[hidden_dim:, :], cond_pad, hid_pad).astype(jnp.bfloat16))   # Wc
    flat.append(bpad(b, hid_pad))
    # fcs2[1 ..]: hidden -> hidden
    for li in range(n_fcs1 + 1, n_fcs1 + n_fcs2):
        push(wpad(weights[li], hid_pad, hid_pad), bpad(biases[li], hid_pad))
    # output_linear: hidden -> output_dim2
    push(wpad(weights[-1], hid_pad, out2_pad), bpad(biases[-1], out2_pad))

    dims = dict(in_pad=in_pad, hid_pad=hid_pad, out1_pad=out1_pad,
                out2_pad=out2_pad, cond_pad=cond_pad)
    return flat, dims


# --------------------------------------------------------------------------------------
# Kernel
# --------------------------------------------------------------------------------------
def _make_mlp2_kernel(n_fcs1, n_fcs2, hid_pad):
    """Kernel args: x_ref, c_ref, <padded weight/bias refs...>, oup1_ref, oup2_ref."""

    def kernel(x_ref, c_ref, *refs):
        oup1_ref, oup2_ref = refs[-2], refs[-1]
        params = refs[:-2]
        pos = 0

        def nxt():
            nonlocal pos
            r = params[pos]
            pos += 1
            return r

        def linear(h_bf, w_ref, b_ref, relu):
            # bf16 x bf16 -> f32 accumulation on the MXU; bias/ReLU in f32.
            y = jnp.dot(h_bf, w_ref[...], preferred_element_type=jnp.float32) + b_ref[...]
            return jnp.maximum(y, 0.0) if relu else y

        # ---- fcs1 stack: Linear -> ReLU --------------------------------------------
        h_bf = x_ref[...]                                   # bf16 (row_tile, in_pad)
        h_f32 = None
        for _ in range(n_fcs1):
            h_f32 = linear(h_bf, nxt(), nxt(), relu=True)   # f32
            h_bf = h_f32.astype(jnp.bfloat16)
        # oup1 = (already ReLU'd) last output_dim1 features, stored in lanes [hid_pad:]
        oup1_ref[...] = h_f32[:, hid_pad:].astype(oup1_ref.dtype)
        h_bf = h_bf[:, :hid_pad]

        # ---- fcs2 stack: first layer consumes [h, condition] via split weights ------
        w2h, w2c, b2 = nxt(), nxt(), nxt()
        y = (jnp.dot(h_bf, w2h[...], preferred_element_type=jnp.float32)
             + jnp.dot(c_ref[...], w2c[...], preferred_element_type=jnp.float32)
             + b2[...])
        h_bf = jnp.maximum(y, 0.0).astype(jnp.bfloat16)
        for _ in range(n_fcs2 - 1):
            h_bf = linear(h_bf, nxt(), nxt(), relu=True).astype(jnp.bfloat16)

        # ---- output_linear (no activation) ------------------------------------------
        oup2_ref[...] = linear(h_bf, nxt(), nxt(), relu=False).astype(oup2_ref.dtype)

    return kernel


# --------------------------------------------------------------------------------------
# Wrapper
# --------------------------------------------------------------------------------------
def mlp2_pallas(x, condition, flat_params, dims, n_fcs1, n_fcs2, cfg, *, row_tile=256):
    """x: (B, N_v, input_dim) f32; condition: (B, N_v, condition_dim) f32.
    Returns (oup1: (B, N_v, output_dim1), oup2: (B, N_v, output_dim2)) f32."""
    batch, n_v, input_dim = x.shape
    cond_dim = condition.shape[-1]
    m = batch * n_v
    in_pad, hid_pad = dims["in_pad"], dims["hid_pad"]
    out1_pad, out2_pad, cond_pad = dims["out1_pad"], dims["out2_pad"], dims["cond_pad"]
    output_dim1, output_dim2 = cfg["output_dim1"], cfg["output_dim2"]

    # Pad the token axis to an even multiple of row_tile: full blocks everywhere and an
    # even "parallel" grid so both v7x TensorCores stay busy. Padded rows are zeros and
    # are sliced off below.
    m_pad = _round_up(max(m, 2 * row_tile), 2 * row_tile)

    x2d = jnp.zeros((m_pad, in_pad), jnp.bfloat16)
    x2d = x2d.at[:m, :input_dim].set(x.reshape(m, input_dim).astype(jnp.bfloat16))
    c2d = jnp.zeros((m_pad, cond_pad), jnp.bfloat16)
    c2d = c2d.at[:m, :cond_dim].set(condition.reshape(m, cond_dim).astype(jnp.bfloat16))

    grid = (m_pad // row_tile,)

    in_specs = [pl.BlockSpec((row_tile, in_pad), lambda i: (i, 0)),
                pl.BlockSpec((row_tile, cond_pad), lambda i: (i, 0))]
    for p in flat_params:
        # Weights/biases: constant block index -> fetched once, resident across the grid.
        in_specs.append(pl.BlockSpec(p.shape, lambda i: (0, 0)))

    out_specs = [pl.BlockSpec((row_tile, out1_pad), lambda i: (i, 0)),
                 pl.BlockSpec((row_tile, out2_pad), lambda i: (i, 0))]
    out_shape = (jax.ShapeDtypeStruct((m_pad, out1_pad), jnp.float32),
                 jax.ShapeDtypeStruct((m_pad, out2_pad), jnp.float32))

    oup1, oup2 = pl.pallas_call(
        _make_mlp2_kernel(n_fcs1, n_fcs2, hid_pad),
        out_shape=out_shape,
        grid_spec=pltpu.PrefetchScalarGridSpec(
            num_scalar_prefetch=0,
            grid=grid,
            in_specs=in_specs,
            out_specs=out_specs,
        ),
        compiler_params=pltpu.CompilerParams(
            dimension_semantics=("parallel",),
            # Explicit VMEM budget: double-buffered bf16 weights (~2.4 MiB) + activation
            # tiles (<2 MiB) fit with large headroom on v5e/v6e (128 MiB) and v7x (64 MiB).
            vmem_limit_bytes=48 * 1024 * 1024,
        ),
    )(x2d, c2d, *flat_params)

    oup1 = oup1[:m, :output_dim1].reshape(batch, n_v, output_dim1)
    oup2 = oup2[:m, :output_dim2].reshape(batch, n_v, output_dim2)
    return oup1, oup2


# --------------------------------------------------------------------------------------
# Pure-JAX reference (same bf16-matmul / f32-accumulate numerics as the kernel)
# --------------------------------------------------------------------------------------
def mlp2_reference(x, condition, weights, biases, n_fcs1, n_fcs2, cfg):
    def dot_bf16(a, w):
        return jnp.dot(a.astype(jnp.bfloat16), w.astype(jnp.bfloat16),
                       preferred_element_type=jnp.float32)

    b_, nv, d = x.shape
    h = x.reshape(b_ * nv, d)
    c = condition.reshape(b_ * nv, -1)
    li = 0
    for _ in range(n_fcs1):
        h = jnp.maximum(dot_bf16(h, weights[li]) + biases[li], 0.0)
        li += 1
    out1 = cfg["output_dim1"]
    oup1 = h[:, -out1:]
    h = h[:, :-out1]
    h = jnp.concatenate([h, c], axis=-1)
    for _ in range(n_fcs2):
        h = jnp.maximum(dot_bf16(h, weights[li]) + biases[li], 0.0)
        li += 1
    oup2 = dot_bf16(h, weights[li]) + biases[li]
    return oup1.reshape(b_, nv, -1), oup2.reshape(b_, nv, -1)


# --------------------------------------------------------------------------------------
if __name__ == "__main__":
    # Small shapes consistent with MLP2.forward: input (B, N_v, input_dim),
    # condition (B, N_v, condition_dim); module defaults hidden_dim=256, hidden_layers=8.
    batch, n_v = 2, 300
    cfg = dict(input_dim=4, condition_dim=16, output_dim1=8, output_dim2=4,
               hidden_dim=256, hidden_layers=8)

    key = jax.random.PRNGKey(0)
    key, kx, kc = jax.random.split(key, 3)
    x = jax.random.normal(kx, (batch, n_v, cfg["input_dim"]), jnp.float32)
    condition = jax.random.normal(kc, (batch, n_v, cfg["condition_dim"]), jnp.float32)

    weights, biases, n_fcs1, n_fcs2 = init_mlp2_params(key, **cfg)
    flat_params, dims = pad_mlp2_params(weights, biases, n_fcs1, n_fcs2, cfg)

    oup1, oup2 = mlp2_pallas(x, condition, flat_params, dims, n_fcs1, n_fcs2, cfg,
                             row_tile=256)
    oup1, oup2 = jax.block_until_ready((oup1, oup2))

    ref1, ref2 = mlp2_reference(x, condition, weights, biases, n_fcs1, n_fcs2, cfg)
    assert oup1.shape == (batch, n_v, cfg["output_dim1"])
    assert oup2.shape == (batch, n_v, cfg["output_dim2"])
    err1 = float(jnp.max(jnp.abs(oup1 - ref1)))
    err2 = float(jnp.max(jnp.abs(oup2 - ref2)))
    assert err1 < 1e-2 and err2 < 1e-2, f"mismatch vs reference: {err1}, {err2}"

    print("KERNEL_OK")
</pallas_src>

<mosaic_0001>
module attributes {stable_mosaic.version = 11 : i64} {
  func.func @kernel(%arg0: i32, %arg1: memref<256x128xbf16, #tpu.memory_space<vmem>>, %arg2: memref<256x128xbf16, #tpu.memory_space<vmem>>, %arg3: memref<128x256xbf16, #tpu.memory_space<vmem>>, %arg4: memref<1x256xf32, #tpu.memory_space<vmem>>, %arg5: memref<256x256xbf16, #tpu.memory_space<vmem>>, %arg6: memref<1x256xf32, #tpu.memory_space<vmem>>, %arg7: memref<256x256xbf16, #tpu.memory_space<vmem>>, %arg8: memref<1x256xf32, #tpu.memory_space<vmem>>, %arg9: memref<256x256xbf16, #tpu.memory_space<vmem>>, %arg10: memref<1x256xf32, #tpu.memory_space<vmem>>, %arg11: memref<256x384xbf16, #tpu.memory_space<vmem>>, %arg12: memref<1x384xf32, #tpu.memory_space<vmem>>, %arg13: memref<256x256xbf16, #tpu.memory_space<vmem>>, %arg14: memref<128x256xbf16, #tpu.memory_space<vmem>>, %arg15: memref<1x256xf32, #tpu.memory_space<vmem>>, %arg16: memref<256x256xbf16, #tpu.memory_space<vmem>>, %arg17: memref<1x256xf32, #tpu.memory_space<vmem>>, %arg18: memref<256x256xbf16, #tpu.memory_space<vmem>>, %arg19: memref<1x256xf32, #tpu.memory_space<vmem>>, %arg20: memref<256x128xbf16, #tpu.memory_space<vmem>>, %arg21: memref<1x128xf32, #tpu.memory_space<vmem>>, %arg22: memref<256x128xf32, #tpu.memory_space<vmem>>, %arg23: memref<256x128xf32, #tpu.memory_space<vmem>>) attributes {dimension_semantics = [#tpu.dimension_semantics<parallel>], iteration_bounds = array<i64: 4>, scalar_prefetch = 0 : i64, scratch_operands = 0 : i64, tpu.core_type = #tpu.core_type<tc>, window_params = [{transform_indices = @transform_0, window_bounds = array<i64: 256, 128>}, {transform_indices = @transform_1, window_bounds = array<i64: 256, 128>}, {pipeline_mode = #tpu.pipeline_mode<synchronous>, transform_indices = @transform_2, window_bounds = array<i64: 128, 256>}, {pipeline_mode = #tpu.pipeline_mode<synchronous>, transform_indices = @transform_3, window_bounds = array<i64: 1, 256>}, {pipeline_mode = #tpu.pipeline_mode<synchronous>, transform_indices = @transform_4, window_bounds = array<i64: 256, 256>}, {pipeline_mode = #tpu.pipeline_mode<synchronous>, transform_indices = @transform_5, window_bounds = array<i64: 1, 256>}, {pipeline_mode = #tpu.pipeline_mode<synchronous>, transform_indices = @transform_6, window_bounds = array<i64: 256, 256>}, {pipeline_mode = #tpu.pipeline_mode<synchronous>, transform_indices = @transform_7, window_bounds = array<i64: 1, 256>}, {pipeline_mode = #tpu.pipeline_mode<synchronous>, transform_indices = @transform_8, window_bounds = array<i64: 256, 256>}, {pipeline_mode = #tpu.pipeline_mode<synchronous>, transform_indices = @transform_9, window_bounds = array<i64: 1, 256>}, {pipeline_mode = #tpu.pipeline_mode<synchronous>, transform_indices = @transform_10, window_bounds = array<i64: 256, 384>}, {pipeline_mode = #tpu.pipeline_mode<synchronous>, transform_indices = @transform_11, window_bounds = array<i64: 1, 384>}, {pipeline_mode = #tpu.pipeline_mode<synchronous>, transform_indices = @transform_12, window_bounds = array<i64: 256, 256>}, {pipeline_mode = #tpu.pipeline_mode<synchronous>, transform_indices = @transform_13, window_bounds = array<i64: 128, 256>}, {pipeline_mode = #tpu.pipeline_mode<synchronous>, transform_indices = @transform_14, window_bounds = array<i64: 1, 256>}, {pipeline_mode = #tpu.pipeline_mode<synchronous>, transform_indices = @transform_15, window_bounds = array<i64: 256, 256>}, {pipeline_mode = #tpu.pipeline_mode<synchronous>, transform_indices = @transform_16, window_bounds = array<i64: 1, 256>}, {pipeline_mode = #tpu.pipeline_mode<synchronous>, transform_indices = @transform_17, window_bounds = array<i64: 256, 256>}, {pipeline_mode = #tpu.pipeline_mode<synchronous>, transform_indices = @transform_18, window_bounds = array<i64: 1, 256>}, {pipeline_mode = #tpu.pipeline_mode<synchronous>, transform_indices = @transform_19, window_bounds = array<i64: 256, 128>}, {pipeline_mode = #tpu.pipeline_mode<synchronous>, transform_indices = @transform_20, window_bounds = array<i64: 1, 128>}, {transform_indices = @transform_21, window_bounds = array<i64: 256, 128>}, {transform_indices = @transform_22, window_bounds = array<i64: 256, 128>}]} {
    %c0 = arith.constant 0 : index
    %c0_0 = arith.constant 0 : index
    %0 = vector.load %arg1[%c0, %c0_0] : memref<256x128xbf16, #tpu.memory_space<vmem>>, vector<256x128xbf16>
    %c0_1 = arith.constant 0 : index
    %c0_2 = arith.constant 0 : index
    %1 = vector.load %arg3[%c0_1, %c0_2] : memref<128x256xbf16, #tpu.memory_space<vmem>>, vector<128x256xbf16>
    %cst = arith.constant dense<0.000000e+00> : vector<256x256xf32>
    %2 = tpu.matmul %0, %1, %cst {dimension_numbers = #tpu.dot_dimension_numbers<[1], [0], [0], [1], [0, 0, 1, 1], [], []>} : vector<256x128xbf16>, vector<128x256xbf16>, vector<256x256xf32> -> vector<256x256xf32>
    %c0_3 = arith.constant 0 : index
    %c0_4 = arith.constant 0 : index
    %3 = vector.load %arg4[%c0_3, %c0_4] : memref<1x256xf32, #tpu.memory_space<vmem>>, vector<1x256xf32>
    %4 = vector.broadcast %3 : vector<1x256xf32> to vector<256x256xf32>
    %5 = arith.addf %2, %4 : vector<256x256xf32>
    %cst_5 = arith.constant 0.000000e+00 : f32
    %6 = vector.broadcast %cst_5 : f32 to vector<256x256xf32>
    %7 = arith.maximumf %5, %6 : vector<256x256xf32>
    %8 = arith.truncf %7 : vector<256x256xf32> to vector<256x256xbf16>
    %c0_6 = arith.constant 0 : index
    %c0_7 = arith.constant 0 : index
    %9 = vector.load %arg5[%c0_6, %c0_7] : memref<256x256xbf16, #tpu.memory_space<vmem>>, vector<256x256xbf16>
    %cst_8 = arith.constant dense<0.000000e+00> : vector<256x256xf32>
    %10 = tpu.matmul %8, %9, %cst_8 {dimension_numbers = #tpu.dot_dimension_numbers<[1], [0], [0], [1], [0, 0, 1, 1], [], []>} : vector<256x256xbf16>, vector<256x256xbf16>, vector<256x256xf32> -> vector<256x256xf32>
    %c0_9 = arith.constant 0 : index
    %c0_10 = arith.constant 0 : index
    %11 = vector.load %arg6[%c0_9, %c0_10] : memref<1x256xf32, #tpu.memory_space<vmem>>, vector<1x256xf32>
    %12 = vector.broadcast %11 : vector<1x256xf32> to vector<256x256xf32>
    %13 = arith.addf %10, %12 : vector<256x256xf32>
    %cst_11 = arith.constant 0.000000e+00 : f32
    %14 = vector.broadcast %cst_11 : f32 to vector<256x256xf32>
    %15 = arith.maximumf %13, %14 : vector<256x256xf32>
    %16 = arith.truncf %15 : vector<256x256xf32> to vector<256x256xbf16>
    %c0_12 = arith.constant 0 : index
    %c0_13 = arith.constant 0 : index
    %17 = vector.load %arg7[%c0_12, %c0_13] : memref<256x256xbf16, #tpu.memory_space<vmem>>, vector<256x256xbf16>
    %cst_14 = arith.constant dense<0.000000e+00> : vector<256x256xf32>
    %18 = tpu.matmul %16, %17, %cst_14 {dimension_numbers = #tpu.dot_dimension_numbers<[1], [0], [0], [1], [0, 0, 1, 1], [], []>} : vector<256x256xbf16>, vector<256x256xbf16>, vector<256x256xf32> -> vector<256x256xf32>
    %c0_15 = arith.constant 0 : index
    %c0_16 = arith.constant 0 : index
    %19 = vector.load %arg8[%c0_15, %c0_16] : memref<1x256xf32, #tpu.memory_space<vmem>>, vector<1x256xf32>
    %20 = vector.broadcast %19 : vector<1x256xf32> to vector<256x256xf32>
    %21 = arith.addf %18, %20 : vector<256x256xf32>
    %cst_17 = arith.constant 0.000000e+00 : f32
    %22 = vector.broadcast %cst_17 : f32 to vector<256x256xf32>
    %23 = arith.maximumf %21, %22 : vector<256x256xf32>
    %24 = arith.truncf %23 : vector<256x256xf32> to vector<256x256xbf16>
    %c0_18 = arith.constant 0 : index
    %c0_19 = arith.constant 0 : index
    %25 = vector.load %arg9[%c0_18, %c0_19] : memref<256x256xbf16, #tpu.memory_space<vmem>>, vector<256x256xbf16>
    %cst_20 = arith.constant dense<0.000000e+00> : vector<256x256xf32>
    %26 = tpu.matmul %24, %25, %cst_20 {dimension_numbers = #tpu.dot_dimension_numbers<[1], [0], [0], [1], [0, 0, 1, 1], [], []>} : vector<256x256xbf16>, vector<256x256xbf16>, vector<256x256xf32> -> vector<256x256xf32>
    %c0_21 = arith.constant 0 : index
    %c0_22 = arith.constant 0 : index
    %27 = vector.load %arg10[%c0_21, %c0_22] : memref<1x256xf32, #tpu.memory_space<vmem>>, vector<1x256xf32>
    %28 = vector.broadcast %27 : vector<1x256xf32> to vector<256x256xf32>
    %29 = arith.addf %26, %28 : vector<256x256xf32>
    %cst_23 = arith.constant 0.000000e+00 : f32
    %30 = vector.broadcast %cst_23 : f32 to vector<256x256xf32>
    %31 = arith.maximumf %29, %30 : vector<256x256xf32>
    %32 = arith.truncf %31 : vector<256x256xf32> to vector<256x256xbf16>
    %c0_24 = arith.constant 0 : index
    %c0_25 = arith.constant 0 : index
    %33 = vector.load %arg11[%c0_24, %c0_25] : memref<256x384xbf16, #tpu.memory_space<vmem>>, vector<256x384xbf16>
    %cst_26 = arith.constant dense<0.000000e+00> : vector<256x384xf32>
    %34 = tpu.matmul %32, %33, %cst_26 {dimension_numbers = #tpu.dot_dimension_numbers<[1], [0], [0], [1], [0, 0, 1, 1], [], []>} : vector<256x256xbf16>, vector<256x384xbf16>, vector<256x384xf32> -> vector<256x384xf32>
    %c0_27 = arith.constant 0 : index
    %c0_28 = arith.constant 0 : index
    %35 = vector.load %arg12[%c0_27, %c0_28] : memref<1x384xf32, #tpu.memory_space<vmem>>, vector<1x384xf32>
    %36 = vector.broadcast %35 : vector<1x384xf32> to vector<256x384xf32>
    %37 = arith.addf %34, %36 : vector<256x384xf32>
    %cst_29 = arith.constant 0.000000e+00 : f32
    %38 = vector.broadcast %cst_29 : f32 to vector<256x384xf32>
    %39 = arith.maximumf %37, %38 : vector<256x384xf32>
    %40 = arith.truncf %39 : vector<256x384xf32> to vector<256x384xbf16>
    %41 = vector.extract_strided_slice %39 {offsets = [0, 256], sizes = [256, 128], strides = [1, 1]} : vector<256x384xf32> to vector<256x128xf32>
    %c0_30 = arith.constant 0 : index
    %c0_31 = arith.constant 0 : index
    %42 = vector.load %arg22[%c0_30, %c0_31] : memref<256x128xf32, #tpu.memory_space<vmem>>, vector<256x128xf32>
    tpu.vector_store %arg22[%c0_30, %c0_31], %41 {strides = array<i32>} : memref<256x128xf32, #tpu.memory_space<vmem>>, vector<256x128xf32>,
    %43 = vector.extract_strided_slice %40 {offsets = [0, 0], sizes = [256, 256], strides = [1, 1]} : vector<256x384xbf16> to vector<256x256xbf16>
    %c0_32 = arith.constant 0 : index
    %c0_33 = arith.constant 0 : index
    %44 = vector.load %arg13[%c0_32, %c0_33] : memref<256x256xbf16, #tpu.memory_space<vmem>>, vector<256x256xbf16>
    %cst_34 = arith.constant dense<0.000000e+00> : vector<256x256xf32>
    %45 = tpu.matmul %43, %44, %cst_34 {dimension_numbers = #tpu.dot_dimension_numbers<[1], [0], [0], [1], [0, 0, 1, 1], [], []>} : vector<256x256xbf16>, vector<256x256xbf16>, vector<256x256xf32> -> vector<256x256xf32>
    %c0_35 = arith.constant 0 : index
    %c0_36 = arith.constant 0 : index
    %46 = vector.load %arg2[%c0_35, %c0_36] : memref<256x128xbf16, #tpu.memory_space<vmem>>, vector<256x128xbf16>
    %c0_37 = arith.constant 0 : index
    %c0_38 = arith.constant 0 : index
    %47 = vector.load %arg14[%c0_37, %c0_38] : memref<128x256xbf16, #tpu.memory_space<vmem>>, vector<128x256xbf16>
    %cst_39 = arith.constant dense<0.000000e+00> : vector<256x256xf32>
    %48 = tpu.matmul %46, %47, %cst_39 {dimension_numbers = #tpu.dot_dimension_numbers<[1], [0], [0], [1], [0, 0, 1, 1], [], []>} : vector<256x128xbf16>, vector<128x256xbf16>, vector<256x256xf32> -> vector<256x256xf32>
    %49 = arith.addf %45, %48 : vector<256x256xf32>
    %c0_40 = arith.constant 0 : index
    %c0_41 = arith.constant 0 : index
    %50 = vector.load %arg15[%c0_40, %c0_41] : memref<1x256xf32, #tpu.memory_space<vmem>>, vector<1x256xf32>
    %51 = vector.broadcast %50 : vector<1x256xf32> to vector<256x256xf32>
    %52 = arith.addf %49, %51 : vector<256x256xf32>
    %cst_42 = arith.constant 0.000000e+00 : f32
    %53 = vector.broadcast %cst_42 : f32 to vector<256x256xf32>
    %54 = arith.maximumf %52, %53 : vector<256x256xf32>
    %55 = arith.truncf %54 : vector<256x256xf32> to vector<256x256xbf16>
    %c0_43 = arith.constant 0 : index
    %c0_44 = arith.constant 0 : index
    %56 = vector.load %arg16[%c0_43, %c0_44] : memref<256x256xbf16, #tpu.memory_space<vmem>>, vector<256x256xbf16>
    %cst_45 = arith.constant dense<0.000000e+00> : vector<256x256xf32>
    %57 = tpu.matmul %55, %56, %cst_45 {dimension_numbers = #tpu.dot_dimension_numbers<[1], [0], [0], [1], [0, 0, 1, 1], [], []>} : vector<256x256xbf16>, vector<256x256xbf16>, vector<256x256xf32> -> vector<256x256xf32>
    %c0_46 = arith.constant 0 : index
    %c0_47 = arith.constant 0 : index
    %58 = vector.load %arg17[%c0_46, %c0_47] : memref<1x256xf32, #tpu.memory_space<vmem>>, vector<1x256xf32>
    %59 = vector.broadcast %58 : vector<1x256xf32> to vector<256x256xf32>
    %60 = arith.addf %57, %59 : vector<256x256xf32>
    %cst_48 = arith.constant 0.000000e+00 : f32
    %61 = vector.broadcast %cst_48 : f32 to vector<256x256xf32>
    %62 = arith.maximumf %60, %61 : vector<256x256xf32>
    %63 = arith.truncf %62 : vector<256x256xf32> to vector<256x256xbf16>
    %c0_49 = arith.constant 0 : index
    %c0_50 = arith.constant 0 : index
    %64 = vector.load %arg18[%c0_49, %c0_50] : memref<256x256xbf16, #tpu.memory_space<vmem>>, vector<256x256xbf16>
    %cst_51 = arith.constant dense<0.000000e+00> : vector<256x256xf32>
    %65 = tpu.matmul %63, %64, %cst_51 {dimension_numbers = #tpu.dot_dimension_numbers<[1], [0], [0], [1], [0, 0, 1, 1], [], []>} : vector<256x256xbf16>, vector<256x256xbf16>, vector<256x256xf32> -> vector<256x256xf32>
    %c0_52 = arith.constant 0 : index
    %c0_53 = arith.constant 0 : index
    %66 = vector.load %arg19[%c0_52, %c0_53] : memref<1x256xf32, #tpu.memory_space<vmem>>, vector<1x256xf32>
    %67 = vector.broadcast %66 : vector<1x256xf32> to vector<256x256xf32>
    %68 = arith.addf %65, %67 : vector<256x256xf32>
    %cst_54 = arith.constant 0.000000e+00 : f32
    %69 = vector.broadcast %cst_54 : f32 to vector<256x256xf32>
    %70 = arith.maximumf %68, %69 : vector<256x256xf32>
    %71 = arith.truncf %70 : vector<256x256xf32> to vector<256x256xbf16>
    %c0_55 = arith.constant 0 : index
    %c0_56 = arith.constant 0 : index
    %72 = vector.load %arg20[%c0_55, %c0_56] : memref<256x128xbf16, #tpu.memory_space<vmem>>, vector<256x128xbf16>
    %cst_57 = arith.constant dense<0.000000e+00> : vector<256x128xf32>
    %73 = tpu.matmul %71, %72, %cst_57 {dimension_numbers = #tpu.dot_dimension_numbers<[1], [0], [0], [1], [0, 0, 1, 1], [], []>} : vector<256x256xbf16>, vector<256x128xbf16>, vector<256x128xf32> -> vector<256x128xf32>
    %c0_58 = arith.constant 0 : index
    %c0_59 = arith.constant 0 : index
    %74 = vector.load %arg21[%c0_58, %c0_59] : memref<1x128xf32, #tpu.memory_space<vmem>>, vector<1x128xf32>
    %75 = vector.broadcast %74 : vector<1x128xf32> to vector<256x128xf32>
    %76 = arith.addf %73, %75 : vector<256x128xf32>
    %c0_60 = arith.constant 0 : index
    %c0_61 = arith.constant 0 : index
    %77 = vector.load %arg23[%c0_60, %c0_61] : memref<256x128xf32, #tpu.memory_space<vmem>>, vector<256x128xf32>
    tpu.vector_store %arg23[%c0_60, %c0_61], %76 {strides = array<i32>} : memref<256x128xf32, #tpu.memory_space<vmem>>, vector<256x128xf32>,
    return
  }
  func.func @transform_0(%arg0: i32) -> (i32, i32) {
    %c0_i32 = arith.constant 0 : i32
    %c0_i32_0 = arith.constant 0 : i32
    return %arg0, %c0_i32 : i32, i32
  }
  func.func @transform_1(%arg0: i32) -> (i32, i32) {
    %c0_i32 = arith.constant 0 : i32
    %c0_i32_0 = arith.constant 0 : i32
    return %arg0, %c0_i32 : i32, i32
  }
  func.func @transform_2(%arg0: i32) -> (i32, i32) {
    %c0_i32 = arith.constant 0 : i32
    %c0_i32_0 = arith.constant 0 : i32
    %c0_i32_1 = arith.constant 0 : i32
    return %c0_i32, %c0_i32_0 : i32, i32
  }
  func.func @transform_3(%arg0: i32) -> (i32, i32) {
    %c0_i32 = arith.constant 0 : i32
    %c0_i32_0 = arith.constant 0 : i32
    %c0_i32_1 = arith.constant 0 : i32
    return %c0_i32, %c0_i32_0 : i32, i32
  }
  func.func @transform_4(%arg0: i32) -> (i32, i32) {
    %c0_i32 = arith.constant 0 : i32
    %c0_i32_0 = arith.constant 0 : i32
    %c0_i32_1 = arith.constant 0 : i32
    return %c0_i32, %c0_i32_0 : i32, i32
  }
  func.func @transform_5(%arg0: i32) -> (i32, i32) {
    %c0_i32 = arith.constant 0 : i32
    %c0_i32_0 = arith.constant 0 : i32
    %c0_i32_1 = arith.constant 0 : i32
    return %c0_i32, %c0_i32_0 : i32, i32
  }
  func.func @transform_6(%arg0: i32) -> (i32, i32) {
    %c0_i32 = arith.constant 0 : i32
    %c0_i32_0 = arith.constant 0 : i32
    %c0_i32_1 = arith.constant 0 : i32
    return %c0_i32, %c0_i32_0 : i32, i32
  }
  func.func @transform_7(%arg0: i32) -> (i32, i32) {
    %c0_i32 = arith.constant 0 : i32
    %c0_i32_0 = arith.constant 0 : i32
    %c0_i32_1 = arith.constant 0 : i32
    return %c0_i32, %c0_i32_0 : i32, i32
  }
  func.func @transform_8(%arg0: i32) -> (i32, i32) {
    %c0_i32 = arith.constant 0 : i32
    %c0_i32_0 = arith.constant 0 : i32
    %c0_i32_1 = arith.constant 0 : i32
    return %c0_i32, %c0_i32_0 : i32, i32
  }
  func.func @transform_9(%arg0: i32) -> (i32, i32) {
    %c0_i32 = arith.constant 0 : i32
    %c0_i32_0 = arith.constant 0 : i32
    %c0_i32_1 = arith.constant 0 : i32
    return %c0_i32, %c0_i32_0 : i32, i32
  }
  func.func @transform_10(%arg0: i32) -> (i32, i32) {
    %c0_i32 = arith.constant 0 : i32
    %c0_i32_0 = arith.constant 0 : i32
    %c0_i32_1 = arith.constant 0 : i32
    return %c0_i32, %c0_i32_0 : i32, i32
  }
  func.func @transform_11(%arg0: i32) -> (i32, i32) {
    %c0_i32 = arith.constant 0 : i32
    %c0_i32_0 = arith.constant 0 : i32
    %c0_i32_1 = arith.constant 0 : i32
    return %c0_i32, %c0_i32_0 : i32, i32
  }
  func.func @transform_12(%arg0: i32) -> (i32, i32) {
    %c0_i32 = arith.constant 0 : i32
    %c0_i32_0 = arith.constant 0 : i32
    %c0_i32_1 = arith.constant 0 : i32
    return %c0_i32, %c0_i32_0 : i32, i32
  }
  func.func @transform_13(%arg0: i32) -> (i32, i32) {
    %c0_i32 = arith.constant 0 : i32
    %c0_i32_0 = arith.constant 0 : i32
    %c0_i32_1 = arith.constant 0 : i32
    return %c0_i32, %c0_i32_0 : i32, i32
  }
  func.func @transform_14(%arg0: i32) -> (i32, i32) {
    %c0_i32 = arith.constant 0 : i32
    %c0_i32_0 = arith.constant 0 : i32
    %c0_i32_1 = arith.constant 0 : i32
    return %c0_i32, %c0_i32_0 : i32, i32
  }
  func.func @transform_15(%arg0: i32) -> (i32, i32) {
    %c0_i32 = arith.constant 0 : i32
    %c0_i32_0 = arith.constant 0 : i32
    %c0_i32_1 = arith.constant 0 : i32
    return %c0_i32, %c0_i32_0 : i32, i32
  }
  func.func @transform_16(%arg0: i32) -> (i32, i32) {
    %c0_i32 = arith.constant 0 : i32
    %c0_i32_0 = arith.constant 0 : i32
    %c0_i32_1 = arith.constant 0 : i32
    return %c0_i32, %c0_i32_0 : i32, i32
  }
  func.func @transform_17(%arg0: i32) -> (i32, i32) {
    %c0_i32 = arith.constant 0 : i32
    %c0_i32_0 = arith.constant 0 : i32
    %c0_i32_1 = arith.constant 0 : i32
    return %c0_i32, %c0_i32_0 : i32, i32
  }
  func.func @transform_18(%arg0: i32) -> (i32, i32) {
    %c0_i32 = arith.constant 0 : i32
    %c0_i32_0 = arith.constant 0 : i32
    %c0_i32_1 = arith.constant 0 : i32
    return %c0_i32, %c0_i32_0 : i32, i32
  }
  func.func @transform_19(%arg0: i32) -> (i32, i32) {
    %c0_i32 = arith.constant 0 : i32
    %c0_i32_0 = arith.constant 0 : i32
    %c0_i32_1 = arith.constant 0 : i32
    return %c0_i32, %c0_i32_0 : i32, i32
  }
  func.func @transform_20(%arg0: i32) -> (i32, i32) {
    %c0_i32 = arith.constant 0 : i32
    %c0_i32_0 = arith.constant 0 : i32
    %c0_i32_1 = arith.constant 0 : i32
    return %c0_i32, %c0_i32_0 : i32, i32
  }
  func.func @transform_21(%arg0: i32) -> (i32, i32) {
    %c0_i32 = arith.constant 0 : i32
    %c0_i32_0 = arith.constant 0 : i32
    return %arg0, %c0_i32 : i32, i32
  }
  func.func @transform_22(%arg0: i32) -> (i32, i32) {
    %c0_i32 = arith.constant 0 : i32
    %c0_i32_0 = arith.constant 0 : i32
    return %arg0, %c0_i32 : i32, i32
  }
}

</mosaic_0001>

<bundles_post_ra>
// kernel: tpu_custom_call.1
= control target key start
LH: loop header
LB: loop body
LE: loop exit
PB: predicated region body
PF: predicated region fallthrough
CT: control target
= control target key end

     0   :  { %s9645_s0 = inlined_call_operand.hbm [shape: bf16[1024,128], index: 0, kind: input, shape index: {}]   ;;  %s9646_s1 = inlined_call_operand.hbm [shape: bf16[1024,128], index: 1, kind: input, shape index: {}]   ;;  %s9647_s2 = inlined_call_operand.hbm [shape: bf16[128,256], index: 2, kind: input, shape index: {}]   ;;  %s9648_s3 = inlined_call_operand.vmem [shape: f32[1,256], index: 3, kind: input, shape index: {}]   ;;  %s9649_s4 = inlined_call_operand.hbm [shape: bf16[256,256], index: 4, kind: input, shape index: {}]   ;;  %s9650_s5 = inlined_call_operand.vmem [shape: f32[1,256], index: 5, kind: input, shape index: {}]   ;;  %s9651_s6 = inlined_call_operand.hbm [shape: bf16[256,256], index: 6, kind: input, shape index: {}]   ;;  %s9652_s7 = inlined_call_operand.vmem [shape: f32[1,256], index: 7, kind: input, shape index: {}]   ;;  %s9653_s8 = inlined_call_operand.hbm [shape: bf16[256,256], index: 8, kind: input, shape index: {}]   ;;  %s9654_s9 = inlined_call_operand.vmem [shape: f32[1,256], index: 9, kind: input, shape index: {}]   ;;  %s9655_s10 = inlined_call_operand.hbm [shape: bf16[256,384], index: 10, kind: input, shape index: {}]   ;;  %s9656_s11 = inlined_call_operand.vmem [shape: f32[1,384], index: 11, kind: input, shape index: {}]   ;;  %s9657_s12 = inlined_call_operand.hbm [shape: bf16[256,256], index: 12, kind: input, shape index: {}]   ;;  %s9658_s13 = inlined_call_operand.hbm [shape: bf16[128,256], index: 13, kind: input, shape index: {}]   ;;  %s9659_s14 = inlined_call_operand.vmem [shape: f32[1,256], index: 14, kind: input, shape index: {}]   ;;  %s9660_s15 = inlined_call_operand.hbm [shape: bf16[256,256], index: 15, kind: input, shape index: {}]   ;;  %s9661_s16 = inlined_call_operand.vmem [shape: f32[1,256], index: 16, kind: input, shape index: {}]   ;;  %s9662_s17 = inlined_call_operand.hbm [shape: bf16[256,256], index: 17, kind: input, shape index: {}]   ;;  %s9663_s18 = inlined_call_operand.vmem [shape: f32[1,256], index: 18, kind: input, shape index: {}]   ;;  %s9664_s19 = inlined_call_operand.hbm [shape: bf16[256,128], index: 19, kind: input, shape index: {}]   ;;  %s9665_s20 = inlined_call_operand.vmem [shape: f32[1,128], index: 20, kind: input, shape index: {}]   ;;  %s9666_s21 = inlined_call_operand.hbm [shape: f32[1024,128], index: 21, kind: output, shape index: {0}]   ;;  %s9667_s22 = inlined_call_operand.hbm [shape: f32[1024,128], index: 22, kind: output, shape index: {1}]  }
   0x1   :  { %9689 = sst [smem:[#allocation35_spill]] %s9645_s0 }
   0x2   :  { %9690 = sst [smem:[#allocation36_spill]] %s9646_s1 }
   0x3   :  { %9691 = sst [smem:[#allocation37_spill]] %s9647_s2 }
   0x4   :  { %9692 = sst [smem:[#allocation38_spill]] %s9648_s3 }
   0x5   :  { %9693 = sst [smem:[#allocation39_spill]] %s9649_s4 }
   0x6   :  { %9694 = sst [smem:[#allocation40_spill]] %s9650_s5 }
   0x7   :  { %9695 = sst [smem:[#allocation41_spill]] %s9651_s6 }
   0x8   :  { %9696 = sst [smem:[#allocation42_spill]] %s9652_s7 }
   0x9   :  { %9697 = sst [smem:[#allocation43_spill]] %s9653_s8 }
   0xa   :  { %9698 = sst [smem:[#allocation44_spill]] %s9654_s9 }
   0xb   :  { %9699 = sst [smem:[#allocation45_spill]] %s9655_s10 }
   0xc   :  { %9700 = sst [smem:[#allocation46_spill]] %s9656_s11 }
   0xd   :  { %9701 = sst [smem:[#allocation47_spill]] %s9657_s12 }
   0xe   :  { %9702 = sst [smem:[#allocation48_spill]] %s9658_s13 }
   0xf   :  { %9703 = sst [smem:[#allocation49_spill]] %s9659_s14 }
  0x10   :  { %9704 = sst [smem:[#allocation50_spill]] %s9660_s15 }
  0x11   :  { %9705 = sst [smem:[#allocation51_spill]] %s9661_s16 }
  0x12   :  { %9706 = sst [smem:[#allocation52_spill]] %s9663_s18 }
  0x13   :  { %9707 = sst [smem:[#allocation53_spill]] %s9665_s20 }
  0x14   :  { %9708 = sst [smem:[#allocation54_spill]] %s9666_s21 }
  0x15   :  { %9709 = sst [smem:[#allocation55_spill]] %s9667_s22 }
  0x16   :  { %28 = vsyncpa [#allocation3], 0 }
  0x17   :  { %30 = vsyncpa [#allocation3 + $0x1], 0 }
  0x18   :  { %31 = vsyncpa [#allocation6], 0 }
  0x19   :  { %33 = vsyncpa [#allocation6 + $0x1], 0 }
  0x1a   :  { %34 = vsyncpa [#allocation9], 0 }
  0x1b   :  { %35 = vsyncpa [#allocation12], 0 }
  0x1c   :  { %36 = vsyncpa [#allocation15], 0 }
  0x1d   :  { %37 = vsyncpa [#allocation18], 0 }
  0x1e   :  { %38 = vsyncpa [#allocation21], 0 }
  0x1f   :  { %39 = vsyncpa [#allocation4], 0 }
  0x20   :  { %41 = vsyncpa [#allocation4 + $0x1], 0 }
  0x21   :  { %42 = vsyncpa [#allocation24], 0 }
  0x22   :  { %44 = vsyncpa [#allocation24 + $0x1], 0  ;;  %s8195_s3 = smov 0   ;;  %s8197_s28 = smov 0  }
  0x23   :  { %s8199_s29 = smov 0   ;;  %s8201_s30 = smov 0  }
  0x24 LB: > { %s8057_s4 = smov [#allocation7]   ;;  %s8216_s23 = sadd.s32 4294967295, %s8055_s30   ;;  %s8055_s30 = sphi %s8201_s30, %s9762_s30   ;;  %s8051_s29 = sphi %s8199_s29, %s9761_s29   ;;  %s8047_s28 = sphi %s8197_s28, %s9760_s28   ;;  %s8043_s3 = sphi %s8195_s3, %s9759_s3  }
  0x25   : > { %s570_s0 = sshll.u32 %s8057_s4, 4  ;;  %p6305_p0 = scmp.ge.s32.totalorder %s8055_s30, 1  ;;  %s8221_s0 = int_to_ptr.vmem [resolvable:$true] %s570_s0 }
  0x26   : > { %p9676_p1 = scmp.eq.s32.totalorder %s8216_s23, 0  ;;  %p558_p2 = scmp.lt.s32.totalorder %s8055_s30, 5 }
  0x27   : > { %s8058_s5 = smov [#allocation8]   ;;  %s8059_s25 = smov [#allocation11]  }
  0x28   : > { %p8223_p3 = pnand %p6305_p0, %p558_p2  ;;  %s586_s24 = sshll.u32 %s8058_s5, 4  ;;  %s8235_s24 = int_to_ptr.vmem [resolvable:$true] %s586_s24 }
  0x29   : > { %s618_s26 = sshll.u32 %s8059_s25, 4  ;;  %s9712_s4 = sld [smem:[#allocation37_spill]]  ;;  %s8237_s26 = int_to_ptr.vmem [resolvable:$true] %s618_s26 }
  0x2a   : > { %s9710_s1 = scalar_select %p8223_p3, 1, 0 }
  0x2b   : > { %p7023_p4 = pneg %p8223_p3 }
  0x2d   : > { %p8231_p5 = pnand %p7023_p4, %p9676_p1 }
  0x2f   : > { %s7589_s22 = scalar_lea.hbm %s9712_s4, 2048  ;;  %p8247_p7 = pneg %p8231_p5 }
  0x30   : > { %p7590_p6 = scmp.ne.s32.totalorder %s9712_s4, %s7589_s22  ;;  %p7596_p10 = scmp.lt.u32.totalorder %s7589_s22, %s9712_s4 }
  0x32   : > { %p7592_p8 = pnand %p8247_p7, %p7590_p6 }
  0x34   : > { %p7593_p9 = pneg %p7592_p8 }
  0x36   : > { %p7598_p11 = pnand %p7596_p10, %p7593_p9 }
  0x38   : > { %7601 = shalt.err (!%p7598_p11)
}
  0x39   : > { %s7602_s20 = scalar_lea.vmem %s8221_s0, 2048  ;;  %p7610_p2 = scmp.lt.s32.totalorder %s8221_s0, %s8221_s0 }
  0x3a   : > { %p7603_p12 = scmp.ne.s32.totalorder %s8221_s0, %s7602_s20  ;;  %p7611_p4 = scmp.lt.s32.totalorder %s7602_s20, %s7602_s20 }
  0x3c   : > { %p7605_p13 = pnand %p7603_p12, %p8247_p7  ;;  %p7612_p6 = por %p7611_p4, %p7610_p2 }
  0x3e   : > { %p7606_p0 = pneg %p7605_p13 }
  0x40   : > { %p7613_p8 = pnand %p7612_p6, %p7606_p0 }
  0x42   : > { %7616 = shalt.err (!%p7613_p8)
}
  0x43   : > { %s9678_s21 = smov 128   ;;  %s9680_s18 = smov 8  }
  0x44   : > { %7026 = dma.hbm_to_vmem [thread:$0]  (!%p8231_p5), %s9712_s4, 2048, %s8221_s0, [#allocation6], %s9678_s21, %s9678_s21, %s9680_s18  }
  0x45   : > { %s9714_s16 = sld [smem:[#allocation39_spill]] }
  0x4b   : > { %s7617_s20 = scalar_lea.hbm %s9714_s16, 4096 }
  0x4c   : > { %p7618_p9 = scmp.ne.s32.totalorder %s9714_s16, %s7617_s20  ;;  %p7624_p12 = scmp.lt.u32.totalorder %s7617_s20, %s9714_s16 }
  0x4e   : > { %p7620_p10 = pnand %p7618_p9, %p8247_p7 }
  0x50   : > { %p7621_p11 = pneg %p7620_p10 }
  0x52   : > { %p7626_p13 = pnand %p7624_p12, %p7621_p11 }
  0x54   : > { %7629 = shalt.err (!%p7626_p13)
}
  0x55   : > { %s7630_s0 = scalar_lea.vmem %s8235_s24, 4096  ;;  %p7638_p6 = scmp.lt.s32.totalorder %s8235_s24, %s8235_s24 }
  0x56   : > { %p7631_p0 = scmp.ne.s32.totalorder %s8235_s24, %s7630_s0  ;;  %p7639_p8 = scmp.lt.s32.totalorder %s7630_s0, %s7630_s0 }
  0x58   : > { %p7633_p2 = pnand %p7631_p0, %p8247_p7  ;;  %p7640_p9 = por %p7639_p8, %p7638_p6 }
  0x5a   : > { %p7634_p4 = pneg %p7633_p2 }
  0x5c   : > { %p7641_p10 = pnand %p7640_p9, %p7634_p4 }
  0x5e   : > { %7644 = shalt.err (!%p7641_p10)
}
  0x5f   : > { %7029 = dma.hbm_to_vmem [thread:$0]  (!%p8231_p5), %s9714_s16, 4096, %s8235_s24, [#allocation9], %s9678_s21, %s9678_s21, %s9680_s18  }
  0x60   : > { %s9715_s8 = sld [smem:[#allocation43_spill]] }
  0x66   : > { %s7645_s22 = scalar_lea.hbm %s9715_s8, 4096 }
  0x67   : > { %p7646_p11 = scmp.ne.s32.totalorder %s9715_s8, %s7645_s22  ;;  %p7652_p0 = scmp.lt.u32.totalorder %s7645_s22, %s9715_s8 }
  0x69   : > { %p7648_p12 = pnand %p7646_p11, %p8247_p7 }
  0x6b   : > { %p7649_p13 = pneg %p7648_p12 }
  0x6d   : > { %p7654_p2 = pnand %p7652_p0, %p7649_p13 }
  0x6f   : > { %7657 = shalt.err (!%p7654_p2)
}
  0x70   : > { %s7658_s24 = scalar_lea.vmem %s8237_s26, 4096  ;;  %p7666_p9 = scmp.lt.s32.totalorder %s8237_s26, %s8237_s26 }
  0x71   : > { %p7659_p4 = scmp.ne.s32.totalorder %s8237_s26, %s7658_s24  ;;  %p7667_p10 = scmp.lt.s32.totalorder %s7658_s24, %s7658_s24 }
  0x73   : > { %p7661_p6 = pnand %p7659_p4, %p8247_p7  ;;  %p7668_p11 = por %p7667_p10, %p7666_p9 }
  0x75   : > { %p7662_p8 = pneg %p7661_p6 }
  0x77   : > { %p7669_p12 = pnand %p7668_p11, %p7662_p8 }
  0x79   : > { %7672 = shalt.err (!%p7669_p12)
}
  0x7a   : > { %7035 = dma.hbm_to_vmem [thread:$0]  (!%p8231_p5), %s9715_s8, 4096, %s8237_s26, [#allocation12], %s9678_s21, %s9678_s21, %s9680_s18  }
  0x7b   : > { %s8062_s9 = smov [#allocation14]   ;;  %s8063_s14 = smov [#allocation17]  }
  0x7c   : > { %s650_s11 = sshll.u32 %s8062_s9, 4  ;;  %s679_s22 = sshll.u32 %s8063_s14, 4  ;;  %s651_s11 = int_to_ptr.vmem [resolvable:$true] %s650_s11  ;;  %s680_s22 = int_to_ptr.vmem [resolvable:$true] %s679_s22 }
  0x7d   : > { %s9716_s12 = sld [smem:[#allocation47_spill]] }
  0x83   : > { %s7673_s25 = scalar_lea.hbm %s9716_s12, 4096 }
  0x84   : > { %p7674_p13 = scmp.ne.s32.totalorder %s9716_s12, %s7673_s25  ;;  %p7680_p4 = scmp.lt.u32.totalorder %s7673_s25, %s9716_s12 }
  0x86   : > { %p7676_p0 = pnand %p7674_p13, %p8247_p7 }
  0x88   : > { %p7677_p2 = pneg %p7676_p0 }
  0x8a   : > { %p7682_p6 = pnand %p7680_p4, %p7677_p2 }
  0x8c   : > { %7685 = shalt.err (!%p7682_p6)
}
  0x8d   : > { %s7686_s26 = scalar_lea.vmem %s651_s11, 4096  ;;  %p7694_p11 = scmp.lt.s32.totalorder %s651_s11, %s651_s11 }
  0x8e   : > { %p7687_p8 = scmp.ne.s32.totalorder %s651_s11, %s7686_s26  ;;  %p7695_p12 = scmp.lt.s32.totalorder %s7686_s26, %s7686_s26 }
  0x90   : > { %p7689_p9 = pnand %p7687_p8, %p8247_p7  ;;  %p7696_p1 = por %p7695_p12, %p7694_p11 }
  0x92   : > { %p7690_p10 = pneg %p7689_p9 }
  0x94   : > { %p7697_p3 = pnand %p7696_p1, %p7690_p10 }
  0x96   : > { %7700 = shalt.err (!%p7697_p3)
}
  0x97   : > { %7041 = dma.hbm_to_vmem [thread:$0]  (!%p8231_p5), %s9716_s12, 4096, %s651_s11, [#allocation15], %s9678_s21, %s9678_s21, %s9680_s18  }
  0x98   : > { %s9717_s15 = sld [smem:[#allocation50_spill]] }
  0x9e   : > { %s7701_s2 = scalar_lea.hbm %s9717_s15, 4096 }
  0x9f   : > { %p7702_p1 = scmp.ne.s32.totalorder %s9717_s15, %s7701_s2  ;;  %p7708_p0 = scmp.lt.u32.totalorder %s7701_s2, %s9717_s15 }
  0xa1   : > { %p7704_p3 = pnand %p7702_p1, %p8247_p7 }
  0xa3   : > { %p7705_p13 = pneg %p7704_p3 }
  0xa5   : > { %p7710_p2 = pnand %p7708_p0, %p7705_p13 }
  0xa7   : > { %7713 = shalt.err (!%p7710_p2)
}
  0xa8   : > { %s7714_s0 = scalar_lea.vmem %s680_s22, 4096  ;;  %p7722_p9 = scmp.lt.s32.totalorder %s680_s22, %s680_s22 }
  0xa9   : > { %p7715_p4 = scmp.ne.s32.totalorder %s680_s22, %s7714_s0  ;;  %p7723_p10 = scmp.lt.s32.totalorder %s7714_s0, %s7714_s0 }
  0xab   : > { %p7717_p6 = pnand %p7715_p4, %p8247_p7  ;;  %p7724_p11 = por %p7723_p10, %p7722_p9 }
  0xad   : > { %p7718_p8 = pneg %p7717_p6 }
  0xaf   : > { %p7725_p12 = pnand %p7724_p11, %p7718_p8 }
  0xb1   : > { %7728 = shalt.err (!%p7725_p12)
}
  0xb2   : > { %7047 = dma.hbm_to_vmem [thread:$0]  (!%p8231_p5), %s9717_s15, 4096, %s680_s22, [#allocation18], %s9678_s21, %s9678_s21, %s9680_s18  }
  0xb3   : > { %s8064_s4 = smov [#allocation10]   ;;  %s8065_s9 = smov [#allocation13]  }
  0xb4   : > { %s602_s7 = sshll.u32 %s8064_s4, 4  ;;  %s634_s14 = sshll.u32 %s8065_s9, 4  ;;  %s603_s7 = int_to_ptr.vmem [resolvable:$true] %s602_s7  ;;  %s635_s14 = int_to_ptr.vmem [resolvable:$true] %s634_s14 }
  0xb5   : > { %s9718_s25 = sld [smem:[#allocation41_spill]] }
  0xbb   : > { %s7729_s20 = scalar_lea.hbm %s9718_s25, 4096 }
  0xbc   : > { %p7730_p1 = scmp.ne.s32.totalorder %s9718_s25, %s7729_s20  ;;  %p7736_p0 = scmp.lt.u32.totalorder %s7729_s20, %s9718_s25 }
  0xbe   : > { %p7732_p3 = pnand %p7730_p1, %p8247_p7 }
  0xc0   : > { %p7733_p13 = pneg %p7732_p3 }
  0xc2   : > { %p7738_p2 = pnand %p7736_p0, %p7733_p13 }
  0xc4   : > { %7741 = shalt.err (!%p7738_p2)
}
  0xc5   : > { %s7742_s22 = scalar_lea.vmem %s603_s7, 4096  ;;  %p7750_p9 = scmp.lt.s32.totalorder %s603_s7, %s603_s7 }
  0xc6   : > { %p7743_p4 = scmp.ne.s32.totalorder %s603_s7, %s7742_s22  ;;  %p7751_p10 = scmp.lt.s32.totalorder %s7742_s22, %s7742_s22 }
  0xc8   : > { %p7745_p6 = pnand %p7743_p4, %p8247_p7  ;;  %p7752_p11 = por %p7751_p10, %p7750_p9 }
  0xca   : > { %p7746_p8 = pneg %p7745_p6 }
  0xcc   : > { %p7753_p12 = pnand %p7752_p11, %p7746_p8 }
  0xce   : > { %7756 = shalt.err (!%p7753_p12)
}
  0xcf   : > { %7032 = dma.hbm_to_vmem [thread:$0]  (!%p8231_p5), %s9718_s25, 4096, %s603_s7, [#allocation9], %s9678_s21, %s9678_s21, %s9680_s18  }
  0xd0   : > { %s9719_s10 = sld [smem:[#allocation45_spill]] }
  0xd6   : > { %s7757_s2 = scalar_lea.hbm %s9719_s10, 6144 }
  0xd7   : > { %p7758_p1 = scmp.ne.s32.totalorder %s9719_s10, %s7757_s2  ;;  %p7764_p0 = scmp.lt.u32.totalorder %s7757_s2, %s9719_s10 }
  0xd9   : > { %p7760_p3 = pnand %p7758_p1, %p8247_p7 }
  0xdb   : > { %p7761_p13 = pneg %p7760_p3 }
  0xdd   : > { %p7766_p2 = pnand %p7764_p0, %p7761_p13 }
  0xdf   : > { %7769 = shalt.err (!%p7766_p2)
}
  0xe0   : > { %s7770_s11 = scalar_lea.vmem %s635_s14, 6144  ;;  %p7778_p9 = scmp.lt.s32.totalorder %s635_s14, %s635_s14 }
  0xe1   : > { %p7771_p4 = scmp.ne.s32.totalorder %s635_s14, %s7770_s11  ;;  %p7779_p10 = scmp.lt.s32.totalorder %s7770_s11, %s7770_s11 }
  0xe3   : > { %p7773_p6 = pnand %p7771_p4, %p8247_p7  ;;  %p7780_p11 = por %p7779_p10, %p7778_p9 }
  0xe5   : > { %p7774_p8 = pneg %p7773_p6 }
  0xe7   : > { %p7781_p12 = pnand %p7780_p11, %p7774_p8 }
  0xe9   : > { %7784 = shalt.err (!%p7781_p12)
}
  0xea   : > { %s8066_s7 = smov 192   ;;  %s8067_s22 = smov 12  }
  0xeb   : > { %7038 = dma.hbm_to_vmem [thread:$0]  (!%p8231_p5), %s9719_s10, 6144, %s635_s14, [#allocation12], %s8066_s7, %s8066_s7, %s8067_s22  }
  0xec   : > { %s8068_s4 = smov [#allocation16]   ;;  %s8069_s2 = smov [#allocation19]  }
  0xed   : > { %s663_s9 = sshll.u32 %s8068_s4, 4  ;;  %s695_s27 = sshll.u32 %s8069_s2, 4  ;;  %s664_s9 = int_to_ptr.vmem [resolvable:$true] %s663_s9  ;;  %s696_s27 = int_to_ptr.vmem [resolvable:$true] %s695_s27 }
  0xee   : > { %s9720_s13 = sld [smem:[#allocation48_spill]] }
  0xf4   : > { %s7785_s0 = scalar_lea.hbm %s9720_s13, 2048 }
  0xf5   : > { %p7786_p1 = scmp.ne.s32.totalorder %s9720_s13, %s7785_s0  ;;  %p7792_p0 = scmp.lt.u32.totalorder %s7785_s0, %s9720_s13 }
  0xf7   : > { %p7788_p3 = pnand %p7786_p1, %p8247_p7 }
  0xf9   : > { %p7789_p13 = pneg %p7788_p3 }
  0xfb   : > { %p7794_p2 = pnand %p7792_p0, %p7789_p13 }
  0xfd   : > { %7797 = shalt.err (!%p7794_p2)
}
  0xfe   : > { %s7798_s14 = scalar_lea.vmem %s664_s9, 2048  ;;  %p7806_p9 = scmp.lt.s32.totalorder %s664_s9, %s664_s9 }
  0xff   : > { %p7799_p4 = scmp.ne.s32.totalorder %s664_s9, %s7798_s14  ;;  %p7807_p10 = scmp.lt.s32.totalorder %s7798_s14, %s7798_s14 }
 0x101   : > { %p7801_p6 = pnand %p7799_p4, %p8247_p7  ;;  %p7808_p11 = por %p7807_p10, %p7806_p9 }
 0x103   : > { %p7802_p8 = pneg %p7801_p6 }
 0x105   : > { %p7809_p12 = pnand %p7808_p11, %p7802_p8 }
 0x107   : > { %7812 = shalt.err (!%p7809_p12)
}
 0x108   : > { %s9721_s21 = smov 8   ;;  %s9722_s7 = smov 128  }
 0x109   : > { %7044 = dma.hbm_to_vmem [thread:$0]  (!%p8231_p5), %s9720_s13, 2048, %s664_s9, [#allocation15], %s9722_s7, %s9722_s7, %s9721_s21  }
 0x10a   : > { %s7813_s26 = scalar_lea.hbm %s9662_s17, 4096 }
 0x10b   : > { %p7814_p1 = scmp.ne.s32.totalorder %s9662_s17, %s7813_s26  ;;  %p7820_p0 = scmp.lt.u32.totalorder %s7813_s26, %s9662_s17 }
 0x10d   : > { %p7816_p3 = pnand %p7814_p1, %p8247_p7 }
 0x10f   : > { %p7817_p13 = pneg %p7816_p3 }
 0x111   : > { %p7822_p2 = pnand %p7820_p0, %p7817_p13 }
 0x113   : > { %7825 = shalt.err (!%p7822_p2)
}
 0x114   : > { %s7826_s0 = scalar_lea.vmem %s696_s27, 4096  ;;  %p7834_p9 = scmp.lt.s32.totalorder %s696_s27, %s696_s27 }
 0x115   : > { %p7827_p4 = scmp.ne.s32.totalorder %s696_s27, %s7826_s0  ;;  %p7835_p10 = scmp.lt.s32.totalorder %s7826_s0, %s7826_s0 }
 0x117   : > { %p7829_p6 = pnand %p7827_p4, %p8247_p7  ;;  %p7836_p11 = por %p7835_p10, %p7834_p9 }
 0x119   : > { %p7830_p8 = pneg %p7829_p6 }
 0x11b   : > { %p7837_p12 = pnand %p7836_p11, %p7830_p8 }
 0x11d   : > { %7840 = shalt.err (!%p7837_p12)
}
 0x11e   : > { %7050 = dma.hbm_to_vmem [thread:$0]  (!%p8231_p5), %s9662_s17, 4096, %s696_s27, [#allocation18], %s9722_s7, %s9722_s7, %s9721_s21  }
 0x11f   : > { %s8070_s14 = smov [#allocation20]   ;;  %s7841_s8 = scalar_lea.hbm %s9664_s19, 2048 }
 0x120   : > { %s711_s12 = sshll.u32 %s8070_s14, 4  ;;  %p7842_p1 = scmp.ne.s32.totalorder %s9664_s19, %s7841_s8  ;;  %s712_s12 = int_to_ptr.vmem [resolvable:$true] %s711_s12 }
 0x121   : > { %p7848_p0 = scmp.lt.u32.totalorder %s7841_s8, %s9664_s19 }
 0x122   : > { %p7844_p3 = pnand %p7842_p1, %p8247_p7 }
 0x124   : > { %p7845_p13 = pneg %p7844_p3 }
 0x126   : > { %p7850_p2 = pnand %p7848_p0, %p7845_p13 }
 0x128   : > { %7853 = shalt.err (!%p7850_p2)
}
 0x129   : > { %s7854_s27 = scalar_lea.vmem %s712_s12, 2048  ;;  %p7862_p9 = scmp.lt.s32.totalorder %s712_s12, %s712_s12 }
 0x12a   : > { %p7855_p4 = scmp.ne.s32.totalorder %s712_s12, %s7854_s27  ;;  %p7863_p10 = scmp.lt.s32.totalorder %s7854_s27, %s7854_s27 }
 0x12c   : > { %p7857_p6 = pnand %p7855_p4, %p8247_p7  ;;  %p7864_p11 = por %p7863_p10, %p7862_p9 }
 0x12e   : > { %p7858_p8 = pneg %p7857_p6 }
 0x130   : > { %p7865_p12 = pnand %p7864_p11, %p7858_p8 }
 0x132   : > { %7868 = shalt.err (!%p7865_p12)
}
 0x133   : > { %s9682_s21 = smov 64   ;;  %s9684_s5 = smov 4  }
 0x134   : > { %7053 = dma.hbm_to_vmem [thread:$0]  (!%p8231_p5), %s9664_s19, 2048, %s712_s12, [#allocation21], %s9682_s21, %s9682_s21, %s9684_s5  }
 0x135   : > { %s6304_s0 = sadd.s32 4294967294, %s8055_s30   ;;  %s8469_s9 = sadd.s32 1, %s8055_s30  }
 0x136   : > { %s54_s11 = ssub.s32 %s8055_s30, %s8469_s9  ;;  %s57_s14 = sadd.s32 1, %s8051_s29 }
 0x137   : > { %p55_p7 = scmp.eq.s32.totalorder %s54_s11, 0  ;;  %p64_p1 = scmp.ne.s32.totalorder %s8051_s29, %s8047_s28 }
 0x138   : > { %p65_p3 = scmp.eq.s32.totalorder %s8055_s30, 0  ;;  %p70_p13 = scmp.ne.s32.totalorder %s8047_s28, %s8043_s3 }
 0x139   : > { %s8480_s6 = scalar_select %p55_p7, %s8051_s29, %s57_s14  }
 0x13a   : > { %p8482_p0 = por %p65_p3, %p64_p1  ;;  %p9724_p2 = scmp.eq.s32.totalorder %s8216_s23, 0 }
 0x13b   : > { %p519_p4 = scmp.eq.s32.totalorder %s8216_s23, 3  ;;  %p525_p6 = scmp.eq.s32.totalorder %s6304_s0, 3 }
 0x13c   : > { %p8488_p5 = por %p9724_p2, %p70_p13  ;;  %p7078_p8 = scmp.lt.s32.totalorder %s8055_s30, 4 }
 0x13d   : > { %s728_s22 = sand.u32 1, %s8051_s29   ;;  %p8495_p9 = por %p519_p4, %p64_p1 }
 0x13e   : > { %p8499_p10 = por %p525_p6, %p70_p13  ;;  %s6317_s4 = sshll.u32 %s728_s22, 7 }
 0x13f   : > { %s9726_s8 = scalar_select %p8495_p9, 1, 0 }
 0x140   : > { %s9727_s26 = scalar_select %p8499_p10, 1, 0 }
 0x141   : > { %s6667_s2 = sshll.u32 %s8055_s30, 11  ;;  %s9728_s7 = sld [smem:[#allocation35_spill]] }
 0x142   : > { %s732_s0 = scalar_lea.vmem [#allocation2], %s6317_s4  ;;  %p8513_p11 = pnand %p7078_p8, %p8482_p0 }
 0x143   : > { %s739_s11 = sshll.u32 %s732_s0, 4  ;;  %s9730_s10 = sld [smem:[#allocation36_spill]]  ;;  %s8509_s11 = int_to_ptr.vmem [resolvable:$true] %s739_s11 }
 0x144   : > { %s753_s27 = scalar_lea.vmem [#allocation5], %s6317_s4  ;;  %s8524_s15 = scalar_lea.sflag [#allocation3], %s728_s22 }
 0x145   : > { %s8522_s13 = sshll.u32 %s753_s27, 4  ;;  %p7871_p7 = pneg %p8513_p11  ;;  %s8556_s13 = int_to_ptr.vmem [resolvable:$true] %s8522_s13 }
 0x147   : > { %s8507_s24 = scalar_lea.hbm %s9728_s7, %s6667_s2  ;;  %s7874_s21 = scalar_lea.hbm %s9728_s7, 8192 }
 0x148   : > { %s7869_s0 = scalar_lea.hbm %s8507_s24, 2048  ;;  %p7875_p13 = scmp.lt.u32.totalorder %s8507_s24, %s9728_s7 }
 0x149   : > { %s8520_s20 = scalar_lea.hbm %s9730_s10, %s6667_s2  ;;  %p7870_p12 = scmp.ne.s32.totalorder %s8507_s24, %s7869_s0 }
 0x14a   : > { %p7876_p0 = scmp.lt.u32.totalorder %s7874_s21, %s7869_s0  ;;  %p7878_p4 = scmp.lt.u32.totalorder %s7869_s0, %s8507_s24 }
 0x14b   : > { %p7872_p1 = pnand %p7871_p7, %p7870_p12 }
 0x14c   : > { %p7877_p2 = por %p7876_p0, %p7875_p13 }
 0x14d   : > { %p7873_p3 = pneg %p7872_p1 }
 0x14e   : > { %p7879_p6 = por %p7878_p4, %p7877_p2 }
 0x150   : > { %p7880_p8 = pnand %p7879_p6, %p7873_p3 }
 0x152   : > { %7883 = shalt.err (!%p7880_p8)
}
 0x153   : > { %s7884_s22 = scalar_lea.vmem %s8509_s11, 2048  ;;  %s8073_s16 = smov [#allocation2]  }
 0x154   : > { %p7885_p12 = scmp.ne.s32.totalorder %s8509_s11, %s7884_s22  ;;  %s7889_s4 = sshll.u32 %s8073_s16, 4  ;;  %s7890_s4 = int_to_ptr.vmem [resolvable:$false] %s7889_s4 }
 0x155   : > { %s7891_s27 = scalar_lea.vmem %s7890_s4, 4096  ;;  %p7892_p9 = scmp.lt.s32.totalorder %s8509_s11, %s7890_s4 }
 0x156   : > { %p7887_p1 = pnand %p7885_p12, %p7871_p7  ;;  %p7893_p13 = scmp.lt.s32.totalorder %s7891_s27, %s7884_s22 }
 0x158   : > { %p7888_p10 = pneg %p7887_p1  ;;  %p7894_p0 = por %p7893_p13, %p7892_p9 }
 0x15a   : > { %p7895_p2 = pnand %p7894_p0, %p7888_p10 }
 0x15c   : > { %7898 = shalt.err (!%p7895_p2)
}
 0x15d   : > { %s9731_s0 = smov 4   ;;  %s9732_s18 = smov 64  }
 0x15e   : > { %7057 = dma.hbm_to_vmem [thread:$0]  (!%p8513_p11), %s8507_s24, 2048, %s8509_s11, %s8524_s15, %s9732_s18, %s9732_s18, %s9731_s0  }
 0x15f   : > { %s749_s21 = sand.u32 1, %s8055_s30   ;;  %s7899_s2 = scalar_lea.hbm %s8520_s20, 2048 }
 0x160   : > { %s8559_s5 = scalar_lea.sflag [#allocation6], %s749_s21  ;;  %p7900_p9 = scmp.ne.s32.totalorder %s8520_s20, %s7899_s2 }
 0x161   : > { %s7904_s4 = scalar_lea.hbm %s9730_s10, 8192  ;;  %p7905_p4 = scmp.lt.u32.totalorder %s8520_s20, %s9730_s10 }
 0x162   : > { %p7902_p10 = pnand %p7900_p9, %p7871_p7  ;;  %p7906_p6 = scmp.lt.u32.totalorder %s7904_s4, %s7899_s2 }
 0x163   : > { %p7908_p12 = scmp.lt.u32.totalorder %s7899_s2, %s8520_s20 }
 0x164   : > { %p7903_p3 = pneg %p7902_p10  ;;  %p7907_p8 = por %p7906_p6, %p7905_p4 }
 0x166   : > { %p7909_p1 = por %p7908_p12, %p7907_p8 }
 0x168   : > { %p7910_p13 = pnand %p7909_p1, %p7903_p3 }
 0x16a   : > { %7913 = shalt.err (!%p7910_p13)
}
 0x16b   : > { %s7914_s15 = scalar_lea.vmem %s8556_s13, 2048  ;;  %s8074_s24 = smov [#allocation5]  }
 0x16c   : > { %p7915_p0 = scmp.ne.s32.totalorder %s8556_s13, %s7914_s15  ;;  %s7919_s11 = sshll.u32 %s8074_s24, 4  ;;  %s7920_s11 = int_to_ptr.vmem [resolvable:$false] %s7919_s11 }
 0x16d   : > { %s7921_s7 = scalar_lea.vmem %s7920_s11, 4096  ;;  %p7922_p10 = scmp.lt.s32.totalorder %s8556_s13, %s7920_s11 }
 0x16e   : > { %p7917_p2 = pnand %p7915_p0, %p7871_p7  ;;  %p7923_p4 = scmp.lt.s32.totalorder %s7921_s7, %s7914_s15 }
 0x170   : > { %p7918_p9 = pneg %p7917_p2  ;;  %p7924_p6 = por %p7923_p4, %p7922_p10 }
 0x172   : > { %p7925_p8 = pnand %p7924_p6, %p7918_p9 }
 0x174   : > { %7928 = shalt.err (!%p7925_p8)
}
 0x175   : > { %7060 = dma.hbm_to_vmem [thread:$0]  (!%p8513_p11), %s8520_s20, 2048, %s8556_s13, %s8559_s5, %s9732_s18, %s9732_s18, %s9731_s0  }
 0x176   : > { %p9733_p7 = scmp.ne.s32.totalorder %s9710_s1, 0 }
 0x177   : > { %s8591_s21 = sand.u32 (!%p9733_p7), 1, %s8047_s28  }
 0x178   : > { %772 = sbr.rel (%p9733_p7) target bundleno = 2603 (0xa2b), region = 104  ;;  %s6324_s2 = sshll.u32 (!%p9733_p7), %s8591_s21, 7 }
 0x179   : > { %s775_s22 = scalar_lea.sflag (!%p9733_p7), [#allocation3], %s8591_s21  ;;  %s8595_s16 = scalar_lea.vmem (!%p9733_p7), [#allocation2], %s6324_s2 }
 0x17f   : > { %8002 = dma.done.wait (%p8488_p5), %s775_s22, 2048  }
 0x180   : > { %8004 = vsyncadd (%p8488_p5), %s775_s22, 4294965248  ;;  %s783_s13 = sand.u32 1, %s8216_s23   ;;  %s8602_s14 = scalar_lea.vmem [#allocation5], %s6324_s2 }
 0x181   : > { %s784_s1 = scalar_lea.sflag [#allocation6], %s783_s13 }
 0x182   : > { %8006 = dma.done.wait (%p8488_p5), %s784_s1, 2048  }
 0x183   : > { %8008 = vsyncadd (%p8488_p5), %s784_s1, 4294965248  ;;  %p9734_p11 = scmp.eq.s32.totalorder %s8216_s23, 0 }
 0x185   : > { %8010 = dma.done.wait (%p9734_p11), [#allocation6], 2048   ;;  %p9735_p3 = pmov %p9734_p11 }
 0x187   : > { %8012 = vsyncadd (%p9735_p3), [#allocation6], 4294965248  ;;  %p9736_p12 = pmov %p9735_p3 }
 0x188   : > { %p9737_p1 = pmov %p9735_p3 }
 0x189   : > { %8014 = dma.done.wait (%p9736_p12), [#allocation9], 8192  }
 0x18a   : > { %8016 = vsyncadd (%p9737_p1), [#allocation9], 4294959104  ;;  %p9738_p13 = pmov %p9737_p1 }
 0x18b   : > { %p9739_p0 = pmov %p9737_p1 }
 0x18c   : > { %8018 = dma.done.wait (%p9738_p13), [#allocation12], 10240  }
 0x18d   : > { %8020 = vsyncadd (%p9739_p0), [#allocation12], 4294957056  ;;  %p9740_p5 = pmov %p9739_p0 }
 0x18e   : > { %p9741_p2 = pmov %p9739_p0 }
 0x18f   : > { %8022 = dma.done.wait (%p9740_p5), [#allocation15], 6144  }
 0x190   : > { %8024 = vsyncadd (%p9741_p2), [#allocation15], 4294961152  ;;  %p9742_p9 = pmov %p9739_p0 }
 0x191   : > { %p9743_p10 = pmov %p9739_p0 }
 0x192   : > { %8026 = dma.done.wait (%p9742_p9), [#allocation18], 8192  }
 0x193   : > { %8028 = vsyncadd (%p9743_p10), [#allocation18], 4294959104  ;;  %p9744_p4 = pmov %p9739_p0 }
 0x194   : > { %p9745_p6 = pmov %p9739_p0 }
 0x195   : > { %8030 = dma.done.wait (%p9744_p4), [#allocation21], 2048  }
 0x196   : > { %8032 = vsyncadd (%p9745_p6), [#allocation21], 4294965248  ;;  %v8075_v0 = vmov 0   ;;  %v7141_v1 = vld [vmem:[#allocation7 + $0x4] ss:$8 sps:$4 sm:$0xff]   ;;  %v7167_v28 = vld [vmem:[%s8595_s16 + $0x10] sm:$0xff]  }
 0x197   : > { %1171 = vmatprep.mubr.bf16.mxu0 %v8075_v0  ;;  %1251 = vmatprep.mubr.bf16.mxu1 %v8075_v0  ;;  %v7143_v2 = vld [vmem:[#allocation7] ss:$8 sps:$4 sm:$0xff]   ;;  %v7144_v3 = vld [vmem:[#allocation7 + $0x14] ss:$8 sps:$4 sm:$0xff]   ;;  %v7146_v4 = vld [vmem:[#allocation7 + $0x10] ss:$8 sps:$4 sm:$0xff]  }
 0x198   : > { %1139 = vmatprep.subr.bf16.mxu0 %v7141_v1  ;;  %6895 = vmatprep.subr.bf16.mxu1 %v7141_v1  ;;  %v7147_v5 = vld [vmem:[#allocation7 + $0x24] ss:$8 sps:$4 sm:$0xff]   ;;  %v7149_v6 = vld [vmem:[#allocation7 + $0x20] ss:$8 sps:$4 sm:$0xff]   ;;  %v7150_v7 = vld [vmem:[#allocation7 + $0x34] ss:$8 sps:$4 sm:$0xff]  }
 0x199   : > { %1140 = vmatpush1.bf16.msra.mxu0 %v7143_v2  ;;  %6903 = vmatpush1.bf16.msra.mxu1 %v7143_v2  ;;  %v7152_v8 = vld [vmem:[#allocation7 + $0x30] ss:$8 sps:$4 sm:$0xff]   ;;  %v7153_v9 = vld [vmem:[#allocation7 + $0x44] ss:$8 sps:$4 sm:$0xff]   ;;  %v7155_v10 = vld [vmem:[#allocation7 + $0x40] ss:$8 sps:$4 sm:$0xff]   ;;  %v953_v2 = vlaneseq }
 0x19a   : > { %1141 = vmatprep.subr.bf16.mxu0 %v7144_v3  ;;  %6896 = vmatprep.subr.bf16.mxu1 %v7144_v3  ;;  %v7156_v11 = vld [vmem:[#allocation7 + $0x54] ss:$8 sps:$4 sm:$0xff]   ;;  %v7158_v12 = vld [vmem:[#allocation7 + $0x50] ss:$8 sps:$4 sm:$0xff]   ;;  %v7159_v13 = vld [vmem:[#allocation7 + $0x64] ss:$8 sps:$4 sm:$0xff]  }
 0x19b   : > { %v7161_v14 = vld [vmem:[#allocation7 + $0x60] ss:$8 sps:$4 sm:$0xff]   ;;  %v7162_v15 = vld [vmem:[#allocation7 + $0x74] ss:$8 sps:$4 sm:$0xff]   ;;  %v7164_v16 = vld [vmem:[#allocation7 + $0x70] ss:$8 sps:$4 sm:$0xff]  }
 0x19c   : > { %v7183_v17 = vld [vmem:[#allocation8 + $0x4] ss:$8 sps:$4 sm:$0xff]   ;;  %v7181_v20 = vld [vmem:[#allocation8] ss:$8 sps:$4 sm:$0xff]   ;;  %v7186_v21 = vld [vmem:[#allocation8 + $0x14] ss:$8 sps:$4 sm:$0xff]  }
 0x19d   : > { %1142 = vmatpush1.bf16.msra.mxu0 %v7146_v4  ;;  %6904 = vmatpush1.bf16.msra.mxu1 %v7146_v4  ;;  %v7165_v18 = vld [vmem:[%s8595_s16] sm:$0xff]   ;;  %v7184_v22 = vld [vmem:[#allocation8 + $0x10] ss:$8 sps:$4 sm:$0xff]   ;;  %v7166_v24 = vld [vmem:[%s8595_s16 + $0x8] sm:$0xff]   ;;  %v8664_v3 = vshrl.u32 %v953_v2, 7  ;;  %s9746_s0 = sld [smem:[#allocation38_spill]] }
 0x19e   : > { %1143 = vmatprep.subr.bf16.mxu0 %v7147_v5  ;;  %6897 = vmatprep.subr.bf16.mxu1 %v7147_v5  ;;  %v7173_v19 = vld [vmem:[%s8595_s16 + $0x40] sm:$0xff]   ;;  %v7174_v25 = vld [vmem:[%s8595_s16 + $0x48] sm:$0xff]   ;;  %v7192_v27 = vld [vmem:[#allocation8 + $0x34] ss:$8 sps:$4 sm:$0xff]   ;;  %s9747_s4 = sld [smem:[#allocation40_spill]]  ;;  %s9748_s24 = sld [smem:[#allocation42_spill]] }
 0x19f   : > { %v7189_v23 = vld [vmem:[#allocation8 + $0x24] ss:$8 sps:$4 sm:$0xff]   ;;  %v7187_v26 = vld [vmem:[#allocation8 + $0x20] ss:$8 sps:$4 sm:$0xff]   ;;  %v7190_v29 = vld [vmem:[#allocation8 + $0x30] ss:$8 sps:$4 sm:$0xff]  }
 0x1a0   : > { %v7175_v30 = vld [vmem:[%s8595_s16 + $0x50] sm:$0xff]   ;;  %v7195_v31 = vld [vmem:[#allocation8 + $0x44] ss:$8 sps:$4 sm:$0xff]   ;;  %v7193_v32 = vld [vmem:[#allocation8 + $0x40] ss:$8 sps:$4 sm:$0xff]   ;;  %v8667_v4 = vsub.s32 0, %v8664_v3 }
 0x1a1   : > { %1144 = vmatpush1.bf16.msra.mxu0 %v7149_v6  ;;  %6905 = vmatpush1.bf16.msra.mxu1 %v7149_v6  ;;  %v7198_v33 = vld [vmem:[#allocation8 + $0x54] ss:$8 sps:$4 sm:$0xff]   ;;  %v7196_v34 = vld [vmem:[#allocation8 + $0x50] ss:$8 sps:$4 sm:$0xff]   ;;  %v7201_v35 = vld [vmem:[#allocation8 + $0x64] ss:$8 sps:$4 sm:$0xff]  }
 0x1a2   : > { %1145 = vmatprep.subr.bf16.mxu0 %v7150_v7  ;;  %6898 = vmatprep.subr.bf16.mxu1 %v7150_v7  ;;  %v7168_v36 = vld [vmem:[%s8595_s16 + $0x18] sm:$0xff]   ;;  %v7199_v38 = vld [vmem:[#allocation8 + $0x60] ss:$8 sps:$4 sm:$0xff]   ;;  %v7207_v41 = vld [vmem:[#allocation8 + $0x84] ss:$8 sps:$4 sm:$0xff]   ;;  %v8673_v6 = vsub.s32 1, %v8664_v3 }
 0x1a3   : > { %v7176_v37 = vld [vmem:[%s8595_s16 + $0x58] sm:$0xff]   ;;  %v7169_v42 = vld [vmem:[%s8595_s16 + $0x20] sm:$0xff]   ;;  %v7170_v48 = vld [vmem:[%s8595_s16 + $0x28] sm:$0xff]   ;;  %s9749_s2 = sld [smem:[#allocation44_spill]]  ;;  %s9750_s13 = sld [smem:[#allocation46_spill]] }
 0x1a4   : > { %v7204_v39 = vld [vmem:[#allocation8 + $0x74] ss:$8 sps:$4 sm:$0xff]   ;;  %v7202_v40 = vld [vmem:[#allocation8 + $0x70] ss:$8 sps:$4 sm:$0xff]   ;;  %v7177_v43 = vld [vmem:[%s8595_s16 + $0x60] sm:$0xff]   ;;  %s6336_s1 = sshll.u32 %s8591_s21, 8 }
 0x1a5   : > { %1146 = vmatpush1.bf16.msra.mxu0 %v7152_v8  ;;  %6906 = vmatpush1.bf16.msra.mxu1 %v7152_v8  ;;  %v7205_v44 = vld [vmem:[#allocation8 + $0x80] ss:$8 sps:$4 sm:$0xff]   ;;  %v7210_v45 = vld [vmem:[#allocation8 + $0x94] ss:$8 sps:$4 sm:$0xff]   ;;  %v7208_v46 = vld [vmem:[#allocation8 + $0x90] ss:$8 sps:$4 sm:$0xff]  }
 0x1a6   : > { %1147 = vmatprep.subr.bf16.mxu0 %v7153_v9  ;;  %6899 = vmatprep.subr.bf16.mxu1 %v7153_v9  ;;  %v7213_v47 = vld [vmem:[#allocation8 + $0xa4] ss:$8 sps:$4 sm:$0xff]   ;;  %v7211_v50 = vld [vmem:[#allocation8 + $0xa0] ss:$8 sps:$4 sm:$0xff]   ;;  %v7216_v51 = vld [vmem:[#allocation8 + $0xb4] ss:$8 sps:$4 sm:$0xff]  }
 0x1a7   : > { %v7178_v49 = vld [vmem:[%s8595_s16 + $0x68] sm:$0xff]   ;;  %v7214_v52 = vld [vmem:[#allocation8 + $0xb0] ss:$8 sps:$4 sm:$0xff]   ;;  %v7222_v57 = vld [vmem:[#allocation8 + $0xd4] ss:$8 sps:$4 sm:$0xff]   ;;  %s9048_s12 = scalar_lea.vmem [#allocation22], %s6336_s1 }
 0x1a8   : > { %v7219_v53 = vld [vmem:[#allocation8 + $0xc4] ss:$8 sps:$4 sm:$0xff]   ;;  %v7171_v54 = vld [vmem:[%s8595_s16 + $0x30] sm:$0xff]   ;;  %v7217_v56 = vld [vmem:[#allocation8 + $0xc0] ss:$8 sps:$4 sm:$0xff]   ;;  %s6669_s11 = sshll.u32 %s8216_s23, 12 }
 0x1a9   : > { %1148 = vmatpush1.bf16.msra.mxu0 %v7155_v10  ;;  %6907 = vmatpush1.bf16.msra.mxu1 %v7155_v10  ;;  %v7179_v55 = vld [vmem:[%s8595_s16 + $0x70] sm:$0xff]   ;;  %v7172_v59 = vld [vmem:[%s8595_s16 + $0x38] sm:$0xff]   ;;  %v7225_v61 = vld [vmem:[#allocation8 + $0xe4] ss:$8 sps:$4 sm:$0xff]   ;;  %s6065_s7 = sshll.u32 %s9048_s12, 4  ;;  %p9756_p7 = scmp.ne.s32.totalorder %s9726_s8, 0  ;;  %s9494_s7 = int_to_ptr.vmem [resolvable:$true] %s6065_s7 }
 0x1aa   : > { %1149 = vmatprep.subr.bf16.mxu0 %v7156_v11  ;;  %6900 = vmatprep.subr.bf16.mxu1 %v7156_v11  ;;  %v7220_v58 = vld [vmem:[#allocation8 + $0xd0] ss:$8 sps:$4 sm:$0xff]   ;;  %v7223_v62 = vld [vmem:[#allocation8 + $0xe0] ss:$8 sps:$4 sm:$0xff]   ;;  %v7228_v63 = vld [vmem:[#allocation8 + $0xf4] ss:$8 sps:$4 sm:$0xff]  }
 0x1ab   : > { %v7180_v60 = vld [vmem:[%s8595_s16 + $0x78] sm:$0xff]   ;;  %v951_v5 = vld [vmem:[%s9746_s0] sm:$0x3]  ;;  %s9751_s0 = sld [smem:[#allocation49_spill]]  ;;  %s9754_s16 = sld [smem:[#allocation54_spill]] }
 0x1ac   : > { %v7226_v1 = vld [vmem:[#allocation8 + $0xf0] ss:$8 sps:$4 sm:$0xff]   ;;  %v8676_v7 = vrot.slane %v951_v5, %v8667_v4  ;;  %v8679_v8 = vrot.slane %v951_v5, %v8673_v6  ;;  %s7929_s18 = scalar_lea.vmem %s9494_s7, 4096  ;;  %s8076_s5 = smov [#allocation22]  }
 0x1ad   : > { %1150 = vmatpush1.bf16.msra.mxu0 %v7158_v12  ;;  %6908 = vmatpush1.bf16.msra.mxu1 %v7158_v12  ;;  %p7930_p8 = scmp.ne.s32.totalorder %s9494_s7, %s7929_s18 }
 0x1ae   : > { %1151 = vmatprep.subr.bf16.mxu0 %v7159_v13  ;;  %6901 = vmatprep.subr.bf16.mxu1 %v7159_v13 }
 0x1af   : > { %p7931_p11 = pnand %p7930_p8, %p9756_p7 }
 0x1b1   : > { %1152 = vmatpush1.bf16.msra.mxu0 %v7161_v14  ;;  %6909 = vmatpush1.bf16.msra.mxu1 %v7161_v14  ;;  %p7932_p3 = pneg %p7931_p11 }
 0x1b2   : > { %1153 = vmatprep.subr.bf16.mxu0 %v7162_v15  ;;  %6902 = vmatprep.subr.bf16.mxu1 %v7162_v15 }
 0x1b5   : > { %1154 = vmatpush1.bf16.msra.mxu0 %v7164_v16  ;;  %6910 = vmatpush1.bf16.msra.mxu1 %v7164_v16 }
 0x1b6   : > { %1632 = vmatprep.subr.bf16.mxu1 %v7183_v17 }
 0x1b8   : > { %1172 = vmatmul.mubr.bf16.vlgmr.msra.gmra.mrb[0].mxu0 %v7165_v18  ;;  %1252 = vmatmul.mubr.bf16.vlgmr.msra.gmra.mrb[0].mxu1 %v7173_v19 }
 0x1b9   : > { %1181 = vmatprep.mubr.bf16.mxu0 %v8075_v0  ;;  %1261 = vmatprep.mubr.bf16.mxu1 %v8075_v0 }
 0x1ba   : > { %1633 = vmatpush1.bf16.msra.mxu1 %v7181_v20 }
 0x1bb   : > { %1634 = vmatprep.subr.bf16.mxu1 %v7186_v21 }
 0x1be   : > { %1635 = vmatpush1.bf16.msra.mxu1 %v7184_v22 }
 0x1bf   : > { %1636 = vmatprep.subr.bf16.mxu1 %v7189_v23 }
 0x1c0   : > { %1182 = vmatmul.mubr.bf16.gmra.mrb[4].mxu0 %v7166_v24  ;;  %1262 = vmatmul.mubr.bf16.gmra.mrb[4].mxu1 %v7174_v25  ;;  %v7229_v24 = vld [vmem:[#allocation10] ss:$8 sps:$4 sm:$0xff]  }
 0x1c1   : > { %1191 = vmatprep.mubr.bf16.mxu0 %v8075_v0  ;;  %1271 = vmatprep.mubr.bf16.mxu1 %v8075_v0 }
 0x1c2   : > { %1637 = vmatpush1.bf16.msra.mxu1 %v7187_v26 }
 0x1c3   : > { %1638 = vmatprep.subr.bf16.mxu1 %v7192_v27 }
 0x1c6   : > { %1639 = vmatpush1.bf16.msra.mxu1 %v7190_v29 }
 0x1c7   : > { %1640 = vmatprep.subr.bf16.mxu1 %v7195_v31 }
 0x1c8   : > { %1192 = vmatmul.mubr.bf16.gmra.mrb[8].mxu0 %v7167_v28  ;;  %1272 = vmatmul.mubr.bf16.gmra.mrb[8].mxu1 %v7175_v30  ;;  %v7231_v28 = vld [vmem:[#allocation10 + $0x4] ss:$8 sps:$4 sm:$0xff]  }
 0x1c9   : > { %1201 = vmatprep.mubr.bf16.mxu0 %v8075_v0  ;;  %1281 = vmatprep.mubr.bf16.mxu1 %v8075_v0 }
 0x1ca   : > { %1641 = vmatpush1.bf16.msra.mxu1 %v7193_v32  ;;  %v7234_v32 = vld [vmem:[#allocation10 + $0x14] ss:$8 sps:$4 sm:$0xff]   ;;  %2125 = vmatprep.subr.bf16.mxu0 %v7231_v28 }
 0x1cb   : > { %1642 = vmatprep.subr.bf16.mxu1 %v7198_v33  ;;  %2126 = vmatpush1.bf16.msra.mxu0 %v7229_v24 }
 0x1cc   : > { %2127 = vmatprep.subr.bf16.mxu0 %v7234_v32 }
 0x1ce   : > { %1643 = vmatpush1.bf16.msra.mxu1 %v7196_v34 }
 0x1cf   : > { %1644 = vmatprep.subr.bf16.mxu1 %v7201_v35 }
 0x1d0   : > { %1202 = vmatmul.mubr.bf16.gmra.mrb[12].mxu0 %v7168_v36  ;;  %1282 = vmatmul.mubr.bf16.gmra.mrb[12].mxu1 %v7176_v37 }
 0x1d1   : > { %1211 = vmatprep.mubr.bf16.mxu0 %v8075_v0  ;;  %1291 = vmatprep.mubr.bf16.mxu1 %v8075_v0 }
 0x1d2   : > { %1645 = vmatpush1.bf16.msra.mxu1 %v7199_v38  ;;  %v7232_v38 = vld [vmem:[#allocation10 + $0x10] ss:$8 sps:$4 sm:$0xff]  }
 0x1d3   : > { %1646 = vmatprep.subr.bf16.mxu1 %v7204_v39  ;;  %2128 = vmatpush1.bf16.msra.mxu0 %v7232_v38 }
 0x1d6   : > { %1647 = vmatpush1.bf16.msra.mxu1 %v7202_v40 }
 0x1d7   : > { %1648 = vmatprep.subr.bf16.mxu1 %v7207_v41 }
 0x1d8   : > { %1212 = vmatmul.mubr.bf16.gmra.mrb[16].mxu0 %v7169_v42  ;;  %1292 = vmatmul.mubr.bf16.gmra.mrb[16].mxu1 %v7177_v43  ;;  %v7237_v43 = vld [vmem:[#allocation10 + $0x24] ss:$8 sps:$4 sm:$0xff]  }
 0x1d9   : > { %1221 = vmatprep.mubr.bf16.mxu0 %v8075_v0  ;;  %1301 = vmatprep.mubr.bf16.mxu1 %v8075_v0 }
 0x1da   : > { %1649 = vmatpush1.bf16.msra.mxu1 %v7205_v44  ;;  %2129 = vmatprep.subr.bf16.mxu0 %v7237_v43 }
 0x1db   : > { %1650 = vmatprep.subr.bf16.mxu1 %v7210_v45 }
 0x1de   : > { %1651 = vmatpush1.bf16.msra.mxu1 %v7208_v46 }
 0x1df   : > { %1652 = vmatprep.subr.bf16.mxu1 %v7213_v47 }
 0x1e0   : > { %1222 = vmatmul.mubr.bf16.gmra.mrb[20].mxu0 %v7170_v48  ;;  %1302 = vmatmul.mubr.bf16.gmra.mrb[20].mxu1 %v7178_v49 }
 0x1e1   : > { %1231 = vmatprep.mubr.bf16.mxu0 %v8075_v0  ;;  %1311 = vmatprep.mubr.bf16.mxu1 %v8075_v0 }
 0x1e2   : > { %1653 = vmatpush1.bf16.msra.mxu1 %v7211_v50 }
 0x1e3   : > { %1654 = vmatprep.subr.bf16.mxu1 %v7216_v51 }
 0x1e6   : > { %1655 = vmatpush1.bf16.msra.mxu1 %v7214_v52 }
 0x1e7   : > { %1656 = vmatprep.subr.bf16.mxu1 %v7219_v53 }
 0x1e8   : > { %1232 = vmatmul.mubr.bf16.gmra.mrb[24].mxu0 %v7171_v54  ;;  %1312 = vmatmul.mubr.bf16.gmra.mrb[24].mxu1 %v7179_v55 }
 0x1e9   : > { %1241 = vmatprep.mubr.bf16.mxu0 %v8075_v0  ;;  %1321 = vmatprep.mubr.bf16.mxu1 %v8075_v0 }
 0x1ea   : > { %1657 = vmatpush1.bf16.msra.mxu1 %v7217_v56 }
 0x1eb   : > { %1658 = vmatprep.subr.bf16.mxu1 %v7222_v57  ;;  %v7235_v57 = vld [vmem:[#allocation10 + $0x20] ss:$8 sps:$4 sm:$0xff]  }
 0x1ec   : > { %2130 = vmatpush1.bf16.msra.mxu0 %v7235_v57 }
 0x1ee   : > { %1659 = vmatpush1.bf16.msra.mxu1 %v7220_v58 }
 0x1ef   : > { %1660 = vmatprep.subr.bf16.mxu1 %v7225_v61  ;;  %v7240_v61 = vld [vmem:[#allocation10 + $0x34] ss:$8 sps:$4 sm:$0xff]  }
 0x1f0   : > { %1242 = vmatmul.mubr.bf16.gmra.mrb[28].mxu0 %v7172_v59  ;;  %1322 = vmatmul.mubr.bf16.gmra.mrb[28].mxu1 %v7180_v60 }
 0x1f1   : > { %2131 = vmatprep.subr.bf16.mxu0 %v7240_v61 }
 0x1f2   : > { %1661 = vmatpush1.bf16.msra.mxu1 %v7223_v62 }
 0x1f3   : > { %1662 = vmatprep.subr.bf16.mxu1 %v7228_v63 }
 0x1f6   : > { %1663 = vmatpush1.bf16.msra.mxu1 %v7226_v1 }
 0x28b   : > { %v1173_v9 = vpop.f32.mrb[0].mxu0  ;;  %v1253_v10 = vpop.f32.mrb[0].mxu1 }
 0x28c   : > { %v1174_v11 = vadd.f32 %v1173_v9, %v8676_v7  ;;  %v1175_v12 = vpop.f32.mrb[1].mxu0  ;;  %v1254_v13 = vadd.f32 %v1253_v10, %v8676_v7  ;;  %v1255_v14 = vpop.f32.mrb[1].mxu1 }
 0x28d   : > { %v1176_v15 = vadd.f32 %v1175_v12, %v8679_v8  ;;  %v1177_v16 = vpop.f32.mrb[2].mxu0  ;;  %v1256_v17 = vadd.f32 %v1255_v14, %v8679_v8  ;;  %v1257_v18 = vpop.f32.mrb[2].mxu1  ;;  %v7238_v12 = vld [vmem:[#allocation10 + $0x30] ss:$8 sps:$4 sm:$0xff]  }
 0x28e   : > { %v1178_v19 = vadd.f32 %v1177_v16, %v8676_v7  ;;  %v1179_v20 = vpop.f32.mrb[3].mxu0  ;;  %v1364_v21 = vmax.f32 %v1254_v13, 0.0  ;;  %v1258_v22 = vadd.f32 %v1257_v18, %v8676_v7  ;;  %v1259_v23 = vpop.f32.mrb[3].mxu1  ;;  %v1332_v29 = vmax.f32 %v1174_v11, 0.0  ;;  %2132 = vmatpush1.bf16.msra.mxu0 %v7238_v12  ;;  %v7252_v12 = vld [vmem:[#allocation10 + $0x74] ss:$8 sps:$4 sm:$0xff]  }
 0x28f   : > { %v1180_v25 = vadd.f32 %v1179_v20, %v8679_v8  ;;  %v1365_v26 = vmax.f32 %v1256_v17, 0.0  ;;  %v1260_v27 = vadd.f32 %v1259_v23, %v8679_v8  ;;  %v1333_v33 = vmax.f32 %v1176_v15, 0.0  ;;  %v7243_v17 = vld [vmem:[#allocation10 + $0x44] ss:$8 sps:$4 sm:$0xff]  }
 0x290   : > { %v1334_v30 = vmax.f32 %v1178_v19, 0.0  ;;  %v1366_v31 = vmax.f32 %v1258_v22, 0.0  ;;  %2133 = vmatprep.subr.bf16.mxu0 %v7243_v17 }
 0x291   : > { %v1335_v34 = vmax.f32 %v1180_v25, 0.0  ;;  %v1367_v35 = vmax.f32 %v1260_v27, 0.0 }
 0x292   : > { %v1396_v36 = vpack.c.bf16 %v1334_v30, %v1332_v29  ;;  %v8689_v37 = vpack.c.bf16 %v1366_v31, %v1364_v21  ;;  %v7241_v31 = vld [vmem:[#allocation10 + $0x40] ss:$8 sps:$4 sm:$0xff]  }
 0x293   : > { %v1183_v39 = vpop.f32.mrb[4].mxu0  ;;  %v1397_v40 = vpack.c.bf16 %v1335_v34, %v1333_v33  ;;  %v1263_v41 = vpop.f32.mrb[4].mxu1  ;;  %v8691_v42 = vpack.c.bf16 %v1367_v35, %v1365_v26  ;;  %v7246_v35 = vld [vmem:[#allocation10 + $0x54] ss:$8 sps:$4 sm:$0xff]   ;;  %2134 = vmatpush1.bf16.msra.mxu0 %v7241_v31 }
 0x294   : > { %v1184_v44 = vadd.f32 %v1183_v39, %v8676_v7  ;;  %v1185_v45 = vpop.f32.mrb[5].mxu0  ;;  %v1264_v46 = vadd.f32 %v1263_v41, %v8676_v7  ;;  %v1265_v47 = vpop.f32.mrb[5].mxu1  ;;  %2135 = vmatprep.subr.bf16.mxu0 %v7246_v35 }
 0x295   : > { %v1186_v48 = vadd.f32 %v1185_v45, %v8679_v8  ;;  %v1187_v49 = vpop.f32.mrb[6].mxu0  ;;  %1664 = vmatprep.mubr.bf16.mxu1 %v1397_v40  ;;  %v1266_v50 = vadd.f32 %v1265_v47, %v8679_v8  ;;  %v1267_v51 = vpop.f32.mrb[6].mxu1 }
 0x296   : > { %v1188_v52 = vadd.f32 %v1187_v49, %v8676_v7  ;;  %v1189_v53 = vpop.f32.mrb[7].mxu0  ;;  %1665 = vmatmul.mubr.bf16.vlgmr.msra.gmra.mrb[32].mxu1 %v1396_v36  ;;  %v1368_v54 = vmax.f32 %v1264_v46, 0.0  ;;  %v1268_v55 = vadd.f32 %v1267_v51, %v8676_v7  ;;  %v1269_v56 = vpop.f32.mrb[7].mxu1  ;;  %v1336_v62 = vmax.f32 %v1184_v44, 0.0  ;;  %v7244_v46 = vld [vmem:[#allocation10 + $0x50] ss:$8 sps:$4 sm:$0xff]  }
 0x297   : > { %v1190_v58 = vadd.f32 %v1189_v53, %v8679_v8  ;;  %v1369_v59 = vmax.f32 %v1266_v50, 0.0  ;;  %v1270_v60 = vadd.f32 %v1269_v56, %v8679_v8  ;;  %v1337_v2 = vmax.f32 %v1186_v48, 0.0  ;;  %v7249_v51 = vld [vmem:[#allocation10 + $0x64] ss:$8 sps:$4 sm:$0xff]   ;;  %2136 = vmatpush1.bf16.msra.mxu0 %v7244_v46 }
 0x298   : > { %v1338_v63 = vmax.f32 %v1188_v52, 0.0  ;;  %v1370_v1 = vmax.f32 %v1268_v55, 0.0  ;;  %2137 = vmatprep.subr.bf16.mxu0 %v7249_v51 }
 0x299   : > { %v1339_v5 = vmax.f32 %v1190_v58, 0.0  ;;  %v1371_v9 = vmax.f32 %v1270_v60, 0.0 }
 0x29a   : > { %v1398_v10 = vpack.c.bf16 %v1338_v63, %v1336_v62  ;;  %v8701_v11 = vpack.c.bf16 %v1370_v1, %v1368_v54 }
 0x29b   : > { %v1193_v13 = vpop.f32.mrb[8].mxu0  ;;  %v1399_v14 = vpack.c.bf16 %v1339_v5, %v1337_v2  ;;  %v1273_v15 = vpop.f32.mrb[8].mxu1  ;;  %v8703_v16 = vpack.c.bf16 %v1371_v9, %v1369_v59  ;;  %v7247_v2 = vld [vmem:[#allocation10 + $0x60] ss:$8 sps:$4 sm:$0xff]  }
 0x29c   : > { %v1194_v18 = vadd.f32 %v1193_v13, %v8676_v7  ;;  %v1195_v19 = vpop.f32.mrb[9].mxu0  ;;  %v1274_v20 = vadd.f32 %v1273_v15, %v8676_v7  ;;  %v1275_v21 = vpop.f32.mrb[9].mxu1  ;;  %2138 = vmatpush1.bf16.msra.mxu0 %v7247_v2 }
 0x29d   : > { %v1196_v22 = vadd.f32 %v1195_v19, %v8679_v8  ;;  %v1197_v23 = vpop.f32.mrb[10].mxu0  ;;  %1674 = vmatprep.mubr.bf16.mxu1 %v1399_v14  ;;  %v1276_v24 = vadd.f32 %v1275_v21, %v8679_v8  ;;  %v1277_v25 = vpop.f32.mrb[10].mxu1  ;;  %2139 = vmatprep.subr.bf16.mxu0 %v7252_v12 }
 0x29e   : > { %v1198_v26 = vadd.f32 %v1197_v23, %v8676_v7  ;;  %v1199_v27 = vpop.f32.mrb[11].mxu0  ;;  %1675 = vmatmul.mubr.bf16.gmra.mrb[36].mxu1 %v1398_v10  ;;  %v1372_v28 = vmax.f32 %v1274_v20, 0.0  ;;  %v1278_v29 = vadd.f32 %v1277_v25, %v8676_v7  ;;  %v1279_v30 = vpop.f32.mrb[11].mxu1  ;;  %v1340_v36 = vmax.f32 %v1194_v18, 0.0 }
 0x29f   : > { %v1200_v32 = vadd.f32 %v1199_v27, %v8679_v8  ;;  %v1373_v33 = vmax.f32 %v1276_v24, 0.0  ;;  %v1280_v34 = vadd.f32 %v1279_v30, %v8679_v8  ;;  %v1341_v40 = vmax.f32 %v1196_v22, 0.0  ;;  %v7250_v22 = vld [vmem:[#allocation10 + $0x70] ss:$8 sps:$4 sm:$0xff]   ;;  %v7255_v27 = vld [vmem:[#allocation10 + $0x84] ss:$8 sps:$4 sm:$0xff]  }
 0x2a0   : > { %v1342_v38 = vmax.f32 %v1198_v26, 0.0  ;;  %v1374_v39 = vmax.f32 %v1278_v29, 0.0  ;;  %2140 = vmatpush1.bf16.msra.mxu0 %v7250_v22  ;;  %v7259_v22 = vld [vmem:[#allocation10 + $0xa0] ss:$8 sps:$4 sm:$0xff]  }
 0x2a1   : > { %v1343_v41 = vmax.f32 %v1200_v32, 0.0  ;;  %v1375_v43 = vmax.f32 %v1280_v34, 0.0  ;;  %2141 = vmatprep.subr.bf16.mxu0 %v7255_v27  ;;  %v7264_v27 = vld [vmem:[#allocation10 + $0xb4] ss:$8 sps:$4 sm:$0xff]  }
 0x2a2   : > { %v1400_v44 = vpack.c.bf16 %v1342_v38, %v1340_v36  ;;  %v8713_v45 = vpack.c.bf16 %v1374_v39, %v1372_v28 }
 0x2a3   : > { %v1203_v47 = vpop.f32.mrb[12].mxu0  ;;  %v1401_v48 = vpack.c.bf16 %v1343_v41, %v1341_v40  ;;  %v1283_v49 = vpop.f32.mrb[12].mxu1  ;;  %v8715_v50 = vpack.c.bf16 %v1375_v43, %v1373_v33  ;;  %v7253_v43 = vld [vmem:[#allocation10 + $0x80] ss:$8 sps:$4 sm:$0xff]  }
 0x2a4   : > { %v1204_v52 = vadd.f32 %v1203_v47, %v8676_v7  ;;  %v1205_v53 = vpop.f32.mrb[13].mxu0  ;;  %v1284_v54 = vadd.f32 %v1283_v49, %v8676_v7  ;;  %v1285_v55 = vpop.f32.mrb[13].mxu1  ;;  %2142 = vmatpush1.bf16.msra.mxu0 %v7253_v43  ;;  %v7267_v43 = vld [vmem:[#allocation10 + $0xc4] ss:$8 sps:$4 sm:$0xff]  }
 0x2a5   : > { %v1206_v56 = vadd.f32 %v1205_v53, %v8679_v8  ;;  %v1207_v57 = vpop.f32.mrb[14].mxu0  ;;  %1684 = vmatprep.mubr.bf16.mxu1 %v1401_v48  ;;  %v1286_v58 = vadd.f32 %v1285_v55, %v8679_v8  ;;  %v1287_v59 = vpop.f32.mrb[14].mxu1  ;;  %v7258_v48 = vld [vmem:[#allocation10 + $0x94] ss:$8 sps:$4 sm:$0xff]  }
 0x2a6   : > { %v1208_v60 = vadd.f32 %v1207_v57, %v8676_v7  ;;  %v1209_v61 = vpop.f32.mrb[15].mxu0  ;;  %1685 = vmatmul.mubr.bf16.gmra.mrb[40].mxu1 %v1400_v44  ;;  %v1376_v62 = vmax.f32 %v1284_v54, 0.0  ;;  %v1288_v63 = vadd.f32 %v1287_v59, %v8676_v7  ;;  %v1289_v1 = vpop.f32.mrb[15].mxu1  ;;  %v1344_v13 = vmax.f32 %v1204_v52, 0.0  ;;  %2143 = vmatprep.subr.bf16.mxu0 %v7258_v48 }
 0x2a7   : > { %v1210_v5 = vadd.f32 %v1209_v61, %v8679_v8  ;;  %v1377_v9 = vmax.f32 %v1286_v58, 0.0  ;;  %v1290_v10 = vadd.f32 %v1289_v1, %v8679_v8  ;;  %v1345_v17 = vmax.f32 %v1206_v56, 0.0  ;;  %v7256_v58 = vld [vmem:[#allocation10 + $0x90] ss:$8 sps:$4 sm:$0xff]  }
 0x2a8   : > { %v1346_v14 = vmax.f32 %v1208_v60, 0.0  ;;  %v1378_v15 = vmax.f32 %v1288_v63, 0.0  ;;  %v7261_v63 = vld [vmem:[#allocation10 + $0xa4] ss:$8 sps:$4 sm:$0xff]   ;;  %2144 = vmatpush1.bf16.msra.mxu0 %v7256_v58 }
 0x2a9   : > { %v1347_v18 = vmax.f32 %v1210_v5, 0.0  ;;  %v1379_v19 = vmax.f32 %v1290_v10, 0.0  ;;  %2145 = vmatprep.subr.bf16.mxu0 %v7261_v63 }
 0x2aa   : > { %v1402_v20 = vpack.c.bf16 %v1346_v14, %v1344_v13  ;;  %v8725_v21 = vpack.c.bf16 %v1378_v15, %v1376_v62 }
 0x2ab   : > { %v1213_v23 = vpop.f32.mrb[16].mxu0  ;;  %v1403_v24 = vpack.c.bf16 %v1347_v18, %v1345_v17  ;;  %v1293_v25 = vpop.f32.mrb[16].mxu1  ;;  %v8727_v26 = vpack.c.bf16 %v1379_v19, %v1377_v9 }
 0x2ac   : > { %v1214_v28 = vadd.f32 %v1213_v23, %v8676_v7  ;;  %v1215_v29 = vpop.f32.mrb[17].mxu0  ;;  %v1294_v30 = vadd.f32 %v1293_v25, %v8676_v7  ;;  %v1295_v31 = vpop.f32.mrb[17].mxu1  ;;  %2146 = vmatpush1.bf16.msra.mxu0 %v7259_v22 }
 0x2ad   : > { %v1216_v32 = vadd.f32 %v1215_v29, %v8679_v8  ;;  %v1217_v33 = vpop.f32.mrb[18].mxu0  ;;  %1694 = vmatprep.mubr.bf16.mxu1 %v1403_v24  ;;  %v1296_v34 = vadd.f32 %v1295_v31, %v8679_v8  ;;  %v1297_v35 = vpop.f32.mrb[18].mxu1  ;;  %2147 = vmatprep.subr.bf16.mxu0 %v7264_v27 }
 0x2ae   : > { %v1218_v36 = vadd.f32 %v1217_v33, %v8676_v7  ;;  %v1219_v38 = vpop.f32.mrb[19].mxu0  ;;  %1695 = vmatmul.mubr.bf16.gmra.mrb[44].mxu1 %v1402_v20  ;;  %v1380_v39 = vmax.f32 %v1294_v30, 0.0  ;;  %v1298_v40 = vadd.f32 %v1297_v35, %v8676_v7  ;;  %v1299_v41 = vpop.f32.mrb[19].mxu1  ;;  %v1348_v49 = vmax.f32 %v1214_v28, 0.0 }
 0x2af   : > { %v1220_v44 = vadd.f32 %v1219_v38, %v8679_v8  ;;  %v1381_v46 = vmax.f32 %v1296_v34, 0.0  ;;  %v1300_v47 = vadd.f32 %v1299_v41, %v8679_v8  ;;  %v1349_v53 = vmax.f32 %v1216_v32, 0.0 }
 0x2b0   : > { %v1350_v51 = vmax.f32 %v1218_v36, 0.0  ;;  %v1382_v52 = vmax.f32 %v1298_v40, 0.0  ;;  %v7262_v36 = vld [vmem:[#allocation10 + $0xb0] ss:$8 sps:$4 sm:$0xff]  }
 0x2b1   : > { %v1351_v54 = vmax.f32 %v1220_v44, 0.0  ;;  %v1383_v55 = vmax.f32 %v1300_v47, 0.0  ;;  %2148 = vmatpush1.bf16.msra.mxu0 %v7262_v36 }
 0x2b2   : > { %v1404_v56 = vpack.c.bf16 %v1350_v51, %v1348_v49  ;;  %v8737_v57 = vpack.c.bf16 %v1382_v52, %v1380_v39  ;;  %2149 = vmatprep.subr.bf16.mxu0 %v7267_v43 }
 0x2b3   : > { %v1223_v59 = vpop.f32.mrb[20].mxu0  ;;  %v1405_v60 = vpack.c.bf16 %v1351_v54, %v1349_v53  ;;  %v1303_v61 = vpop.f32.mrb[20].mxu1  ;;  %v8739_v62 = vpack.c.bf16 %v1383_v55, %v1381_v46 }
 0x2b4   : > { %v1224_v1 = vadd.f32 %v1223_v59, %v8676_v7  ;;  %v1225_v2 = vpop.f32.mrb[21].mxu0  ;;  %v1304_v5 = vadd.f32 %v1303_v61, %v8676_v7  ;;  %v1305_v9 = vpop.f32.mrb[21].mxu1 }
 0x2b5   : > { %v1226_v10 = vadd.f32 %v1225_v2, %v8679_v8  ;;  %v1227_v12 = vpop.f32.mrb[22].mxu0  ;;  %1704 = vmatprep.mubr.bf16.mxu1 %v1405_v60  ;;  %v1306_v13 = vadd.f32 %v1305_v9, %v8679_v8  ;;  %v1307_v14 = vpop.f32.mrb[22].mxu1  ;;  %v7265_v60 = vld [vmem:[#allocation10 + $0xc0] ss:$8 sps:$4 sm:$0xff]   ;;  %v7270_v2 = vld [vmem:[#allocation10 + $0xd4] ss:$8 sps:$4 sm:$0xff]  }
 0x2b6   : > { %v1228_v15 = vadd.f32 %v1227_v12, %v8676_v7  ;;  %v1229_v17 = vpop.f32.mrb[23].mxu0  ;;  %1705 = vmatmul.mubr.bf16.gmra.mrb[48].mxu1 %v1404_v56  ;;  %v1384_v18 = vmax.f32 %v1304_v5, 0.0  ;;  %v1308_v19 = vadd.f32 %v1307_v14, %v8676_v7  ;;  %v1309_v20 = vpop.f32.mrb[23].mxu1  ;;  %v1352_v28 = vmax.f32 %v1224_v1, 0.0  ;;  %2150 = vmatpush1.bf16.msra.mxu0 %v7265_v60 }
 0x2b7   : > { %v1230_v23 = vadd.f32 %v1229_v17, %v8679_v8  ;;  %v1385_v24 = vmax.f32 %v1306_v13, 0.0  ;;  %v1310_v25 = vadd.f32 %v1309_v20, %v8679_v8  ;;  %v1353_v31 = vmax.f32 %v1226_v10, 0.0  ;;  %2151 = vmatprep.subr.bf16.mxu0 %v7270_v2 }
 0x2b8   : > { %v1354_v29 = vmax.f32 %v1228_v15, 0.0  ;;  %v1386_v30 = vmax.f32 %v1308_v19, 0.0 }
 0x2b9   : > { %v1355_v32 = vmax.f32 %v1230_v23, 0.0  ;;  %v1387_v33 = vmax.f32 %v1310_v25, 0.0 }
 0x2ba   : > { %v1406_v34 = vpack.c.bf16 %v1354_v29, %v1352_v28  ;;  %v8749_v35 = vpack.c.bf16 %v1386_v30, %v1384_v18  ;;  %v7268_v18 = vld [vmem:[#allocation10 + $0xd0] ss:$8 sps:$4 sm:$0xff]  }
 0x2bb   : > { %v1233_v38 = vpop.f32.mrb[24].mxu0  ;;  %v1407_v39 = vpack.c.bf16 %v1355_v32, %v1353_v31  ;;  %v1313_v40 = vpop.f32.mrb[24].mxu1  ;;  %v8751_v41 = vpack.c.bf16 %v1387_v33, %v1385_v24  ;;  %2152 = vmatpush1.bf16.msra.mxu0 %v7268_v18 }
 0x2bc   : > { %v1234_v44 = vadd.f32 %v1233_v38, %v8676_v7  ;;  %v1235_v46 = vpop.f32.mrb[25].mxu0  ;;  %v1314_v47 = vadd.f32 %v1313_v40, %v8676_v7  ;;  %v1315_v48 = vpop.f32.mrb[25].mxu1 }
 0x2bd   : > { %v1236_v49 = vadd.f32 %v1235_v46, %v8679_v8  ;;  %v1237_v51 = vpop.f32.mrb[26].mxu0  ;;  %1714 = vmatprep.mubr.bf16.mxu1 %v1407_v39  ;;  %v1316_v52 = vadd.f32 %v1315_v48, %v8679_v8  ;;  %v1317_v53 = vpop.f32.mrb[26].mxu1 }
 0x2be   : > { %v1238_v54 = vadd.f32 %v1237_v51, %v8676_v7  ;;  %v1239_v55 = vpop.f32.mrb[27].mxu0  ;;  %1715 = vmatmul.mubr.bf16.gmra.mrb[52].mxu1 %v1406_v34  ;;  %v1388_v56 = vmax.f32 %v1314_v47, 0.0  ;;  %v1318_v58 = vadd.f32 %v1317_v53, %v8676_v7  ;;  %v1319_v59 = vpop.f32.mrb[27].mxu1  ;;  %v1356_v5 = vmax.f32 %v1234_v44, 0.0 }
 0x2bf   : > { %v1240_v61 = vadd.f32 %v1239_v55, %v8679_v8  ;;  %v1389_v63 = vmax.f32 %v1316_v52, 0.0  ;;  %v1320_v1 = vadd.f32 %v1319_v59, %v8679_v8  ;;  %v1357_v12 = vmax.f32 %v1236_v49, 0.0 }
 0x2c0   : > { %v1358_v9 = vmax.f32 %v1238_v54, 0.0  ;;  %v1390_v10 = vmax.f32 %v1318_v58, 0.0  ;;  %v7276_v58 = vld [vmem:[#allocation10 + $0xf4] ss:$8 sps:$4 sm:$0xff]  }
 0x2c1   : > { %v1359_v13 = vmax.f32 %v1240_v61, 0.0  ;;  %v1391_v14 = vmax.f32 %v1320_v1, 0.0 }
 0x2c2   : > { %v1408_v15 = vpack.c.bf16 %v1358_v9, %v1356_v5  ;;  %v1424_v17 = vpack.c.bf16 %v1390_v10, %v1388_v56  ;;  %v7289_v9 = vld [vmem:[#allocation11 + $0x40] ss:$8 sps:$4 sm:$0xff]   ;;  %v7291_v10 = vld [vmem:[#allocation11 + $0x44] ss:$8 sps:$4 sm:$0xff]  }
 0x2c3   : > { %v1243_v19 = vpop.f32.mrb[28].mxu0  ;;  %v1409_v20 = vpack.c.bf16 %v1359_v13, %v1357_v12  ;;  %v1323_v22 = vpop.f32.mrb[28].mxu1  ;;  %v1425_v23 = vpack.c.bf16 %v1391_v14, %v1389_v63  ;;  %v7294_v13 = vld [vmem:[#allocation11 + $0x54] ss:$8 sps:$4 sm:$0xff]  }
 0x2c4   : > { %v1244_v24 = vadd.f32 %v1243_v19, %v8676_v7  ;;  %v1245_v25 = vpop.f32.mrb[29].mxu0  ;;  %v1324_v27 = vadd.f32 %v1323_v22, %v8676_v7  ;;  %v1325_v28 = vpop.f32.mrb[29].mxu1  ;;  %v7292_v19 = vld [vmem:[#allocation11 + $0x50] ss:$8 sps:$4 sm:$0xff]   ;;  %v7297_v22 = vld [vmem:[#allocation11 + $0x64] ss:$8 sps:$4 sm:$0xff]  }
 0x2c5   : > { %v1246_v29 = vadd.f32 %v1245_v25, %v8679_v8  ;;  %v1247_v30 = vpop.f32.mrb[30].mxu0  ;;  %1724 = vmatprep.mubr.bf16.mxu1 %v1409_v20  ;;  %v1326_v31 = vadd.f32 %v1325_v28, %v8679_v8  ;;  %v1327_v32 = vpop.f32.mrb[30].mxu1 }
 0x2c6   : > { %v1248_v33 = vadd.f32 %v1247_v30, %v8676_v7  ;;  %v1249_v34 = vpop.f32.mrb[31].mxu0  ;;  %1725 = vmatmul.mubr.bf16.gmra.mrb[56].mxu1 %v1408_v15  ;;  %v1392_v36 = vmax.f32 %v1324_v27, 0.0  ;;  %v1328_v38 = vadd.f32 %v1327_v32, %v8676_v7  ;;  %v1329_v39 = vpop.f32.mrb[31].mxu1  ;;  %v1360_v46 = vmax.f32 %v1244_v24, 0.0  ;;  %v7273_v7 = vld [vmem:[#allocation10 + $0xe4] ss:$8 sps:$4 sm:$0xff]  }
 0x2c7   : > { %v1250_v40 = vadd.f32 %v1249_v34, %v8679_v8  ;;  %v1393_v43 = vmax.f32 %v1326_v31, 0.0  ;;  %v1330_v44 = vadd.f32 %v1329_v39, %v8679_v8  ;;  %v1361_v49 = vmax.f32 %v1246_v29, 0.0  ;;  %v7271_v8 = vld [vmem:[#allocation10 + $0xe0] ss:$8 sps:$4 sm:$0xff]   ;;  %2153 = vmatprep.subr.bf16.mxu0 %v7273_v7  ;;  %v7306_v7 = vld [vmem:[#allocation11 + $0x94] ss:$8 sps:$4 sm:$0xff]  }
 0x2c8   : > { %v1362_v47 = vmax.f32 %v1248_v33, 0.0  ;;  %v1394_v48 = vmax.f32 %v1328_v38, 0.0  ;;  %2154 = vmatpush1.bf16.msra.mxu0 %v7271_v8  ;;  %v7295_v30 = vld [vmem:[#allocation11 + $0x60] ss:$8 sps:$4 sm:$0xff]   ;;  %v7300_v33 = vld [vmem:[#allocation11 + $0x74] ss:$8 sps:$4 sm:$0xff]  }
 0x2c9   : > { %v1363_v51 = vmax.f32 %v1250_v40, 0.0  ;;  %v1395_v52 = vmax.f32 %v1330_v44, 0.0  ;;  %2155 = vmatprep.subr.bf16.mxu0 %v7276_v58 }
 0x2ca   : > { %v1410_v53 = vpack.c.bf16 %v1362_v47, %v1360_v46  ;;  %v1426_v54 = vpack.c.bf16 %v1394_v48, %v1392_v36  ;;  %v7303_v46 = vld [vmem:[#allocation11 + $0x84] ss:$8 sps:$4 sm:$0xff]  }
 0x2cb   : > { %v1411_v55 = vpack.c.bf16 %v1363_v51, %v1361_v49  ;;  %v1427_v56 = vpack.c.bf16 %v1395_v52, %v1393_v43  ;;  %v7298_v43 = vld [vmem:[#allocation11 + $0x70] ss:$8 sps:$4 sm:$0xff]  }
 0x2cd   : > { %1734 = vmatprep.mubr.bf16.mxu1 %v1411_v55 }
 0x2ce   : > { %1735 = vmatmul.mubr.bf16.gmra.mrb[60].mxu1 %v1410_v53 }
 0x2cf   : > { %1744 = vmatprep.mubr.bf16.mxu1 %v8691_v42  ;;  %v7277_v42 = vld [vmem:[#allocation11] ss:$8 sps:$4 sm:$0xff]  }
 0x2d6   : > { %1745 = vmatmul.mubr.bf16.gmra.mrb[64].mxu1 %v8689_v37  ;;  %v7274_v37 = vld [vmem:[#allocation10 + $0xf0] ss:$8 sps:$4 sm:$0xff]  }
 0x2d7   : > { %1754 = vmatprep.mubr.bf16.mxu1 %v8703_v16  ;;  %2156 = vmatpush1.bf16.msra.mxu0 %v7274_v37  ;;  %v7280_v16 = vld [vmem:[#allocation11 + $0x10] ss:$8 sps:$4 sm:$0xff]  }
 0x2de   : > { %1755 = vmatmul.mubr.bf16.gmra.mrb[68].mxu1 %v8701_v11  ;;  %v7279_v11 = vld [vmem:[#allocation11 + $0x4] ss:$8 sps:$4 sm:$0xff]  }
 0x2df   : > { %1764 = vmatprep.mubr.bf16.mxu1 %v8715_v50  ;;  %2618 = vmatprep.subr.bf16.mxu1 %v7279_v11  ;;  %v1460_v50 = vld [vmem:[%s9747_s4] sm:$0x3]  ;;  %s9752_s4 = sld [smem:[#allocation51_spill]] }
 0x2e0   : > { %2619 = vmatpush1.bf16.msra.mxu1 %v7277_v42 }
 0x2e6   : > { %1765 = vmatmul.mubr.bf16.gmra.mrb[72].mxu1 %v8713_v45  ;;  %v7282_v45 = vld [vmem:[#allocation11 + $0x14] ss:$8 sps:$4 sm:$0xff]  }
 0x2e7   : > { %1774 = vmatprep.mubr.bf16.mxu1 %v8727_v26  ;;  %2620 = vmatprep.subr.bf16.mxu1 %v7282_v45  ;;  %v7285_v26 = vld [vmem:[#allocation11 + $0x24] ss:$8 sps:$4 sm:$0xff]  }
 0x2e8   : > { %2621 = vmatpush1.bf16.msra.mxu1 %v7280_v16  ;;  %v7304_v16 = vld [vmem:[#allocation11 + $0x90] ss:$8 sps:$4 sm:$0xff]  }
 0x2e9   : > { %2622 = vmatprep.subr.bf16.mxu1 %v7285_v26 }
 0x2ee   : > { %1775 = vmatmul.mubr.bf16.gmra.mrb[76].mxu1 %v8725_v21  ;;  %v7283_v21 = vld [vmem:[#allocation11 + $0x20] ss:$8 sps:$4 sm:$0xff]  }
 0x2ef   : > { %1784 = vmatprep.mubr.bf16.mxu1 %v8739_v62  ;;  %v8788_v62 = vrot.slane %v1460_v50, %v8673_v6  ;;  %2623 = vmatpush1.bf16.msra.mxu1 %v7283_v21 }
 0x2f6   : > { %1785 = vmatmul.mubr.bf16.gmra.mrb[80].mxu1 %v8737_v57  ;;  %v8785_v57 = vrot.slane %v1460_v50, %v8667_v4  ;;  %v7309_v50 = vld [vmem:[#allocation11 + $0xa4] ss:$8 sps:$4 sm:$0xff]  }
 0x2f7   : > { %1794 = vmatprep.mubr.bf16.mxu1 %v8751_v41  ;;  %v7288_v41 = vld [vmem:[#allocation11 + $0x34] ss:$8 sps:$4 sm:$0xff]  }
 0x2f8   : > { %2624 = vmatprep.subr.bf16.mxu1 %v7288_v41 }
 0x2fe   : > { %1795 = vmatmul.mubr.bf16.gmra.mrb[84].mxu1 %v8749_v35  ;;  %v7286_v35 = vld [vmem:[#allocation11 + $0x30] ss:$8 sps:$4 sm:$0xff]  }
 0x2ff   : > { %1804 = vmatprep.mubr.bf16.mxu1 %v1425_v23  ;;  %2625 = vmatpush1.bf16.msra.mxu1 %v7286_v35 }
 0x300   : > { %2626 = vmatprep.subr.bf16.mxu1 %v7291_v10 }
 0x303   : > { %2627 = vmatpush1.bf16.msra.mxu1 %v7289_v9 }
 0x304   : > { %2628 = vmatprep.subr.bf16.mxu1 %v7294_v13 }
 0x306   : > { %1805 = vmatmul.mubr.bf16.gmra.mrb[88].mxu1 %v1424_v17 }
 0x307   : > { %1814 = vmatprep.mubr.bf16.mxu1 %v1427_v56  ;;  %2629 = vmatpush1.bf16.msra.mxu1 %v7292_v19 }
 0x308   : > { %2630 = vmatprep.subr.bf16.mxu1 %v7297_v22 }
 0x30b   : > { %2631 = vmatpush1.bf16.msra.mxu1 %v7295_v30 }
 0x30c   : > { %2632 = vmatprep.subr.bf16.mxu1 %v7300_v33 }
 0x30e   : > { %1815 = vmatmul.mubr.bf16.gmra.mrb[92].mxu1 %v1426_v54  ;;  %v7301_v54 = vld [vmem:[#allocation11 + $0x80] ss:$8 sps:$4 sm:$0xff]  }
 0x30f   : > { %2633 = vmatpush1.bf16.msra.mxu1 %v7298_v43 }
 0x310   : > { %2634 = vmatprep.subr.bf16.mxu1 %v7303_v46 }
 0x313   : > { %2635 = vmatpush1.bf16.msra.mxu1 %v7301_v54 }
 0x314   : > { %2636 = vmatprep.subr.bf16.mxu1 %v7306_v7 }
 0x317   : > { %2637 = vmatpush1.bf16.msra.mxu1 %v7304_v16 }
 0x318   : > { %2638 = vmatprep.subr.bf16.mxu1 %v7309_v50 }
 0x369   : > { %v1666_v59 = vpop.f32.mrb[32].mxu1 }
 0x36a   : > { %v1667_v60 = vadd.f32 %v1666_v59, %v8785_v57  ;;  %v1668_v61 = vpop.f32.mrb[33].mxu1 }
 0x36b   : > { %v1669_v63 = vadd.f32 %v1668_v61, %v8788_v62  ;;  %v1670_v1 = vpop.f32.mrb[34].mxu1  ;;  %v7307_v61 = vld [vmem:[#allocation11 + $0xa0] ss:$8 sps:$4 sm:$0xff]  }
 0x36c   : > { %v1671_v2 = vadd.f32 %v1670_v1, %v8785_v57  ;;  %v1672_v5 = vpop.f32.mrb[35].mxu1  ;;  %v1825_v14 = vmax.f32 %v1667_v60, 0.0  ;;  %2639 = vmatpush1.bf16.msra.mxu1 %v7307_v61 }
 0x36d   : > { %v1673_v12 = vadd.f32 %v1672_v5, %v8788_v62  ;;  %v1826_v17 = vmax.f32 %v1669_v63, 0.0 }
 0x36e   : > { %v1827_v15 = vmax.f32 %v1671_v2, 0.0  ;;  %v7312_v2 = vld [vmem:[#allocation11 + $0xb4] ss:$8 sps:$4 sm:$0xff]  }
 0x36f   : > { %v1828_v18 = vmax.f32 %v1673_v12, 0.0  ;;  %2640 = vmatprep.subr.bf16.mxu1 %v7312_v2 }
 0x370   : > { %v1889_v20 = vpack.c.bf16 %v1827_v15, %v1825_v14  ;;  %v7310_v14 = vld [vmem:[#allocation11 + $0xb0] ss:$8 sps:$4 sm:$0xff]  }
 0x371   : > { %v1676_v23 = vpop.f32.mrb[36].mxu1  ;;  %v1890_v24 = vpack.c.bf16 %v1828_v18, %v1826_v17  ;;  %v7315_v17 = vld [vmem:[#allocation11 + $0xc4] ss:$8 sps:$4 sm:$0xff]   ;;  %2641 = vmatpush1.bf16.msra.mxu1 %v7310_v14 }
 0x372   : > { %v1677_v25 = vadd.f32 %v1676_v23, %v8785_v57  ;;  %v1678_v27 = vpop.f32.mrb[37].mxu1  ;;  %2642 = vmatprep.subr.bf16.mxu1 %v7315_v17 }
 0x373   : > { %v1679_v28 = vadd.f32 %v1678_v27, %v8788_v62  ;;  %v1680_v29 = vpop.f32.mrb[38].mxu1  ;;  %2157 = vmatprep.mubr.bf16.mxu0 %v1890_v24 }
 0x374   : > { %v1681_v31 = vadd.f32 %v1680_v29, %v8785_v57  ;;  %v1682_v32 = vpop.f32.mrb[39].mxu1  ;;  %2158 = vmatmul.mubr.bf16.vlgmr.msra.gmra.mrb[32].mxu0 %v1889_v20  ;;  %v1829_v36 = vmax.f32 %v1677_v25, 0.0  ;;  %v7313_v25 = vld [vmem:[#allocation11 + $0xc0] ss:$8 sps:$4 sm:$0xff]   ;;  %v7318_v29 = vld [vmem:[#allocation11 + $0xd4] ss:$8 sps:$4 sm:$0xff]  }
 0x375   : > { %v1683_v34 = vadd.f32 %v1682_v32, %v8788_v62  ;;  %v1830_v39 = vmax.f32 %v1679_v28, 0.0  ;;  %2643 = vmatpush1.bf16.msra.mxu1 %v7313_v25 }
 0x376   : > { %v1831_v38 = vmax.f32 %v1681_v31, 0.0  ;;  %2644 = vmatprep.subr.bf16.mxu1 %v7318_v29 }
 0x377   : > { %v1832_v40 = vmax.f32 %v1683_v34, 0.0 }
 0x378   : > { %v1891_v44 = vpack.c.bf16 %v1831_v38, %v1829_v36  ;;  %v7316_v36 = vld [vmem:[#allocation11 + $0xd0] ss:$8 sps:$4 sm:$0xff]  }
 0x379   : > { %v1686_v47 = vpop.f32.mrb[40].mxu1  ;;  %v1892_v48 = vpack.c.bf16 %v1832_v40, %v1830_v39  ;;  %v7321_v39 = vld [vmem:[#allocation11 + $0xe4] ss:$8 sps:$4 sm:$0xff]   ;;  %2645 = vmatpush1.bf16.msra.mxu1 %v7316_v36 }
 0x37a   : > { %v1687_v49 = vadd.f32 %v1686_v47, %v8785_v57  ;;  %v1688_v51 = vpop.f32.mrb[41].mxu1  ;;  %2646 = vmatprep.subr.bf16.mxu1 %v7321_v39 }
 0x37b   : > { %v1689_v52 = vadd.f32 %v1688_v51, %v8788_v62  ;;  %v1690_v53 = vpop.f32.mrb[42].mxu1  ;;  %2167 = vmatprep.mubr.bf16.mxu0 %v1892_v48 }
 0x37c   : > { %v1691_v55 = vadd.f32 %v1690_v53, %v8785_v57  ;;  %v1692_v56 = vpop.f32.mrb[43].mxu1  ;;  %2168 = vmatmul.mubr.bf16.gmra.mrb[36].mxu0 %v1891_v44  ;;  %v1833_v58 = vmax.f32 %v1687_v49, 0.0  ;;  %v7319_v49 = vld [vmem:[#allocation11 + $0xe0] ss:$8 sps:$4 sm:$0xff]  }
 0x37d   : > { %v1693_v8 = vadd.f32 %v1692_v56, %v8788_v62  ;;  %v1834_v42 = vmax.f32 %v1689_v52, 0.0  ;;  %2647 = vmatpush1.bf16.msra.mxu1 %v7319_v49 }
 0x37e   : > { %v1835_v37 = vmax.f32 %v1691_v55, 0.0 }
 0x37f   : > { %v1836_v11 = vmax.f32 %v1693_v8, 0.0 }
 0x380   : > { %v1893_v45 = vpack.c.bf16 %v1835_v37, %v1833_v58 }
 0x381   : > { %v1696_v21 = vpop.f32.mrb[44].mxu1  ;;  %v1894_v26 = vpack.c.bf16 %v1836_v11, %v1834_v42 }
 0x382   : > { %v1697_v35 = vadd.f32 %v1696_v21, %v8785_v57  ;;  %v1698_v41 = vpop.f32.mrb[45].mxu1 }
 0x383   : > { %v1699_v59 = vadd.f32 %v1698_v41, %v8788_v62  ;;  %v1700_v60 = vpop.f32.mrb[46].mxu1  ;;  %2177 = vmatprep.mubr.bf16.mxu0 %v1894_v26 }
 0x384   : > { %v1701_v63 = vadd.f32 %v1700_v60, %v8785_v57  ;;  %v1702_v1 = vpop.f32.mrb[47].mxu1  ;;  %2178 = vmatmul.mubr.bf16.gmra.mrb[40].mxu0 %v1893_v45  ;;  %v1837_v9 = vmax.f32 %v1697_v35, 0.0 }
 0x385   : > { %v1703_v5 = vadd.f32 %v1702_v1, %v8788_v62  ;;  %v1838_v12 = vmax.f32 %v1699_v59, 0.0 }
 0x386   : > { %v1839_v10 = vmax.f32 %v1701_v63, 0.0 }
 0x387   : > { %v1840_v13 = vmax.f32 %v1703_v5, 0.0 }
 0x388   : > { %v1895_v15 = vpack.c.bf16 %v1839_v10, %v1837_v9 }
 0x389   : > { %v1706_v18 = vpop.f32.mrb[48].mxu1  ;;  %v1896_v19 = vpack.c.bf16 %v1840_v13, %v1838_v12 }
 0x38a   : > { %v1707_v20 = vadd.f32 %v1706_v18, %v8785_v57  ;;  %v1708_v22 = vpop.f32.mrb[49].mxu1 }
 0x38b   : > { %v1709_v23 = vadd.f32 %v1708_v22, %v8788_v62  ;;  %v1710_v24 = vpop.f32.mrb[50].mxu1  ;;  %2187 = vmatprep.mubr.bf16.mxu0 %v1896_v19 }
 0x38c   : > { %v1711_v27 = vadd.f32 %v1710_v24, %v8785_v57  ;;  %v1712_v28 = vpop.f32.mrb[51].mxu1  ;;  %2188 = vmatmul.mubr.bf16.gmra.mrb[44].mxu0 %v1895_v15  ;;  %v1841_v31 = vmax.f32 %v1707_v20, 0.0 }
 0x38d   : > { %v1713_v30 = vadd.f32 %v1712_v28, %v8788_v62  ;;  %v1842_v33 = vmax.f32 %v1709_v23, 0.0 }
 0x38e   : > { %v1843_v32 = vmax.f32 %v1711_v27, 0.0 }
 0x38f   : > { %v1844_v34 = vmax.f32 %v1713_v30, 0.0 }
 0x390   : > { %v1897_v38 = vpack.c.bf16 %v1843_v32, %v1841_v31 }
 0x391   : > { %v1716_v40 = vpop.f32.mrb[52].mxu1  ;;  %v1898_v43 = vpack.c.bf16 %v1844_v34, %v1842_v33 }
 0x392   : > { %v1717_v44 = vadd.f32 %v1716_v40, %v8785_v57  ;;  %v1718_v46 = vpop.f32.mrb[53].mxu1 }
 0x393   : > { %v1719_v47 = vadd.f32 %v1718_v46, %v8788_v62  ;;  %v1720_v48 = vpop.f32.mrb[54].mxu1  ;;  %2197 = vmatprep.mubr.bf16.mxu0 %v1898_v43 }
 0x394   : > { %v1721_v51 = vadd.f32 %v1720_v48, %v8785_v57  ;;  %v1722_v52 = vpop.f32.mrb[55].mxu1  ;;  %2198 = vmatmul.mubr.bf16.gmra.mrb[48].mxu0 %v1897_v38  ;;  %v1845_v54 = vmax.f32 %v1717_v44, 0.0 }
 0x395   : > { %v1723_v53 = vadd.f32 %v1722_v52, %v8788_v62  ;;  %v1846_v56 = vmax.f32 %v1719_v47, 0.0 }
 0x396   : > { %v1847_v55 = vmax.f32 %v1721_v51, 0.0 }
 0x397   : > { %v1848_v7 = vmax.f32 %v1723_v53, 0.0 }
 0x398   : > { %v1899_v8 = vpack.c.bf16 %v1847_v55, %v1845_v54 }
 0x399   : > { %v1726_v58 = vpop.f32.mrb[56].mxu1  ;;  %v1900_v37 = vpack.c.bf16 %v1848_v7, %v1846_v56 }
 0x39a   : > { %v1727_v42 = vadd.f32 %v1726_v58, %v8785_v57  ;;  %v1728_v11 = vpop.f32.mrb[57].mxu1 }
 0x39b   : > { %v1729_v16 = vadd.f32 %v1728_v11, %v8788_v62  ;;  %v1730_v45 = vpop.f32.mrb[58].mxu1  ;;  %2207 = vmatprep.mubr.bf16.mxu0 %v1900_v37 }
 0x39c   : > { %v1731_v50 = vadd.f32 %v1730_v45, %v8785_v57  ;;  %v1732_v21 = vpop.f32.mrb[59].mxu1  ;;  %2208 = vmatmul.mubr.bf16.gmra.mrb[52].mxu0 %v1899_v8  ;;  %v1849_v35 = vmax.f32 %v1727_v42, 0.0 }
 0x39d   : > { %v1733_v26 = vadd.f32 %v1732_v21, %v8788_v62  ;;  %v1850_v59 = vmax.f32 %v1729_v16, 0.0 }
 0x39e   : > { %v1851_v41 = vmax.f32 %v1731_v50, 0.0 }
 0x39f   : > { %v1852_v60 = vmax.f32 %v1733_v26, 0.0 }
 0x3a0   : > { %v1901_v61 = vpack.c.bf16 %v1851_v41, %v1849_v35 }
 0x3a1   : > { %v1736_v63 = vpop.f32.mrb[60].mxu1  ;;  %v1902_v1 = vpack.c.bf16 %v1852_v60, %v1850_v59 }
 0x3a2   : > { %v1737_v2 = vadd.f32 %v1736_v63, %v8785_v57  ;;  %v1738_v5 = vpop.f32.mrb[61].mxu1 }
 0x3a3   : > { %v1739_v9 = vadd.f32 %v1738_v5, %v8788_v62  ;;  %v1740_v10 = vpop.f32.mrb[62].mxu1  ;;  %2217 = vmatprep.mubr.bf16.mxu0 %v1902_v1 }
 0x3a4   : > { %v1741_v12 = vadd.f32 %v1740_v10, %v8785_v57  ;;  %v1742_v13 = vpop.f32.mrb[63].mxu1  ;;  %2218 = vmatmul.mubr.bf16.gmra.mrb[56].mxu0 %v1901_v61  ;;  %v1853_v15 = vmax.f32 %v1737_v2, 0.0 }
 0x3a5   : > { %v1743_v14 = vadd.f32 %v1742_v13, %v8788_v62  ;;  %v1854_v18 = vmax.f32 %v1739_v9, 0.0 }
 0x3a6   : > { %v1855_v17 = vmax.f32 %v1741_v12, 0.0 }
 0x3a7   : > { %v1856_v19 = vmax.f32 %v1743_v14, 0.0 }
 0x3a8   : > { %v1903_v20 = vpack.c.bf16 %v1855_v17, %v1853_v15 }
 0x3a9   : > { %v1746_v22 = vpop.f32.mrb[64].mxu1  ;;  %v1904_v23 = vpack.c.bf16 %v1856_v19, %v1854_v18 }
 0x3aa   : > { %v1747_v24 = vadd.f32 %v1746_v22, %v8785_v57  ;;  %v1748_v25 = vpop.f32.mrb[65].mxu1 }
 0x3ab   : > { %v1749_v27 = vadd.f32 %v1748_v25, %v8788_v62  ;;  %v1750_v28 = vpop.f32.mrb[66].mxu1  ;;  %2227 = vmatprep.mubr.bf16.mxu0 %v1904_v23 }
 0x3ac   : > { %v1751_v29 = vadd.f32 %v1750_v28, %v8785_v57  ;;  %v1752_v30 = vpop.f32.mrb[67].mxu1  ;;  %2228 = vmatmul.mubr.bf16.gmra.mrb[60].mxu0 %v1903_v20  ;;  %v1857_v32 = vmax.f32 %v1747_v24, 0.0 }
 0x3ad   : > { %v1753_v31 = vadd.f32 %v1752_v30, %v8788_v62  ;;  %v1858_v34 = vmax.f32 %v1749_v27, 0.0 }
 0x3ae   : > { %v1859_v33 = vmax.f32 %v1751_v29, 0.0  ;;  %v7324_v29 = vld [vmem:[#allocation11 + $0xf4] ss:$8 sps:$4 sm:$0xff]  }
 0x3af   : > { %v1860_v36 = vmax.f32 %v1753_v31, 0.0  ;;  %v7322_v31 = vld [vmem:[#allocation11 + $0xf0] ss:$8 sps:$4 sm:$0xff]   ;;  %2648 = vmatprep.subr.bf16.mxu1 %v7324_v29 }
 0x3b0   : > { %v1905_v38 = vpack.c.bf16 %v1859_v33, %v1857_v32  ;;  %2649 = vmatpush1.bf16.msra.mxu1 %v7322_v31  ;;  %v7336_v31 = vld [vmem:[#allocation13 + $0x4c] ss:$12 sps:$4 sm:$0xff]  }
 0x3b1   : > { %v1756_v39 = vpop.f32.mrb[68].mxu1  ;;  %v1906_v40 = vpack.c.bf16 %v1860_v36, %v1858_v34 }
 0x3b2   : > { %v1757_v43 = vadd.f32 %v1756_v39, %v8785_v57  ;;  %v1758_v44 = vpop.f32.mrb[69].mxu1 }
 0x3b3   : > { %v1759_v46 = vadd.f32 %v1758_v44, %v8788_v62  ;;  %v1760_v47 = vpop.f32.mrb[70].mxu1  ;;  %2237 = vmatprep.mubr.bf16.mxu0 %v1906_v40 }
 0x3b4   : > { %v1761_v48 = vadd.f32 %v1760_v47, %v8785_v57  ;;  %v1762_v49 = vpop.f32.mrb[71].mxu1  ;;  %2238 = vmatmul.mubr.bf16.gmra.mrb[64].mxu0 %v1905_v38  ;;  %v1861_v52 = vmax.f32 %v1757_v43, 0.0 }
 0x3b5   : > { %v1763_v51 = vadd.f32 %v1762_v49, %v8788_v62  ;;  %v1862_v54 = vmax.f32 %v1759_v46, 0.0 }
 0x3b6   : > { %v1863_v53 = vmax.f32 %v1761_v48, 0.0 }
 0x3b7   : > { %v1864_v55 = vmax.f32 %v1763_v51, 0.0 }
 0x3b8   : > { %v1907_v56 = vpack.c.bf16 %v1863_v53, %v1861_v52 }
 0x3b9   : > { %v1766_v7 = vpop.f32.mrb[72].mxu1  ;;  %v1908_v8 = vpack.c.bf16 %v1864_v55, %v1862_v54 }
 0x3ba   : > { %v1767_v58 = vadd.f32 %v1766_v7, %v8785_v57  ;;  %v1768_v37 = vpop.f32.mrb[73].mxu1 }
 0x3bb   : > { %v1769_v42 = vadd.f32 %v1768_v37, %v8788_v62  ;;  %v1770_v11 = vpop.f32.mrb[74].mxu1  ;;  %2247 = vmatprep.mubr.bf16.mxu0 %v1908_v8 }
 0x3bc   : > { %v1771_v16 = vadd.f32 %v1770_v11, %v8785_v57  ;;  %v1772_v45 = vpop.f32.mrb[75].mxu1  ;;  %2248 = vmatmul.mubr.bf16.gmra.mrb[68].mxu0 %v1907_v56  ;;  %v1865_v21 = vmax.f32 %v1767_v58, 0.0 }
 0x3bd   : > { %v1773_v50 = vadd.f32 %v1772_v45, %v8788_v62  ;;  %v1866_v35 = vmax.f32 %v1769_v42, 0.0 }
 0x3be   : > { %v1867_v26 = vmax.f32 %v1771_v16, 0.0 }
 0x3bf   : > { %v1868_v41 = vmax.f32 %v1773_v50, 0.0 }
 0x3c0   : > { %v1909_v59 = vpack.c.bf16 %v1867_v26, %v1865_v21 }
 0x3c1   : > { %v1776_v60 = vpop.f32.mrb[76].mxu1  ;;  %v1910_v61 = vpack.c.bf16 %v1868_v41, %v1866_v35 }
 0x3c2   : > { %v1777_v63 = vadd.f32 %v1776_v60, %v8785_v57  ;;  %v1778_v1 = vpop.f32.mrb[77].mxu1 }
 0x3c3   : > { %v1779_v2 = vadd.f32 %v1778_v1, %v8788_v62  ;;  %v1780_v5 = vpop.f32.mrb[78].mxu1  ;;  %2257 = vmatprep.mubr.bf16.mxu0 %v1910_v61 }
 0x3c4   : > { %v1781_v9 = vadd.f32 %v1780_v5, %v8785_v57  ;;  %v1782_v10 = vpop.f32.mrb[79].mxu1  ;;  %2258 = vmatmul.mubr.bf16.gmra.mrb[72].mxu0 %v1909_v59  ;;  %v1869_v13 = vmax.f32 %v1777_v63, 0.0 }
 0x3c5   : > { %v1783_v12 = vadd.f32 %v1782_v10, %v8788_v62  ;;  %v1870_v15 = vmax.f32 %v1779_v2, 0.0 }
 0x3c6   : > { %v1871_v14 = vmax.f32 %v1781_v9, 0.0 }
 0x3c7   : > { %v1872_v17 = vmax.f32 %v1783_v12, 0.0 }
 0x3c8   : > { %v1911_v18 = vpack.c.bf16 %v1871_v14, %v1869_v13 }
 0x3c9   : > { %v1786_v19 = vpop.f32.mrb[80].mxu1  ;;  %v1912_v20 = vpack.c.bf16 %v1872_v17, %v1870_v15 }
 0x3ca   : > { %v1787_v22 = vadd.f32 %v1786_v19, %v8785_v57  ;;  %v1788_v23 = vpop.f32.mrb[81].mxu1 }
 0x3cb   : > { %v1789_v24 = vadd.f32 %v1788_v23, %v8788_v62  ;;  %v1790_v25 = vpop.f32.mrb[82].mxu1  ;;  %2267 = vmatprep.mubr.bf16.mxu0 %v1912_v20  ;;  %v7325_v20 = vld [vmem:[#allocation13] ss:$12 sps:$4 sm:$0xff]   ;;  %v7328_v23 = vld [vmem:[#allocation13 + $0x18] ss:$12 sps:$4 sm:$0xff]  }
 0x3cc   : > { %v1791_v27 = vadd.f32 %v1790_v25, %v8785_v57  ;;  %v1792_v28 = vpop.f32.mrb[83].mxu1  ;;  %2268 = vmatmul.mubr.bf16.gmra.mrb[76].mxu0 %v1911_v18  ;;  %v1873_v32 = vmax.f32 %v1787_v22, 0.0  ;;  %v7327_v22 = vld [vmem:[#allocation13 + $0x4] ss:$12 sps:$4 sm:$0xff]   ;;  %v7333_v25 = vld [vmem:[#allocation13 + $0x34] ss:$12 sps:$4 sm:$0xff]  }
 0x3cd   : > { %v1793_v30 = vadd.f32 %v1792_v28, %v8788_v62  ;;  %v1874_v34 = vmax.f32 %v1789_v24, 0.0  ;;  %3244 = vmatprep.subr.bf16.mxu0 %v7327_v22  ;;  %v7330_v24 = vld [vmem:[#allocation13 + $0x1c] ss:$12 sps:$4 sm:$0xff]   ;;  %v7349_v22 = vld [vmem:[#allocation13 + $0xc0] ss:$12 sps:$4 sm:$0xff]  }
 0x3ce   : > { %v1875_v33 = vmax.f32 %v1791_v27, 0.0  ;;  %3245 = vmatpush1.bf16.msra.mxu0 %v7325_v20 }
 0x3cf   : > { %v1876_v36 = vmax.f32 %v1793_v30, 0.0  ;;  %3246 = vmatprep.subr.bf16.mxu0 %v7330_v24  ;;  %v7334_v30 = vld [vmem:[#allocation13 + $0x48] ss:$12 sps:$4 sm:$0xff]  }
 0x3d0   : > { %v1913_v38 = vpack.c.bf16 %v1875_v33, %v1873_v32 }
 0x3d1   : > { %v1796_v39 = vpop.f32.mrb[84].mxu1  ;;  %v1914_v40 = vpack.c.bf16 %v1876_v36, %v1874_v34 }
 0x3d2   : > { %v1797_v43 = vadd.f32 %v1796_v39, %v8785_v57  ;;  %v1798_v44 = vpop.f32.mrb[85].mxu1  ;;  %3247 = vmatpush1.bf16.msra.mxu0 %v7328_v23  ;;  %v7373_v23 = vld [vmem:[#allocation13 + $0x110] ss:$12 sps:$4 sm:$0xff]  }
 0x3d3   : > { %v1799_v46 = vadd.f32 %v1798_v44, %v8788_v62  ;;  %v1800_v47 = vpop.f32.mrb[86].mxu1  ;;  %2277 = vmatprep.mubr.bf16.mxu0 %v1914_v40  ;;  %3248 = vmatprep.subr.bf16.mxu0 %v7333_v25  ;;  %v7337_v40 = vld [vmem:[#allocation13 + $0x60] ss:$12 sps:$4 sm:$0xff]  }
 0x3d4   : > { %v1801_v48 = vadd.f32 %v1800_v47, %v8785_v57  ;;  %v1802_v49 = vpop.f32.mrb[87].mxu1  ;;  %2278 = vmatmul.mubr.bf16.gmra.mrb[80].mxu0 %v1913_v38  ;;  %v1877_v52 = vmax.f32 %v1797_v43, 0.0  ;;  %v7339_v43 = vld [vmem:[#allocation13 + $0x64] ss:$12 sps:$4 sm:$0xff]  }
 0x3d5   : > { %v1803_v51 = vadd.f32 %v1802_v49, %v8788_v62  ;;  %v1878_v54 = vmax.f32 %v1799_v46, 0.0  ;;  %v7342_v46 = vld [vmem:[#allocation13 + $0x7c] ss:$12 sps:$4 sm:$0xff]  }
 0x3d6   : > { %v1879_v53 = vmax.f32 %v1801_v48, 0.0 }
 0x3d7   : > { %v1880_v55 = vmax.f32 %v1803_v51, 0.0 }
 0x3d8   : > { %v1915_v56 = vpack.c.bf16 %v1879_v53, %v1877_v52  ;;  %v7340_v53 = vld [vmem:[#allocation13 + $0x78] ss:$12 sps:$4 sm:$0xff]  }
 0x3d9   : > { %v1806_v7 = vpop.f32.mrb[88].mxu1  ;;  %v1916_v8 = vpack.c.bf16 %v1880_v55, %v1878_v54 }
 0x3da   : > { %v1807_v58 = vadd.f32 %v1806_v7, %v8785_v57  ;;  %v1808_v37 = vpop.f32.mrb[89].mxu1 }
 0x3db   : > { %v1809_v42 = vadd.f32 %v1808_v37, %v8788_v62  ;;  %v1810_v11 = vpop.f32.mrb[90].mxu1  ;;  %2287 = vmatprep.mubr.bf16.mxu0 %v1916_v8 }
 0x3dc   : > { %v1811_v16 = vadd.f32 %v1810_v11, %v8785_v57  ;;  %v1812_v45 = vpop.f32.mrb[91].mxu1  ;;  %2288 = vmatmul.mubr.bf16.gmra.mrb[84].mxu0 %v1915_v56  ;;  %v1881_v21 = vmax.f32 %v1807_v58, 0.0  ;;  %v7345_v56 = vld [vmem:[#allocation13 + $0x94] ss:$12 sps:$4 sm:$0xff]  }
 0x3dd   : > { %v1813_v50 = vadd.f32 %v1812_v45, %v8788_v62  ;;  %v1882_v35 = vmax.f32 %v1809_v42, 0.0  ;;  %v7364_v45 = vld [vmem:[#allocation13 + $0xc8] ss:$12 sps:$4 sm:$0xff]  }
 0x3de   : > { %v1883_v26 = vmax.f32 %v1811_v16, 0.0  ;;  %v7343_v16 = vld [vmem:[#allocation13 + $0x90] ss:$12 sps:$4 sm:$0xff]   ;;  %6671 = vmatprep.subr.bf16.mxu1 %v7364_v45 }
 0x3df   : > { %v1884_v41 = vmax.f32 %v1813_v50, 0.0 }
 0x3e0   : > { %v1917_v59 = vpack.c.bf16 %v1883_v26, %v1881_v21  ;;  %v7348_v21 = vld [vmem:[#allocation13 + $0xac] ss:$12 sps:$4 sm:$0xff]   ;;  %v7365_v26 = vld [vmem:[#allocation13 + $0x8] ss:$12 sps:$4 sm:$0xff]  }
 0x3e1   : > { %v1816_v60 = vpop.f32.mrb[92].mxu1  ;;  %v1918_v61 = vpack.c.bf16 %v1884_v41, %v1882_v35  ;;  %v7366_v35 = vld [vmem:[#allocation13 + $0xe0] ss:$12 sps:$4 sm:$0xff]  }
 0x3e2   : > { %v1817_v63 = vadd.f32 %v1816_v60, %v8785_v57  ;;  %v1818_v1 = vpop.f32.mrb[93].mxu1 }
 0x3e3   : > { %v1819_v2 = vadd.f32 %v1818_v1, %v8788_v62  ;;  %v1820_v5 = vpop.f32.mrb[94].mxu1  ;;  %2297 = vmatprep.mubr.bf16.mxu0 %v1918_v61 }
 0x3e4   : > { %v1821_v9 = vadd.f32 %v1820_v5, %v8785_v57  ;;  %v1822_v10 = vpop.f32.mrb[95].mxu1  ;;  %2298 = vmatmul.mubr.bf16.gmra.mrb[88].mxu0 %v1917_v59  ;;  %v1885_v13 = vmax.f32 %v1817_v63, 0.0  ;;  %v1953_v57 = vld [vmem:[%s9748_s24] sm:$0x3]  ;;  %s9753_s24 = sld [smem:[#allocation52_spill]] }
 0x3e5   : > { %v1823_v12 = vadd.f32 %v1822_v10, %v8788_v62  ;;  %v1886_v15 = vmax.f32 %v1819_v2, 0.0  ;;  %v7331_v62 = vld [vmem:[#allocation13 + $0x30] ss:$12 sps:$4 sm:$0xff]   ;;  %v8858_v27 = vrot.slane %v1953_v57, %v8667_v4  ;;  %v8861_v28 = vrot.slane %v1953_v57, %v8673_v6  ;;  %v7367_v63 = vld [vmem:[#allocation13 + $0x20] ss:$12 sps:$4 sm:$0xff]  }
 0x3e6   : > { %v1887_v14 = vmax.f32 %v1821_v9, 0.0  ;;  %3249 = vmatpush1.bf16.msra.mxu0 %v7331_v62  ;;  %v7346_v2 = vld [vmem:[#allocation13 + $0xa8] ss:$12 sps:$4 sm:$0xff]   ;;  %v7351_v10 = vld [vmem:[#allocation13 + $0xc4] ss:$12 sps:$4 sm:$0xff]  }
 0x3e7   : > { %v1888_v17 = vmax.f32 %v1823_v12, 0.0  ;;  %3250 = vmatprep.subr.bf16.mxu0 %v7336_v31  ;;  %v7371_v12 = vld [vmem:[#allocation13 + $0xf8] ss:$12 sps:$4 sm:$0xff]   ;;  %v7354_v57 = vld [vmem:[#allocation13 + $0xdc] ss:$12 sps:$4 sm:$0xff]  }
 0x3e8   : > { %v1919_v18 = vpack.c.bf16 %v1887_v14, %v1885_v13  ;;  %v7374_v31 = vld [vmem:[#allocation13 + $0x50] ss:$12 sps:$4 sm:$0xff]  }
 0x3e9   : > { %v1920_v19 = vpack.c.bf16 %v1888_v17, %v1886_v15 }
 0x3ea   : > { %3251 = vmatpush1.bf16.msra.mxu0 %v7334_v30 }
 0x3eb   : > { %2307 = vmatprep.mubr.bf16.mxu0 %v1920_v19  ;;  %3252 = vmatprep.subr.bf16.mxu0 %v7339_v43 }
 0x3ec   : > { %2308 = vmatmul.mubr.bf16.gmra.mrb[92].mxu0 %v1919_v18  ;;  %v7372_v18 = vld [vmem:[#allocation13 + $0x38] ss:$12 sps:$4 sm:$0xff]  }
 0x3ee   : > { %3253 = vmatpush1.bf16.msra.mxu0 %v7337_v40 }
 0x3ef   : > { %3254 = vmatprep.subr.bf16.mxu0 %v7342_v46 }
 0x3f2   : > { %3255 = vmatpush1.bf16.msra.mxu0 %v7340_v53 }
 0x3f3   : > { %3256 = vmatprep.subr.bf16.mxu0 %v7345_v56 }
 0x3f6   : > { %3257 = vmatpush1.bf16.msra.mxu0 %v7343_v16  ;;  %v7363_v16 = vld [vmem:[#allocation13 + $0x124] ss:$12 sps:$4 sm:$0xff]  }
 0x3f7   : > { %3258 = vmatprep.subr.bf16.mxu0 %v7348_v21 }
 0x3fa   : > { %3259 = vmatpush1.bf16.msra.mxu0 %v7346_v2 }
 0x3fb   : > { %3260 = vmatprep.subr.bf16.mxu0 %v7351_v10  ;;  %v7368_v10 = vld [vmem:[#allocation13 + $0x138] ss:$12 sps:$4 sm:$0xff]  }
 0x3fe   : > { %3261 = vmatpush1.bf16.msra.mxu0 %v7349_v22 }
 0x3ff   : > { %3262 = vmatprep.subr.bf16.mxu0 %v7354_v57 }
 0x447   : > { %v2159_v29 = vpop.f32.mrb[32].mxu0 }
 0x448   : > { %v2160_v32 = vadd.f32 %v2159_v29, %v8858_v27  ;;  %v2161_v33 = vpop.f32.mrb[33].mxu0 }
 0x449   : > { %v2162_v34 = vadd.f32 %v2161_v33, %v8861_v28  ;;  %v2163_v36 = vpop.f32.mrb[34].mxu0  ;;  %v7352_v33 = vld [vmem:[#allocation13 + $0xd8] ss:$12 sps:$4 sm:$0xff]  }
 0x44a   : > { %v2164_v38 = vadd.f32 %v2163_v36, %v8858_v27  ;;  %v2165_v39 = vpop.f32.mrb[35].mxu0  ;;  %v2318_v47 = vmax.f32 %v2160_v32, 0.0  ;;  %3263 = vmatpush1.bf16.msra.mxu0 %v7352_v33 }
 0x44b   : > { %v2166_v44 = vadd.f32 %v2165_v39, %v8861_v28  ;;  %v2319_v49 = vmax.f32 %v2162_v34, 0.0  ;;  %v7378_v39 = vld [vmem:[#allocation13 + $0x128] ss:$12 sps:$4 sm:$0xff]  }
 0x44c   : > { %v2320_v48 = vmax.f32 %v2164_v38, 0.0  ;;  %v7357_v38 = vld [vmem:[#allocation13 + $0xf4] ss:$12 sps:$4 sm:$0xff]  }
 0x44d   : > { %v2321_v51 = vmax.f32 %v2166_v44, 0.0  ;;  %3264 = vmatprep.subr.bf16.mxu0 %v7357_v38 }
 0x44e   : > { %v2382_v52 = vpack.c.bf16 %v2320_v48, %v2318_v47  ;;  %v7379_v47 = vld [vmem:[#allocation13 + $0x68] ss:$12 sps:$4 sm:$0xff]  }
 0x44f   : > { %v2383_v54 = vpack.c.bf16 %v2321_v51, %v2319_v49  ;;  %v2169_v55 = vpop.f32.mrb[36].mxu0  ;;  %v7355_v51 = vld [vmem:[#allocation13 + $0xf0] ss:$12 sps:$4 sm:$0xff]  }
 0x450   : > { %v2170_v7 = vadd.f32 %v2169_v55, %v8858_v27  ;;  %v2171_v8 = vpop.f32.mrb[37].mxu0  ;;  %3265 = vmatpush1.bf16.msra.mxu0 %v7355_v51 }
 0x451   : > { %v2172_v58 = vadd.f32 %v2171_v8, %v8861_v28  ;;  %v2173_v37 = vpop.f32.mrb[38].mxu0  ;;  %2650 = vmatprep.mubr.bf16.mxu1 %v2383_v54  ;;  %v7360_v54 = vld [vmem:[#allocation13 + $0x10c] ss:$12 sps:$4 sm:$0xff]  }
 0x452   : > { %v2174_v42 = vadd.f32 %v2173_v37, %v8858_v27  ;;  %v2175_v11 = vpop.f32.mrb[39].mxu0  ;;  %2651 = vmatmul.mubr.bf16.vlgmr.msra.gmra.mrb[96].mxu1 %v2382_v52  ;;  %v2322_v41 = vmax.f32 %v2170_v7, 0.0  ;;  %v7380_v52 = vld [vmem:[#allocation13 + $0x140] ss:$12 sps:$4 sm:$0xff]   ;;  %v7358_v37 = vld [vmem:[#allocation13 + $0x108] ss:$12 sps:$4 sm:$0xff]   ;;  %3266 = vmatprep.subr.bf16.mxu0 %v7360_v54 }
 0x453   : > { %v2176_v50 = vadd.f32 %v2175_v11, %v8861_v28  ;;  %v2323_v60 = vmax.f32 %v2172_v58, 0.0  ;;  %6672 = vmatpush3.bf16.msra.mxu1 %v7365_v26 }
 0x454   : > { %v2324_v59 = vmax.f32 %v2174_v42, 0.0  ;;  %6673 = vmatprep.subr.bf16.mxu1 %v7366_v35  ;;  %3267 = vmatpush1.bf16.msra.mxu0 %v7358_v37 }
 0x455   : > { %v2325_v61 = vmax.f32 %v2176_v50, 0.0  ;;  %3268 = vmatprep.subr.bf16.mxu0 %v7363_v16 }
 0x456   : > { %v2384_v1 = vpack.c.bf16 %v2324_v59, %v2322_v41  ;;  %v7361_v59 = vld [vmem:[#allocation13 + $0x120] ss:$12 sps:$4 sm:$0xff]  }
 0x457   : > { %v2385_v5 = vpack.c.bf16 %v2325_v61, %v2323_v60  ;;  %v2179_v9 = vpop.f32.mrb[40].mxu0  ;;  %6674 = vmatpush3.bf16.msra.mxu1 %v7367_v63  ;;  %v7370_v61 = vld [vmem:[#allocation13 + $0x13c] ss:$12 sps:$4 sm:$0xff]  }
 0x458   : > { %v2180_v13 = vadd.f32 %v2179_v9, %v8858_v27  ;;  %v2181_v14 = vpop.f32.mrb[41].mxu0  ;;  %6675 = vmatprep.subr.bf16.mxu1 %v7371_v12  ;;  %3269 = vmatpush1.bf16.msra.mxu0 %v7361_v59 }
 0x459   : > { %v2182_v15 = vadd.f32 %v2181_v14, %v8861_v28  ;;  %v2183_v17 = vpop.f32.mrb[42].mxu0  ;;  %2660 = vmatprep.mubr.bf16.mxu1 %v2385_v5  ;;  %3270 = vmatprep.subr.bf16.mxu0 %v7370_v61  ;;  %v7377_v14 = vld [vmem:[#allocation13 + $0x154] ss:$12 sps:$4 sm:$0xff]  }
 0x45a   : > { %v2184_v19 = vadd.f32 %v2183_v17, %v8858_v27  ;;  %v2185_v20 = vpop.f32.mrb[43].mxu0  ;;  %2661 = vmatmul.mubr.bf16.gmra.mrb[100].mxu1 %v2384_v1  ;;  %v2326_v62 = vmax.f32 %v2180_v13, 0.0 }
 0x45b   : > { %v2186_v24 = vadd.f32 %v2185_v20, %v8861_v28  ;;  %v2327_v29 = vmax.f32 %v2182_v15, 0.0  ;;  %6676 = vmatpush3.bf16.msra.mxu1 %v7372_v18 }
 0x45c   : > { %v2328_v25 = vmax.f32 %v2184_v19, 0.0  ;;  %6677 = vmatprep.subr.bf16.mxu1 %v7373_v23  ;;  %3271 = vmatpush1.bf16.msra.mxu0 %v7368_v10  ;;  %v7375_v23 = vld [vmem:[#allocation13 + $0x150] ss:$12 sps:$4 sm:$0xff]  }
 0x45d   : > { %v2329_v30 = vmax.f32 %v2186_v24, 0.0  ;;  %3272 = vmatprep.subr.bf16.mxu0 %v7377_v14 }
 0x45e   : > { %v2386_v32 = vpack.c.bf16 %v2328_v25, %v2326_v62 }
 0x45f   : > { %v2387_v34 = vpack.c.bf16 %v2329_v30, %v2327_v29  ;;  %v2189_v36 = vpop.f32.mrb[44].mxu0  ;;  %6678 = vmatpush3.bf16.msra.mxu1 %v7374_v31 }
 0x460   : > { %v2190_v40 = vadd.f32 %v2189_v36, %v8858_v27  ;;  %v2191_v43 = vpop.f32.mrb[45].mxu0  ;;  %6679 = vmatprep.subr.bf16.mxu1 %v7378_v39  ;;  %3273 = vmatpush1.bf16.msra.mxu0 %v7375_v23 }
 0x461   : > { %v2192_v44 = vadd.f32 %v2191_v43, %v8861_v28  ;;  %v2193_v46 = vpop.f32.mrb[46].mxu0  ;;  %2670 = vmatprep.mubr.bf16.mxu1 %v2387_v34 }
 0x462   : > { %v2194_v48 = vadd.f32 %v2193_v46, %v8858_v27  ;;  %v2195_v49 = vpop.f32.mrb[47].mxu0  ;;  %2671 = vmatmul.mubr.bf16.gmra.mrb[104].mxu1 %v2386_v32  ;;  %v2330_v55 = vmax.f32 %v2190_v40, 0.0 }
 0x463   : > { %v2196_v53 = vadd.f32 %v2195_v49, %v8861_v28  ;;  %v2331_v7 = vmax.f32 %v2192_v44, 0.0  ;;  %6680 = vmatpush3.bf16.msra.mxu1 %v7379_v47 }
 0x464   : > { %v2332_v56 = vmax.f32 %v2194_v48, 0.0  ;;  %6681 = vmatprep.subr.bf16.mxu1 %v7380_v52 }
 0x465   : > { %v2333_v8 = vmax.f32 %v2196_v53, 0.0 }
 0x466   : > { %v2388_v58 = vpack.c.bf16 %v2332_v56, %v2330_v55 }
 0x467   : > { %v2389_v42 = vpack.c.bf16 %v2333_v8, %v2331_v7  ;;  %v2199_v11 = vpop.f32.mrb[48].mxu0 }
 0x468   : > { %v2200_v45 = vadd.f32 %v2199_v11, %v8858_v27  ;;  %v2201_v50 = vpop.f32.mrb[49].mxu0 }
 0x469   : > { %v2202_v21 = vadd.f32 %v2201_v50, %v8861_v28  ;;  %v2203_v26 = vpop.f32.mrb[50].mxu0  ;;  %2680 = vmatprep.mubr.bf16.mxu1 %v2389_v42 }
 0x46a   : > { %v2204_v35 = vadd.f32 %v2203_v26, %v8858_v27  ;;  %v2205_v41 = vpop.f32.mrb[51].mxu0  ;;  %2681 = vmatmul.mubr.bf16.gmra.mrb[108].mxu1 %v2388_v58  ;;  %v2334_v63 = vmax.f32 %v2200_v45, 0.0 }
 0x46b   : > { %v2206_v60 = vadd.f32 %v2205_v41, %v8861_v28  ;;  %v2335_v2 = vmax.f32 %v2202_v21, 0.0 }
 0x46c   : > { %v2336_v1 = vmax.f32 %v2204_v35, 0.0 }
 0x46d   : > { %v2337_v5 = vmax.f32 %v2206_v60, 0.0 }
 0x46e   : > { %v2390_v9 = vpack.c.bf16 %v2336_v1, %v2334_v63 }
 0x46f   : > { %v2391_v12 = vpack.c.bf16 %v2337_v5, %v2335_v2  ;;  %v2209_v13 = vpop.f32.mrb[52].mxu0 }
 0x470   : > { %v2210_v15 = vadd.f32 %v2209_v13, %v8858_v27  ;;  %v2211_v17 = vpop.f32.mrb[53].mxu0 }
 0x471   : > { %v2212_v18 = vadd.f32 %v2211_v17, %v8861_v28  ;;  %v2213_v19 = vpop.f32.mrb[54].mxu0  ;;  %2690 = vmatprep.mubr.bf16.mxu1 %v2391_v12 }
 0x472   : > { %v2214_v20 = vadd.f32 %v2213_v19, %v8858_v27  ;;  %v2215_v22 = vpop.f32.mrb[55].mxu0  ;;  %2691 = vmatmul.mubr.bf16.gmra.mrb[112].mxu1 %v2390_v9  ;;  %v2338_v57 = vmax.f32 %v2210_v15, 0.0 }
 0x473   : > { %v2216_v24 = vadd.f32 %v2215_v22, %v8861_v28  ;;  %v2339_v25 = vmax.f32 %v2212_v18, 0.0 }
 0x474   : > { %v2340_v62 = vmax.f32 %v2214_v20, 0.0 }
 0x475   : > { %v2341_v29 = vmax.f32 %v2216_v24, 0.0 }
 0x476   : > { %v2392_v30 = vpack.c.bf16 %v2340_v62, %v2338_v57 }
 0x477   : > { %v2393_v31 = vpack.c.bf16 %v2341_v29, %v2339_v25  ;;  %v2219_v32 = vpop.f32.mrb[56].mxu0 }
 0x478   : > { %v2220_v33 = vadd.f32 %v2219_v32, %v8858_v27  ;;  %v2221_v34 = vpop.f32.mrb[57].mxu0 }
 0x479   : > { %v2222_v36 = vadd.f32 %v2221_v34, %v8861_v28  ;;  %v2223_v38 = vpop.f32.mrb[58].mxu0  ;;  %2700 = vmatprep.mubr.bf16.mxu1 %v2393_v31 }
 0x47a   : > { %v2224_v39 = vadd.f32 %v2223_v38, %v8858_v27  ;;  %v2225_v40 = vpop.f32.mrb[59].mxu0  ;;  %2701 = vmatmul.mubr.bf16.gmra.mrb[116].mxu1 %v2392_v30  ;;  %v2342_v44 = vmax.f32 %v2220_v33, 0.0 }
 0x47b   : > { %v2226_v43 = vadd.f32 %v2225_v40, %v8861_v28  ;;  %v2343_v47 = vmax.f32 %v2222_v36, 0.0 }
 0x47c   : > { %v2344_v46 = vmax.f32 %v2224_v39, 0.0 }
 0x47d   : > { %v2345_v48 = vmax.f32 %v2226_v43, 0.0 }
 0x47e   : > { %v2394_v49 = vpack.c.bf16 %v2344_v46, %v2342_v44 }
 0x47f   : > { %v2395_v51 = vpack.c.bf16 %v2345_v48, %v2343_v47  ;;  %v2229_v52 = vpop.f32.mrb[60].mxu0 }
 0x480   : > { %v2230_v53 = vadd.f32 %v2229_v52, %v8858_v27  ;;  %v2231_v54 = vpop.f32.mrb[61].mxu0 }
 0x481   : > { %v2232_v55 = vadd.f32 %v2231_v54, %v8861_v28  ;;  %v2233_v56 = vpop.f32.mrb[62].mxu0  ;;  %2710 = vmatprep.mubr.bf16.mxu1 %v2395_v51 }
 0x482   : > { %v2234_v7 = vadd.f32 %v2233_v56, %v8858_v27  ;;  %v2235_v8 = vpop.f32.mrb[63].mxu0  ;;  %2711 = vmatmul.mubr.bf16.gmra.mrb[120].mxu1 %v2394_v49  ;;  %v2346_v37 = vmax.f32 %v2230_v53, 0.0 }
 0x483   : > { %v2236_v58 = vadd.f32 %v2235_v8, %v8861_v28  ;;  %v2347_v11 = vmax.f32 %v2232_v55, 0.0  ;;  %v7381_v8 = vld [vmem:[#allocation13 + $0x80] ss:$12 sps:$4 sm:$0xff]  }
 0x484   : > { %v2348_v42 = vmax.f32 %v2234_v7, 0.0  ;;  %6682 = vmatpush3.bf16.msra.mxu1 %v7381_v8 }
 0x485   : > { %v2349_v16 = vmax.f32 %v2236_v58, 0.0 }
 0x486   : > { %v2396_v45 = vpack.c.bf16 %v2348_v42, %v2346_v37 }
 0x487   : > { %v2397_v50 = vpack.c.bf16 %v2349_v16, %v2347_v11  ;;  %v2239_v21 = vpop.f32.mrb[64].mxu0 }
 0x488   : > { %v2240_v26 = vadd.f32 %v2239_v21, %v8858_v27  ;;  %v2241_v35 = vpop.f32.mrb[65].mxu0 }
 0x489   : > { %v2242_v41 = vadd.f32 %v2241_v35, %v8861_v28  ;;  %v2243_v59 = vpop.f32.mrb[66].mxu0  ;;  %2720 = vmatprep.mubr.bf16.mxu1 %v2397_v50 }
 0x48a   : > { %v2244_v60 = vadd.f32 %v2243_v59, %v8858_v27  ;;  %v2245_v61 = vpop.f32.mrb[67].mxu0  ;;  %2721 = vmatmul.mubr.bf16.gmra.mrb[124].mxu1 %v2396_v45  ;;  %v2350_v1 = vmax.f32 %v2240_v26, 0.0  ;;  %v7385_v45 = vld [vmem:[#allocation13 + $0x158] ss:$12 sps:$4 sm:$0xff]  }
 0x48b   : > { %v2246_v63 = vadd.f32 %v2245_v61, %v8861_v28  ;;  %v2351_v5 = vmax.f32 %v2242_v41, 0.0  ;;  %v7386_v26 = vld [vmem:[#allocation13 + $0x98] ss:$12 sps:$4 sm:$0xff]   ;;  %6683 = vmatprep.subr.bf16.mxu1 %v7385_v45 }
 0x48c   : > { %v2352_v2 = vmax.f32 %v2244_v60, 0.0  ;;  %6684 = vmatpush3.bf16.msra.mxu1 %v7386_v26 }
 0x48d   : > { %v2353_v9 = vmax.f32 %v2246_v63, 0.0 }
 0x48e   : > { %v2398_v10 = vpack.c.bf16 %v2352_v2, %v2350_v1  ;;  %v7384_v1 = vld [vmem:[#allocation13 + $0x16c] ss:$12 sps:$4 sm:$0xff]   ;;  %v7387_v2 = vld [vmem:[#allocation13 + $0x170] ss:$12 sps:$4 sm:$0xff]  }
 0x48f   : > { %v2399_v12 = vpack.c.bf16 %v2353_v9, %v2351_v5  ;;  %v2249_v13 = vpop.f32.mrb[68].mxu0  ;;  %v7382_v9 = vld [vmem:[#allocation13 + $0x168] ss:$12 sps:$4 sm:$0xff]   ;;  %3274 = vmatprep.subr.bf16.mxu0 %v7384_v1  ;;  %6685 = vmatprep.subr.bf16.mxu1 %v7387_v2 }
 0x490   : > { %v2250_v14 = vadd.f32 %v2249_v13, %v8858_v27  ;;  %v2251_v15 = vpop.f32.mrb[69].mxu0  ;;  %3275 = vmatpush1.bf16.msra.mxu0 %v7382_v9 }
 0x491   : > { %v2252_v17 = vadd.f32 %v2251_v15, %v8861_v28  ;;  %v2253_v18 = vpop.f32.mrb[70].mxu0  ;;  %2730 = vmatprep.mubr.bf16.mxu1 %v2399_v12 }
 0x492   : > { %v2254_v19 = vadd.f32 %v2253_v18, %v8858_v27  ;;  %v2255_v20 = vpop.f32.mrb[71].mxu0  ;;  %2731 = vmatmul.mubr.bf16.gmra.mrb[128].mxu1 %v2398_v10  ;;  %v2354_v23 = vmax.f32 %v2250_v14, 0.0  ;;  %v7388_v10 = vld [vmem:[#allocation13 + $0xb0] ss:$12 sps:$4 sm:$0xff]  }
 0x493   : > { %v2256_v22 = vadd.f32 %v2255_v20, %v8861_v28  ;;  %v2355_v57 = vmax.f32 %v2252_v17, 0.0  ;;  %6686 = vmatpush3.bf16.msra.mxu1 %v7388_v10 }
 0x494   : > { %v2356_v24 = vmax.f32 %v2254_v19, 0.0 }
 0x495   : > { %v2357_v62 = vmax.f32 %v2256_v22, 0.0 }
 0x496   : > { %v2400_v25 = vpack.c.bf16 %v2356_v24, %v2354_v23 }
 0x497   : > { %v2401_v29 = vpack.c.bf16 %v2357_v62, %v2355_v57  ;;  %v2259_v30 = vpop.f32.mrb[72].mxu0 }
 0x498   : > { %v2260_v31 = vadd.f32 %v2259_v30, %v8858_v27  ;;  %v2261_v32 = vpop.f32.mrb[73].mxu0 }
 0x499   : > { %v2262_v33 = vadd.f32 %v2261_v32, %v8861_v28  ;;  %v2263_v34 = vpop.f32.mrb[74].mxu0  ;;  %2740 = vmatprep.mubr.bf16.mxu1 %v2401_v29 }
 0x49a   : > { %v2264_v36 = vadd.f32 %v2263_v34, %v8858_v27  ;;  %v2265_v38 = vpop.f32.mrb[75].mxu0  ;;  %2741 = vmatmul.mubr.bf16.gmra.mrb[132].mxu1 %v2400_v25  ;;  %v2358_v40 = vmax.f32 %v2260_v31, 0.0  ;;  %v7391_v31 = vld [vmem:[#allocation16 + $0x4] ss:$8 sps:$4 sm:$0xff]  }
 0x49b   : > { %v2266_v39 = vadd.f32 %v2265_v38, %v8861_v28  ;;  %v2359_v44 = vmax.f32 %v2262_v33, 0.0  ;;  %4014 = vmatprep.subr.bf16.mxu0 %v7391_v31  ;;  %v7392_v31 = vld [vmem:[#allocation16 + $0x10] ss:$8 sps:$4 sm:$0xff]  }
 0x49c   : > { %v2360_v43 = vmax.f32 %v2264_v36, 0.0 }
 0x49d   : > { %v2361_v46 = vmax.f32 %v2266_v39, 0.0 }
 0x49e   : > { %v2402_v47 = vpack.c.bf16 %v2360_v43, %v2358_v40 }
 0x49f   : > { %v2403_v48 = vpack.c.bf16 %v2361_v46, %v2359_v44  ;;  %v2269_v49 = vpop.f32.mrb[76].mxu0 }
 0x4a0   : > { %v2270_v51 = vadd.f32 %v2269_v49, %v8858_v27  ;;  %v2271_v52 = vpop.f32.mrb[77].mxu0 }
 0x4a1   : > { %v2272_v53 = vadd.f32 %v2271_v52, %v8861_v28  ;;  %v2273_v54 = vpop.f32.mrb[78].mxu0  ;;  %2750 = vmatprep.mubr.bf16.mxu1 %v2403_v48 }
 0x4a2   : > { %v2274_v55 = vadd.f32 %v2273_v54, %v8858_v27  ;;  %v2275_v56 = vpop.f32.mrb[79].mxu0  ;;  %2751 = vmatmul.mubr.bf16.gmra.mrb[136].mxu1 %v2402_v47  ;;  %v2362_v58 = vmax.f32 %v2270_v51, 0.0 }
 0x4a3   : > { %v2276_v7 = vadd.f32 %v2275_v56, %v8861_v28  ;;  %v2363_v42 = vmax.f32 %v2272_v53, 0.0 }
 0x4a4   : > { %v2364_v37 = vmax.f32 %v2274_v55, 0.0 }
 0x4a5   : > { %v2365_v11 = vmax.f32 %v2276_v7, 0.0 }
 0x4a6   : > { %v2404_v16 = vpack.c.bf16 %v2364_v37, %v2362_v58 }
 0x4a7   : > { %v2405_v50 = vpack.c.bf16 %v2365_v11, %v2363_v42  ;;  %v2279_v21 = vpop.f32.mrb[80].mxu0 }
 0x4a8   : > { %v2280_v35 = vadd.f32 %v2279_v21, %v8858_v27  ;;  %v2281_v41 = vpop.f32.mrb[81].mxu0 }
 0x4a9   : > { %v2282_v59 = vadd.f32 %v2281_v41, %v8861_v28  ;;  %v2283_v60 = vpop.f32.mrb[82].mxu0  ;;  %2760 = vmatprep.mubr.bf16.mxu1 %v2405_v50 }
 0x4aa   : > { %v2284_v61 = vadd.f32 %v2283_v60, %v8858_v27  ;;  %v2285_v63 = vpop.f32.mrb[83].mxu0  ;;  %2761 = vmatmul.mubr.bf16.gmra.mrb[140].mxu1 %v2404_v16  ;;  %v2366_v12 = vmax.f32 %v2280_v35, 0.0 }
 0x4ab   : > { %v2286_v5 = vadd.f32 %v2285_v63, %v8861_v28  ;;  %v2367_v14 = vmax.f32 %v2282_v59, 0.0  ;;  %v2446_v59 = vld [vmem:[%s9749_s2] sm:$0x3] }
 0x4ac   : > { %v2368_v13 = vmax.f32 %v2284_v61, 0.0  ;;  %v8931_v60 = vrot.slane %v2446_v59, %v8667_v4 }
 0x4ad   : > { %v2369_v15 = vmax.f32 %v2286_v5, 0.0 }
 0x4ae   : > { %v2406_v17 = vpack.c.bf16 %v2368_v13, %v2366_v12 }
 0x4af   : > { %v2407_v18 = vpack.c.bf16 %v2369_v15, %v2367_v14  ;;  %v2289_v19 = vpop.f32.mrb[84].mxu0 }
 0x4b0   : > { %v2290_v20 = vadd.f32 %v2289_v19, %v8858_v27  ;;  %v2291_v22 = vpop.f32.mrb[85].mxu0 }
 0x4b1   : > { %v2292_v23 = vadd.f32 %v2291_v22, %v8861_v28  ;;  %v2293_v24 = vpop.f32.mrb[86].mxu0  ;;  %2770 = vmatprep.mubr.bf16.mxu1 %v2407_v18 }
 0x4b2   : > { %v2294_v57 = vadd.f32 %v2293_v24, %v8858_v27  ;;  %v2295_v62 = vpop.f32.mrb[87].mxu0  ;;  %2771 = vmatmul.mubr.bf16.gmra.mrb[144].mxu1 %v2406_v17  ;;  %v2370_v29 = vmax.f32 %v2290_v20, 0.0  ;;  %v7389_v20 = vld [vmem:[#allocation16] ss:$8 sps:$4 sm:$0xff]   ;;  %v7394_v24 = vld [vmem:[#allocation16 + $0x14] ss:$8 sps:$4 sm:$0xff]  }
 0x4b3   : > { %v2296_v25 = vadd.f32 %v2295_v62, %v8861_v28  ;;  %v2371_v32 = vmax.f32 %v2292_v23, 0.0 }
 0x4b4   : > { %v2372_v30 = vmax.f32 %v2294_v57, 0.0 }
 0x4b5   : > { %v2373_v33 = vmax.f32 %v2296_v25, 0.0 }
 0x4b6   : > { %v2408_v34 = vpack.c.bf16 %v2372_v30, %v2370_v29 }
 0x4b7   : > { %v2409_v36 = vpack.c.bf16 %v2373_v33, %v2371_v32  ;;  %v2299_v38 = vpop.f32.mrb[88].mxu0 }
 0x4b8   : > { %v2300_v39 = vadd.f32 %v2299_v38, %v8858_v27  ;;  %v2301_v40 = vpop.f32.mrb[89].mxu0 }
 0x4b9   : > { %v2302_v43 = vadd.f32 %v2301_v40, %v8861_v28  ;;  %v2303_v44 = vpop.f32.mrb[90].mxu0  ;;  %2780 = vmatprep.mubr.bf16.mxu1 %v2409_v36 }
 0x4ba   : > { %v2304_v46 = vadd.f32 %v2303_v44, %v8858_v27  ;;  %v2305_v47 = vpop.f32.mrb[91].mxu0  ;;  %2781 = vmatmul.mubr.bf16.gmra.mrb[148].mxu1 %v2408_v34  ;;  %v2374_v49 = vmax.f32 %v2300_v39, 0.0  ;;  %v7397_v34 = vld [vmem:[#allocation16 + $0x24] ss:$8 sps:$4 sm:$0xff]   ;;  %v7395_v44 = vld [vmem:[#allocation16 + $0x20] ss:$8 sps:$4 sm:$0xff]  }
 0x4bb   : > { %v2306_v48 = vadd.f32 %v2305_v47, %v8861_v28  ;;  %v2375_v52 = vmax.f32 %v2302_v43, 0.0 }
 0x4bc   : > { %v2376_v51 = vmax.f32 %v2304_v46, 0.0 }
 0x4bd   : > { %v2377_v53 = vmax.f32 %v2306_v48, 0.0  ;;  %v7400_v48 = vld [vmem:[#allocation16 + $0x34] ss:$8 sps:$4 sm:$0xff]  }
 0x4be   : > { %v2410_v54 = vpack.c.bf16 %v2376_v51, %v2374_v49 }
 0x4bf   : > { %v2411_v55 = vpack.c.bf16 %v2377_v53, %v2375_v52  ;;  %v2309_v56 = vpop.f32.mrb[92].mxu0 }
 0x4c0   : > { %v2310_v7 = vadd.f32 %v2309_v56, %v8858_v27  ;;  %v2311_v8 = vpop.f32.mrb[93].mxu0 }
 0x4c1   : > { %v2312_v58 = vadd.f32 %v2311_v8, %v8861_v28  ;;  %v2313_v37 = vpop.f32.mrb[94].mxu0  ;;  %2790 = vmatprep.mubr.bf16.mxu1 %v2411_v55  ;;  %v7398_v55 = vld [vmem:[#allocation16 + $0x30] ss:$8 sps:$4 sm:$0xff]   ;;  %v7403_v8 = vld [vmem:[#allocation16 + $0x44] ss:$8 sps:$4 sm:$0xff]  }
 0x4c2   : > { %v2314_v42 = vadd.f32 %v2313_v37, %v8858_v27  ;;  %v2315_v11 = vpop.f32.mrb[95].mxu0  ;;  %2791 = vmatmul.mubr.bf16.gmra.mrb[152].mxu1 %v2410_v54  ;;  %v2378_v45 = vmax.f32 %v2310_v7, 0.0  ;;  %v8934_v27 = vrot.slane %v2446_v59, %v8673_v6 }
 0x4c3   : > { %v2316_v16 = vadd.f32 %v2315_v11, %v8861_v28  ;;  %v2379_v21 = vmax.f32 %v2312_v58, 0.0 }
 0x4c4   : > { %v2380_v50 = vmax.f32 %v2314_v42, 0.0 }
 0x4c5   : > { %v2381_v26 = vmax.f32 %v2316_v16, 0.0 }
 0x4c6   : > { %v2412_v35 = vpack.c.bf16 %v2380_v50, %v2378_v45  ;;  %v7401_v45 = vld [vmem:[#allocation16 + $0x40] ss:$8 sps:$4 sm:$0xff]  }
 0x4c7   : > { %v2413_v41 = vpack.c.bf16 %v2381_v26, %v2379_v21  ;;  %v7406_v26 = vld [vmem:[#allocation16 + $0x54] ss:$8 sps:$4 sm:$0xff]  }
 0x4c9   : > { %2800 = vmatprep.mubr.bf16.mxu1 %v2413_v41 }
 0x4ca   : > { %2801 = vmatmul.mubr.bf16.gmra.mrb[156].mxu1 %v2412_v35 }
 0x525   : > { %v2652_v61 = vpop.f32.mrb[96].mxu1 }
 0x526   : > { %v2653_v28 = vadd.f32 %v2652_v61, %v8931_v60  ;;  %v2654_v63 = vpop.f32.mrb[97].mxu1 }
 0x527   : > { %v2655_v1 = vadd.f32 %v2654_v63, %v8934_v27  ;;  %v2656_v2 = vpop.f32.mrb[98].mxu1  ;;  %v7404_v63 = vld [vmem:[#allocation16 + $0x50] ss:$8 sps:$4 sm:$0xff]  }
 0x528   : > { %v2657_v5 = vadd.f32 %v2656_v2, %v8931_v60  ;;  %v2658_v9 = vpop.f32.mrb[99].mxu1  ;;  %v2811_v12 = vmax.f32 %v2653_v28, 0.0 }
 0x529   : > { %v2659_v10 = vadd.f32 %v2658_v9, %v8934_v27  ;;  %v2812_v14 = vmax.f32 %v2655_v1, 0.0 }
 0x52a   : > { %v2813_v13 = vmax.f32 %v2657_v5, 0.0  ;;  %v7409_v5 = vld [vmem:[#allocation16 + $0x64] ss:$8 sps:$4 sm:$0xff]  }
 0x52b   : > { %v2814_v15 = vmax.f32 %v2659_v10, 0.0 }
 0x52c   : > { %v2875_v17 = vpack.c.bf16 %v2813_v13, %v2811_v12 }
 0x52d   : > { %v2876_v18 = vpack.c.bf16 %v2814_v15, %v2812_v14  ;;  %v2662_v19 = vpop.f32.mrb[100].mxu1  ;;  %v7407_v15 = vld [vmem:[#allocation16 + $0x60] ss:$8 sps:$4 sm:$0xff]  }
 0x52e   : > { %v2663_v22 = vadd.f32 %v2662_v19, %v8931_v60  ;;  %v2664_v23 = vpop.f32.mrb[101].mxu1  ;;  %v7412_v19 = vld [vmem:[#allocation16 + $0x74] ss:$8 sps:$4 sm:$0xff]  }
 0x52f   : > { %v2665_v57 = vadd.f32 %v2664_v23, %v8934_v27  ;;  %v2666_v62 = vpop.f32.mrb[102].mxu1  ;;  %3276 = vmatprep.mubr.bf16.mxu0 %v2876_v18  ;;  %3469 = vmatprep.mubr.bf16.mxu1 %v2876_v18 }
 0x530   : > { %v2667_v25 = vadd.f32 %v2666_v62, %v8931_v60  ;;  %v2668_v29 = vpop.f32.mrb[103].mxu1  ;;  %3277 = vmatmul.mubr.bf16.vlgmr.msra.gmra.mrb[96].mxu0 %v2875_v17  ;;  %3470 = vmatmul.mubr.bf16.vlgmr.msra.gmra.mrb[160].mxu1 %v2875_v17  ;;  %v2815_v32 = vmax.f32 %v2663_v22, 0.0  ;;  %v7410_v62 = vld [vmem:[#allocation16 + $0x70] ss:$8 sps:$4 sm:$0xff]  }
 0x531   : > { %v2669_v30 = vadd.f32 %v2668_v29, %v8934_v27  ;;  %4015 = vmatpush1.bf16.msra.mxu0 %v7389_v20  ;;  %v2816_v36 = vmax.f32 %v2665_v57, 0.0 }
 0x532   : > { %v2817_v33 = vmax.f32 %v2667_v25, 0.0  ;;  %4016 = vmatprep.subr.bf16.mxu0 %v7394_v24 }
 0x533   : > { %v2818_v38 = vmax.f32 %v2669_v30, 0.0  ;;  %v7415_v30 = vld [vmem:[#allocation14 + $0x4] ss:$8 sps:$4 sm:$0xff]  }
 0x534   : > { %v2877_v39 = vpack.c.bf16 %v2817_v33, %v2815_v32 }
 0x535   : > { %v2878_v40 = vpack.c.bf16 %v2818_v38, %v2816_v36  ;;  %v2672_v43 = vpop.f32.mrb[104].mxu1  ;;  %4017 = vmatpush1.bf16.msra.mxu0 %v7392_v31 }
 0x536   : > { %v2673_v46 = vadd.f32 %v2672_v43, %v8931_v60  ;;  %v2674_v47 = vpop.f32.mrb[105].mxu1  ;;  %4018 = vmatprep.subr.bf16.mxu0 %v7397_v34 }
 0x537   : > { %v2675_v49 = vadd.f32 %v2674_v47, %v8934_v27  ;;  %v2676_v51 = vpop.f32.mrb[106].mxu1  ;;  %3286 = vmatprep.mubr.bf16.mxu0 %v2878_v40  ;;  %3477 = vmatprep.mubr.bf16.mxu1 %v2878_v40 }
 0x538   : > { %v2677_v52 = vadd.f32 %v2676_v51, %v8931_v60  ;;  %v2678_v53 = vpop.f32.mrb[107].mxu1  ;;  %3287 = vmatmul.mubr.bf16.gmra.mrb[100].mxu0 %v2877_v39  ;;  %3478 = vmatmul.mubr.bf16.gmra.mrb[164].mxu1 %v2877_v39  ;;  %v2819_v56 = vmax.f32 %v2673_v46, 0.0 }
 0x539   : > { %v2679_v54 = vadd.f32 %v2678_v53, %v8934_v27  ;;  %4019 = vmatpush1.bf16.msra.mxu0 %v7395_v44  ;;  %v2820_v58 = vmax.f32 %v2675_v49, 0.0 }
 0x53a   : > { %v2821_v7 = vmax.f32 %v2677_v52, 0.0  ;;  %4020 = vmatprep.subr.bf16.mxu0 %v7400_v48 }
 0x53b   : > { %v2822_v37 = vmax.f32 %v2679_v54, 0.0 }
 0x53c   : > { %v2879_v42 = vpack.c.bf16 %v2821_v7, %v2819_v56 }
 0x53d   : > { %v2880_v11 = vpack.c.bf16 %v2822_v37, %v2820_v58  ;;  %v2682_v16 = vpop.f32.mrb[108].mxu1  ;;  %4021 = vmatpush1.bf16.msra.mxu0 %v7398_v55 }
 0x53e   : > { %v2683_v50 = vadd.f32 %v2682_v16, %v8931_v60  ;;  %v2684_v21 = vpop.f32.mrb[109].mxu1  ;;  %4022 = vmatprep.subr.bf16.mxu0 %v7403_v8 }
 0x53f   : > { %v2685_v35 = vadd.f32 %v2684_v21, %v8934_v27  ;;  %v2686_v41 = vpop.f32.mrb[110].mxu1  ;;  %3296 = vmatprep.mubr.bf16.mxu0 %v2880_v11  ;;  %3485 = vmatprep.mubr.bf16.mxu1 %v2880_v11 }
 0x540   : > { %v2687_v59 = vadd.f32 %v2686_v41, %v8931_v60  ;;  %v2688_v61 = vpop.f32.mrb[111].mxu1  ;;  %3297 = vmatmul.mubr.bf16.gmra.mrb[104].mxu0 %v2879_v42  ;;  %3486 = vmatmul.mubr.bf16.gmra.mrb[168].mxu1 %v2879_v42  ;;  %v2823_v1 = vmax.f32 %v2683_v50, 0.0 }
 0x541   : > { %v2689_v28 = vadd.f32 %v2688_v61, %v8934_v27  ;;  %4023 = vmatpush1.bf16.msra.mxu0 %v7401_v45  ;;  %v2824_v9 = vmax.f32 %v2685_v35, 0.0 }
 0x542   : > { %v2825_v2 = vmax.f32 %v2687_v59, 0.0  ;;  %4024 = vmatprep.subr.bf16.mxu0 %v7406_v26 }
 0x543   : > { %v2826_v10 = vmax.f32 %v2689_v28, 0.0 }
 0x544   : > { %v2881_v12 = vpack.c.bf16 %v2825_v2, %v2823_v1 }
 0x545   : > { %v2882_v13 = vpack.c.bf16 %v2826_v10, %v2824_v9  ;;  %v2692_v14 = vpop.f32.mrb[112].mxu1  ;;  %4025 = vmatpush1.bf16.msra.mxu0 %v7404_v63 }
 0x546   : > { %v2693_v17 = vadd.f32 %v2692_v14, %v8931_v60  ;;  %v2694_v18 = vpop.f32.mrb[113].mxu1  ;;  %4026 = vmatprep.subr.bf16.mxu0 %v7409_v5 }
 0x547   : > { %v2695_v20 = vadd.f32 %v2694_v18, %v8934_v27  ;;  %v2696_v22 = vpop.f32.mrb[114].mxu1  ;;  %3306 = vmatprep.mubr.bf16.mxu0 %v2882_v13  ;;  %3493 = vmatprep.mubr.bf16.mxu1 %v2882_v13 }
 0x548   : > { %v2697_v23 = vadd.f32 %v2696_v22, %v8931_v60  ;;  %v2698_v24 = vpop.f32.mrb[115].mxu1  ;;  %3307 = vmatmul.mubr.bf16.gmra.mrb[108].mxu0 %v2881_v12  ;;  %3494 = vmatmul.mubr.bf16.gmra.mrb[172].mxu1 %v2881_v12  ;;  %v2827_v25 = vmax.f32 %v2693_v17, 0.0 }
 0x549   : > { %v2699_v57 = vadd.f32 %v2698_v24, %v8934_v27  ;;  %4027 = vmatpush1.bf16.msra.mxu0 %v7407_v15  ;;  %v2828_v31 = vmax.f32 %v2695_v20, 0.0 }
 0x54a   : > { %v2829_v29 = vmax.f32 %v2697_v23, 0.0  ;;  %4028 = vmatprep.subr.bf16.mxu0 %v7412_v19 }
 0x54b   : > { %v2830_v32 = vmax.f32 %v2699_v57, 0.0 }
 0x54c   : > { %v2883_v33 = vpack.c.bf16 %v2829_v29, %v2827_v25 }
 0x54d   : > { %v2884_v34 = vpack.c.bf16 %v2830_v32, %v2828_v31  ;;  %v2702_v36 = vpop.f32.mrb[116].mxu1  ;;  %4029 = vmatpush1.bf16.msra.mxu0 %v7410_v62 }
 0x54e   : > { %v2703_v38 = vadd.f32 %v2702_v36, %v8931_v60  ;;  %v2704_v39 = vpop.f32.mrb[117].mxu1  ;;  %4367 = vmatprep.subr.bf16.mxu0 %v7415_v30 }
 0x54f   : > { %v2705_v40 = vadd.f32 %v2704_v39, %v8934_v27  ;;  %v2706_v43 = vpop.f32.mrb[118].mxu1  ;;  %3316 = vmatprep.mubr.bf16.mxu0 %v2884_v34  ;;  %3501 = vmatprep.mubr.bf16.mxu1 %v2884_v34 }
 0x550   : > { %v2707_v44 = vadd.f32 %v2706_v43, %v8931_v60  ;;  %v2708_v46 = vpop.f32.mrb[119].mxu1  ;;  %3317 = vmatmul.mubr.bf16.gmra.mrb[112].mxu0 %v2883_v33  ;;  %3502 = vmatmul.mubr.bf16.gmra.mrb[176].mxu1 %v2883_v33  ;;  %v2831_v48 = vmax.f32 %v2703_v38, 0.0 }
 0x551   : > { %v2709_v47 = vadd.f32 %v2708_v46, %v8934_v27  ;;  %v2832_v51 = vmax.f32 %v2705_v40, 0.0 }
 0x552   : > { %v2833_v49 = vmax.f32 %v2707_v44, 0.0 }
 0x553   : > { %v2834_v52 = vmax.f32 %v2709_v47, 0.0 }
 0x554   : > { %v2885_v53 = vpack.c.bf16 %v2833_v49, %v2831_v48 }
 0x555   : > { %v2886_v54 = vpack.c.bf16 %v2834_v52, %v2832_v51  ;;  %v2712_v55 = vpop.f32.mrb[120].mxu1 }
 0x556   : > { %v2713_v56 = vadd.f32 %v2712_v55, %v8931_v60  ;;  %v2714_v7 = vpop.f32.mrb[121].mxu1 }
 0x557   : > { %v2715_v8 = vadd.f32 %v2714_v7, %v8934_v27  ;;  %v2716_v58 = vpop.f32.mrb[122].mxu1  ;;  %3326 = vmatprep.mubr.bf16.mxu0 %v2886_v54  ;;  %3509 = vmatprep.mubr.bf16.mxu1 %v2886_v54 }
 0x558   : > { %v2717_v37 = vadd.f32 %v2716_v58, %v8931_v60  ;;  %v2718_v42 = vpop.f32.mrb[123].mxu1  ;;  %3327 = vmatmul.mubr.bf16.gmra.mrb[116].mxu0 %v2885_v53  ;;  %3510 = vmatmul.mubr.bf16.gmra.mrb[180].mxu1 %v2885_v53  ;;  %v2835_v16 = vmax.f32 %v2713_v56, 0.0 }
 0x559   : > { %v2719_v11 = vadd.f32 %v2718_v42, %v8934_v27  ;;  %v2836_v50 = vmax.f32 %v2715_v8, 0.0 }
 0x55a   : > { %v2837_v45 = vmax.f32 %v2717_v37, 0.0 }
 0x55b   : > { %v2838_v21 = vmax.f32 %v2719_v11, 0.0 }
 0x55c   : > { %v2887_v26 = vpack.c.bf16 %v2837_v45, %v2835_v16 }
 0x55d   : > { %v2888_v35 = vpack.c.bf16 %v2838_v21, %v2836_v50  ;;  %v2722_v41 = vpop.f32.mrb[124].mxu1 }
 0x55e   : > { %v2723_v59 = vadd.f32 %v2722_v41, %v8931_v60  ;;  %v2724_v61 = vpop.f32.mrb[125].mxu1 }
 0x55f   : > { %v2725_v28 = vadd.f32 %v2724_v61, %v8934_v27  ;;  %v2726_v63 = vpop.f32.mrb[126].mxu1  ;;  %3336 = vmatprep.mubr.bf16.mxu0 %v2888_v35  ;;  %3517 = vmatprep.mubr.bf16.mxu1 %v2888_v35 }
 0x560   : > { %v2727_v1 = vadd.f32 %v2726_v63, %v8931_v60  ;;  %v2728_v2 = vpop.f32.mrb[127].mxu1  ;;  %3337 = vmatmul.mubr.bf16.gmra.mrb[120].mxu0 %v2887_v26  ;;  %3518 = vmatmul.mubr.bf16.gmra.mrb[184].mxu1 %v2887_v26  ;;  %v2839_v9 = vmax.f32 %v2723_v59, 0.0 }
 0x561   : > { %v2729_v5 = vadd.f32 %v2728_v2, %v8934_v27  ;;  %v2840_v12 = vmax.f32 %v2725_v28, 0.0 }
 0x562   : > { %v2841_v10 = vmax.f32 %v2727_v1, 0.0 }
 0x563   : > { %v2842_v13 = vmax.f32 %v2729_v5, 0.0 }
 0x564   : > { %v2889_v14 = vpack.c.bf16 %v2841_v10, %v2839_v9 }
 0x565   : > { %v2890_v15 = vpack.c.bf16 %v2842_v13, %v2840_v12  ;;  %v2732_v17 = vpop.f32.mrb[128].mxu1 }
 0x566   : > { %v2733_v18 = vadd.f32 %v2732_v17, %v8931_v60  ;;  %v2734_v19 = vpop.f32.mrb[129].mxu1 }
 0x567   : > { %v2735_v20 = vadd.f32 %v2734_v19, %v8934_v27  ;;  %v2736_v22 = vpop.f32.mrb[130].mxu1  ;;  %3346 = vmatprep.mubr.bf16.mxu0 %v2890_v15  ;;  %3525 = vmatprep.mubr.bf16.mxu1 %v2890_v15 }
 0x568   : > { %v2737_v23 = vadd.f32 %v2736_v22, %v8931_v60  ;;  %v2738_v24 = vpop.f32.mrb[131].mxu1  ;;  %3347 = vmatmul.mubr.bf16.gmra.mrb[124].mxu0 %v2889_v14  ;;  %3526 = vmatmul.mubr.bf16.gmra.mrb[188].mxu1 %v2889_v14  ;;  %v2843_v62 = vmax.f32 %v2733_v18, 0.0 }
 0x569   : > { %v2739_v57 = vadd.f32 %v2738_v24, %v8934_v27  ;;  %v2844_v29 = vmax.f32 %v2735_v20, 0.0 }
 0x56a   : > { %v2845_v25 = vmax.f32 %v2737_v23, 0.0 }
 0x56b   : > { %v2846_v30 = vmax.f32 %v2739_v57, 0.0 }
 0x56c   : > { %v2891_v31 = vpack.c.bf16 %v2845_v25, %v2843_v62 }
 0x56d   : > { %v2892_v32 = vpack.c.bf16 %v2846_v30, %v2844_v29  ;;  %v2742_v33 = vpop.f32.mrb[132].mxu1 }
 0x56e   : > { %v2743_v34 = vadd.f32 %v2742_v33, %v8931_v60  ;;  %v2744_v36 = vpop.f32.mrb[133].mxu1 }
 0x56f   : > { %v2745_v38 = vadd.f32 %v2744_v36, %v8934_v27  ;;  %v2746_v39 = vpop.f32.mrb[134].mxu1  ;;  %3356 = vmatprep.mubr.bf16.mxu0 %v2892_v32  ;;  %3533 = vmatprep.mubr.bf16.mxu1 %v2892_v32 }
 0x570   : > { %v2747_v40 = vadd.f32 %v2746_v39, %v8931_v60  ;;  %v2748_v43 = vpop.f32.mrb[135].mxu1  ;;  %3357 = vmatmul.mubr.bf16.gmra.mrb[128].mxu0 %v2891_v31  ;;  %3534 = vmatmul.mubr.bf16.gmra.mrb[192].mxu1 %v2891_v31  ;;  %v2847_v46 = vmax.f32 %v2743_v34, 0.0 }
 0x571   : > { %v2749_v44 = vadd.f32 %v2748_v43, %v8934_v27  ;;  %v2848_v48 = vmax.f32 %v2745_v38, 0.0 }
 0x572   : > { %v2849_v47 = vmax.f32 %v2747_v40, 0.0 }
 0x573   : > { %v2850_v49 = vmax.f32 %v2749_v44, 0.0 }
 0x574   : > { %v2893_v51 = vpack.c.bf16 %v2849_v47, %v2847_v46 }
 0x575   : > { %v2894_v52 = vpack.c.bf16 %v2850_v49, %v2848_v48  ;;  %v2752_v53 = vpop.f32.mrb[136].mxu1 }
 0x576   : > { %v2753_v54 = vadd.f32 %v2752_v53, %v8931_v60  ;;  %v2754_v55 = vpop.f32.mrb[137].mxu1 }
 0x577   : > { %v2755_v56 = vadd.f32 %v2754_v55, %v8934_v27  ;;  %v2756_v7 = vpop.f32.mrb[138].mxu1  ;;  %3366 = vmatprep.mubr.bf16.mxu0 %v2894_v52  ;;  %3541 = vmatprep.mubr.bf16.mxu1 %v2894_v52 }
 0x578   : > { %v2757_v8 = vadd.f32 %v2756_v7, %v8931_v60  ;;  %v2758_v58 = vpop.f32.mrb[139].mxu1  ;;  %3367 = vmatmul.mubr.bf16.gmra.mrb[132].mxu0 %v2893_v51  ;;  %3542 = vmatmul.mubr.bf16.gmra.mrb[196].mxu1 %v2893_v51  ;;  %v2851_v42 = vmax.f32 %v2753_v54, 0.0 }
 0x579   : > { %v2759_v37 = vadd.f32 %v2758_v58, %v8934_v27  ;;  %v2852_v16 = vmax.f32 %v2755_v56, 0.0 }
 0x57a   : > { %v2853_v11 = vmax.f32 %v2757_v8, 0.0 }
 0x57b   : > { %v2854_v45 = vmax.f32 %v2759_v37, 0.0 }
 0x57c   : > { %v2895_v50 = vpack.c.bf16 %v2853_v11, %v2851_v42 }
 0x57d   : > { %v2896_v21 = vpack.c.bf16 %v2854_v45, %v2852_v16  ;;  %v2762_v26 = vpop.f32.mrb[140].mxu1 }
 0x57e   : > { %v2763_v35 = vadd.f32 %v2762_v26, %v8931_v60  ;;  %v2764_v41 = vpop.f32.mrb[141].mxu1 }
 0x57f   : > { %v2765_v59 = vadd.f32 %v2764_v41, %v8934_v27  ;;  %v2766_v61 = vpop.f32.mrb[142].mxu1  ;;  %3376 = vmatprep.mubr.bf16.mxu0 %v2896_v21  ;;  %3549 = vmatprep.mubr.bf16.mxu1 %v2896_v21 }
 0x580   : > { %v2767_v28 = vadd.f32 %v2766_v61, %v8931_v60  ;;  %v2768_v63 = vpop.f32.mrb[143].mxu1  ;;  %3377 = vmatmul.mubr.bf16.gmra.mrb[136].mxu0 %v2895_v50  ;;  %3550 = vmatmul.mubr.bf16.gmra.mrb[200].mxu1 %v2895_v50  ;;  %v2855_v2 = vmax.f32 %v2763_v35, 0.0 }
 0x581   : > { %v2769_v1 = vadd.f32 %v2768_v63, %v8934_v27  ;;  %v2856_v9 = vmax.f32 %v2765_v59, 0.0 }
 0x582   : > { %v2857_v5 = vmax.f32 %v2767_v28, 0.0 }
 0x583   : > { %v2858_v10 = vmax.f32 %v2769_v1, 0.0 }
 0x584   : > { %v2897_v12 = vpack.c.bf16 %v2857_v5, %v2855_v2 }
 0x585   : > { %v2898_v13 = vpack.c.bf16 %v2858_v10, %v2856_v9  ;;  %v2772_v14 = vpop.f32.mrb[144].mxu1 }
 0x586   : > { %v2773_v15 = vadd.f32 %v2772_v14, %v8931_v60  ;;  %v2774_v17 = vpop.f32.mrb[145].mxu1  ;;  %v7423_v14 = vld [vmem:[#allocation14 + $0x24] ss:$8 sps:$4 sm:$0xff]  }
 0x587   : > { %v2775_v18 = vadd.f32 %v2774_v17, %v8934_v27  ;;  %v2776_v19 = vpop.f32.mrb[146].mxu1  ;;  %3386 = vmatprep.mubr.bf16.mxu0 %v2898_v13  ;;  %3557 = vmatprep.mubr.bf16.mxu1 %v2898_v13  ;;  %v7419_v13 = vld [vmem:[#allocation14 + $0x14] ss:$8 sps:$4 sm:$0xff]   ;;  %v7421_v17 = vld [vmem:[#allocation14 + $0x20] ss:$8 sps:$4 sm:$0xff]  }
 0x588   : > { %v2777_v20 = vadd.f32 %v2776_v19, %v8931_v60  ;;  %v2778_v22 = vpop.f32.mrb[147].mxu1  ;;  %3387 = vmatmul.mubr.bf16.gmra.mrb[140].mxu0 %v2897_v12  ;;  %3558 = vmatmul.mubr.bf16.gmra.mrb[204].mxu1 %v2897_v12  ;;  %v2859_v24 = vmax.f32 %v2773_v15, 0.0  ;;  %v7413_v12 = vld [vmem:[#allocation14] ss:$8 sps:$4 sm:$0xff]   ;;  %v7425_v19 = vld [vmem:[#allocation14 + $0x30] ss:$8 sps:$4 sm:$0xff]  }
 0x589   : > { %v2779_v23 = vadd.f32 %v2778_v22, %v8934_v27  ;;  %v2860_v62 = vmax.f32 %v2775_v18, 0.0  ;;  %v7420_v15 = vld [vmem:[%s8602_s14 + $0x8] sm:$0xff]   ;;  %v7427_v18 = vld [vmem:[#allocation14 + $0x34] ss:$8 sps:$4 sm:$0xff]  }
 0x58a   : > { %v2861_v57 = vmax.f32 %v2777_v20, 0.0  ;;  %v7431_v20 = vld [vmem:[#allocation14 + $0x44] ss:$8 sps:$4 sm:$0xff]   ;;  %v7424_v22 = vld [vmem:[%s8602_s14 + $0x10] sm:$0xff]  }
 0x58b   : > { %v2862_v25 = vmax.f32 %v2779_v23, 0.0  ;;  %v7429_v23 = vld [vmem:[#allocation14 + $0x40] ss:$8 sps:$4 sm:$0xff]  }
 0x58c   : > { %v2899_v29 = vpack.c.bf16 %v2861_v57, %v2859_v24  ;;  %v7435_v24 = vld [vmem:[#allocation14 + $0x54] ss:$8 sps:$4 sm:$0xff]   ;;  %v7433_v57 = vld [vmem:[#allocation14 + $0x50] ss:$8 sps:$4 sm:$0xff]  }
 0x58d   : > { %v2900_v30 = vpack.c.bf16 %v2862_v25, %v2860_v62  ;;  %v2782_v31 = vpop.f32.mrb[148].mxu1  ;;  %v7439_v62 = vld [vmem:[#allocation14 + $0x64] ss:$8 sps:$4 sm:$0xff]   ;;  %v7428_v25 = vld [vmem:[%s8602_s14 + $0x18] sm:$0xff]  }
 0x58e   : > { %v2783_v32 = vadd.f32 %v2782_v31, %v8931_v60  ;;  %v2784_v33 = vpop.f32.mrb[149].mxu1  ;;  %v7441_v31 = vld [vmem:[#allocation14 + $0x70] ss:$8 sps:$4 sm:$0xff]  }
 0x58f   : > { %v2785_v34 = vadd.f32 %v2784_v33, %v8934_v27  ;;  %v2786_v36 = vpop.f32.mrb[150].mxu1  ;;  %3396 = vmatprep.mubr.bf16.mxu0 %v2900_v30  ;;  %3565 = vmatprep.mubr.bf16.mxu1 %v2900_v30  ;;  %v7443_v30 = vld [vmem:[#allocation14 + $0x74] ss:$8 sps:$4 sm:$0xff]   ;;  %v7432_v33 = vld [vmem:[%s8602_s14 + $0x20] sm:$0xff]  }
 0x590   : > { %v2787_v38 = vadd.f32 %v2786_v36, %v8931_v60  ;;  %v2788_v39 = vpop.f32.mrb[151].mxu1  ;;  %3397 = vmatmul.mubr.bf16.gmra.mrb[144].mxu0 %v2899_v29  ;;  %3566 = vmatmul.mubr.bf16.gmra.mrb[208].mxu1 %v2899_v29  ;;  %v2863_v43 = vmax.f32 %v2783_v32, 0.0  ;;  %v7437_v29 = vld [vmem:[#allocation14 + $0x60] ss:$8 sps:$4 sm:$0xff]   ;;  %v7447_v32 = vld [vmem:[#allocation14 + $0x84] ss:$8 sps:$4 sm:$0xff]  }
 0x591   : > { %v2789_v40 = vadd.f32 %v2788_v39, %v8934_v27  ;;  %v2864_v46 = vmax.f32 %v2785_v34, 0.0  ;;  %v7445_v34 = vld [vmem:[#allocation14 + $0x80] ss:$8 sps:$4 sm:$0xff]   ;;  %v7451_v36 = vld [vmem:[#allocation14 + $0x94] ss:$8 sps:$4 sm:$0xff]  }
 0x592   : > { %v2865_v44 = vmax.f32 %v2787_v38, 0.0  ;;  %v7449_v38 = vld [vmem:[#allocation14 + $0x90] ss:$8 sps:$4 sm:$0xff]   ;;  %v7455_v39 = vld [vmem:[#allocation14 + $0xa4] ss:$8 sps:$4 sm:$0xff]  }
 0x593   : > { %v2866_v47 = vmax.f32 %v2789_v40, 0.0  ;;  %v7436_v40 = vld [vmem:[%s8602_s14 + $0x28] sm:$0xff]  }
 0x594   : > { %v2901_v48 = vpack.c.bf16 %v2865_v44, %v2863_v43  ;;  %v7453_v43 = vld [vmem:[#allocation14 + $0xa0] ss:$8 sps:$4 sm:$0xff]   ;;  %v7459_v44 = vld [vmem:[#allocation14 + $0xb4] ss:$8 sps:$4 sm:$0xff]  }
 0x595   : > { %v2902_v49 = vpack.c.bf16 %v2866_v47, %v2864_v46  ;;  %v2792_v51 = vpop.f32.mrb[152].mxu1  ;;  %v7457_v46 = vld [vmem:[#allocation14 + $0xb0] ss:$8 sps:$4 sm:$0xff]   ;;  %v7463_v47 = vld [vmem:[#allocation14 + $0xc4] ss:$8 sps:$4 sm:$0xff]  }
 0x596   : > { %v2793_v52 = vadd.f32 %v2792_v51, %v8931_v60  ;;  %v2794_v53 = vpop.f32.mrb[153].mxu1  ;;  %v7467_v51 = vld [vmem:[#allocation14 + $0xd4] ss:$8 sps:$4 sm:$0xff]  }
 0x597   : > { %v2795_v54 = vadd.f32 %v2794_v53, %v8934_v27  ;;  %v2796_v55 = vpop.f32.mrb[154].mxu1  ;;  %3406 = vmatprep.mubr.bf16.mxu0 %v2902_v49  ;;  %3573 = vmatprep.mubr.bf16.mxu1 %v2902_v49  ;;  %v7461_v49 = vld [vmem:[#allocation14 + $0xc0] ss:$8 sps:$4 sm:$0xff]   ;;  %v7471_v53 = vld [vmem:[#allocation14 + $0xe4] ss:$8 sps:$4 sm:$0xff]  }
 0x598   : > { %v2797_v56 = vadd.f32 %v2796_v55, %v8931_v60  ;;  %v2798_v7 = vpop.f32.mrb[155].mxu1  ;;  %3407 = vmatmul.mubr.bf16.gmra.mrb[148].mxu0 %v2901_v48  ;;  %3574 = vmatmul.mubr.bf16.gmra.mrb[212].mxu1 %v2901_v48  ;;  %v2867_v58 = vmax.f32 %v2793_v52, 0.0  ;;  %v7440_v48 = vld [vmem:[%s8602_s14 + $0x30] sm:$0xff]   ;;  %v7469_v55 = vld [vmem:[#allocation14 + $0xe0] ss:$8 sps:$4 sm:$0xff]  }
 0x599   : > { %v2799_v8 = vadd.f32 %v2798_v7, %v8934_v27  ;;  %v2868_v42 = vmax.f32 %v2795_v54, 0.0  ;;  %v7465_v52 = vld [vmem:[#allocation14 + $0xd0] ss:$8 sps:$4 sm:$0xff]  }
 0x59a   : > { %v2869_v37 = vmax.f32 %v2797_v56, 0.0  ;;  %v7444_v54 = vld [vmem:[%s8602_s14 + $0x38] sm:$0xff]  }
 0x59b   : > { %v2870_v11 = vmax.f32 %v2799_v8, 0.0  ;;  %v7475_v56 = vld [vmem:[#allocation14 + $0xf4] ss:$8 sps:$4 sm:$0xff]   ;;  %v7473_v7 = vld [vmem:[#allocation14 + $0xf0] ss:$8 sps:$4 sm:$0xff]   ;;  %v7448_v8 = vld [vmem:[%s8602_s14 + $0x40] sm:$0xff]  }
 0x59c   : > { %v2903_v16 = vpack.c.bf16 %v2869_v37, %v2867_v58  ;;  %v7452_v58 = vld [vmem:[%s8602_s14 + $0x48] sm:$0xff]   ;;  %v7456_v37 = vld [vmem:[%s8602_s14 + $0x50] sm:$0xff]  }
 0x59d   : > { %v2904_v45 = vpack.c.bf16 %v2870_v11, %v2868_v42  ;;  %v2802_v50 = vpop.f32.mrb[156].mxu1  ;;  %v2971_v42 = vld [vmem:[%s9750_s13] sm:$0x7]  ;;  %v2983_v11 = vsub.s32 2, %v8664_v3  ;;  %s9487_s13 = scalar_lea.hbm %s9754_s16, %s6669_s11 }
 0x59e   : > { %v2803_v21 = vadd.f32 %v2802_v50, %v8931_v60  ;;  %v2804_v26 = vpop.f32.mrb[157].mxu1 }
 0x59f   : > { %v2805_v35 = vadd.f32 %v2804_v26, %v8934_v27  ;;  %v2806_v41 = vpop.f32.mrb[158].mxu1  ;;  %3416 = vmatprep.mubr.bf16.mxu0 %v2904_v45  ;;  %3581 = vmatprep.mubr.bf16.mxu1 %v2904_v45  ;;  %v9030_v45 = vrot.slane %v2971_v42, %v8673_v6  ;;  %v9033_v26 = vrot.slane %v2971_v42, %v2983_v11 }
 0x5a0   : > { %v2807_v59 = vadd.f32 %v2806_v41, %v8931_v60  ;;  %v2808_v61 = vpop.f32.mrb[159].mxu1  ;;  %3417 = vmatmul.mubr.bf16.gmra.mrb[152].mxu0 %v2903_v16  ;;  %3582 = vmatmul.mubr.bf16.gmra.mrb[216].mxu1 %v2903_v16  ;;  %v2871_v63 = vmax.f32 %v2803_v21, 0.0  ;;  %v7416_v60 = vld [vmem:[%s8602_s14] sm:$0xff]   ;;  %v9027_v16 = vrot.slane %v2971_v42, %v8667_v4 }
 0x5a1   : > { %v2809_v28 = vadd.f32 %v2808_v61, %v8934_v27  ;;  %v2872_v2 = vmax.f32 %v2805_v35, 0.0  ;;  %v7417_v27 = vld [vmem:[#allocation14 + $0x10] ss:$8 sps:$4 sm:$0xff]  }
 0x5a2   : > { %v2873_v1 = vmax.f32 %v2807_v59, 0.0  ;;  %v7460_v61 = vld [vmem:[%s8602_s14 + $0x58] sm:$0xff]  }
 0x5a3   : > { %v2874_v5 = vmax.f32 %v2809_v28, 0.0 }
 0x5a4   : > { %v2905_v9 = vpack.c.bf16 %v2873_v1, %v2871_v63 }
 0x5a5   : > { %v2906_v10 = vpack.c.bf16 %v2874_v5, %v2872_v2 }
 0x5a7   : > { %3426 = vmatprep.mubr.bf16.mxu0 %v2906_v10  ;;  %3589 = vmatprep.mubr.bf16.mxu1 %v2906_v10 }
 0x5a8   : > { %3427 = vmatmul.mubr.bf16.gmra.mrb[156].mxu0 %v2905_v9  ;;  %3590 = vmatmul.mubr.bf16.gmra.mrb[220].mxu1 %v2905_v9 }
 0x5a9   : > { %4046 = vmatprep.mubr.bf16.mxu0 %v8075_v0 }
 0x5b0   : > { %4047 = vmatmul.mubr.bf16.vlgmr.msra.gmra.mrb[160].mxu0 %v7416_v60 }
 0x5b1   : > { %4368 = vmatpush1.bf16.msra.mxu0 %v7413_v12  ;;  %4056 = vmatprep.mubr.bf16.mxu0 %v8075_v0 }
 0x5b2   : > { %4369 = vmatprep.subr.bf16.mxu0 %v7419_v13 }
 0x5b5   : > { %4370 = vmatpush1.bf16.msra.mxu0 %v7417_v27 }
 0x5b6   : > { %4371 = vmatprep.subr.bf16.mxu0 %v7423_v14 }
 0x5b8   : > { %4057 = vmatmul.mubr.bf16.gmra.mrb[164].mxu0 %v7420_v15 }
 0x5b9   : > { %4066 = vmatprep.mubr.bf16.mxu0 %v8075_v0  ;;  %4372 = vmatpush1.bf16.msra.mxu0 %v7421_v17 }
 0x5ba   : > { %4373 = vmatprep.subr.bf16.mxu0 %v7427_v18 }
 0x5bd   : > { %4374 = vmatpush1.bf16.msra.mxu0 %v7425_v19  ;;  %v7477_v19 = vld [vmem:[#allocation17] ss:$8 sps:$4 sm:$0xff]  }
 0x5be   : > { %4375 = vmatprep.subr.bf16.mxu0 %v7431_v20  ;;  %v7479_v20 = vld [vmem:[#allocation17 + $0x4] ss:$8 sps:$4 sm:$0xff]  }
 0x5bf   : > { %4936 = vmatprep.subr.bf16.mxu1 %v7479_v20 }
 0x5c0   : > { %4067 = vmatmul.mubr.bf16.gmra.mrb[168].mxu0 %v7424_v22  ;;  %4937 = vmatpush1.bf16.msra.mxu1 %v7477_v19 }
 0x5c1   : > { %4076 = vmatprep.mubr.bf16.mxu0 %v8075_v0  ;;  %4376 = vmatpush1.bf16.msra.mxu0 %v7429_v23 }
 0x5c2   : > { %4377 = vmatprep.subr.bf16.mxu0 %v7435_v24 }
 0x5c5   : > { %4378 = vmatpush1.bf16.msra.mxu0 %v7433_v57 }
 0x5c6   : > { %4379 = vmatprep.subr.bf16.mxu0 %v7439_v62 }
 0x5c8   : > { %4077 = vmatmul.mubr.bf16.gmra.mrb[172].mxu0 %v7428_v25 }
 0x5c9   : > { %4086 = vmatprep.mubr.bf16.mxu0 %v8075_v0  ;;  %4380 = vmatpush1.bf16.msra.mxu0 %v7437_v29 }
 0x5ca   : > { %4381 = vmatprep.subr.bf16.mxu0 %v7443_v30 }
 0x5cd   : > { %4382 = vmatpush1.bf16.msra.mxu0 %v7441_v31  ;;  %v7464_v31 = vld [vmem:[%s8602_s14 + $0x60] sm:$0xff]  }
 0x5ce   : > { %4383 = vmatprep.subr.bf16.mxu0 %v7447_v32 }
 0x5d0   : > { %4087 = vmatmul.mubr.bf16.gmra.mrb[176].mxu0 %v7432_v33 }
 0x5d1   : > { %4096 = vmatprep.mubr.bf16.mxu0 %v8075_v0  ;;  %4384 = vmatpush1.bf16.msra.mxu0 %v7445_v34 }
 0x5d2   : > { %4385 = vmatprep.subr.bf16.mxu0 %v7451_v36 }
 0x5d5   : > { %4386 = vmatpush1.bf16.msra.mxu0 %v7449_v38 }
 0x5d6   : > { %4387 = vmatprep.subr.bf16.mxu0 %v7455_v39 }
 0x5d8   : > { %4097 = vmatmul.mubr.bf16.gmra.mrb[180].mxu0 %v7436_v40 }
 0x5d9   : > { %4106 = vmatprep.mubr.bf16.mxu0 %v8075_v0  ;;  %4388 = vmatpush1.bf16.msra.mxu0 %v7453_v43 }
 0x5da   : > { %4389 = vmatprep.subr.bf16.mxu0 %v7459_v44 }
 0x5dd   : > { %4390 = vmatpush1.bf16.msra.mxu0 %v7457_v46 }
 0x5de   : > { %4391 = vmatprep.subr.bf16.mxu0 %v7463_v47 }
 0x5e0   : > { %4107 = vmatmul.mubr.bf16.gmra.mrb[184].mxu0 %v7440_v48 }
 0x5e1   : > { %4116 = vmatprep.mubr.bf16.mxu0 %v8075_v0  ;;  %4392 = vmatpush1.bf16.msra.mxu0 %v7461_v49 }
 0x5e2   : > { %4393 = vmatprep.subr.bf16.mxu0 %v7467_v51 }
 0x5e5   : > { %4394 = vmatpush1.bf16.msra.mxu0 %v7465_v52 }
 0x5e6   : > { %4395 = vmatprep.subr.bf16.mxu0 %v7471_v53 }
 0x5e8   : > { %4117 = vmatmul.mubr.bf16.gmra.mrb[188].mxu0 %v7444_v54  ;;  %v7480_v54 = vld [vmem:[#allocation17 + $0x10] ss:$8 sps:$4 sm:$0xff]  }
 0x5e9   : > { %4126 = vmatprep.mubr.bf16.mxu0 %v8075_v0  ;;  %4396 = vmatpush1.bf16.msra.mxu0 %v7469_v55  ;;  %v7482_v55 = vld [vmem:[#allocation17 + $0x14] ss:$8 sps:$4 sm:$0xff]  }
 0x5ea   : > { %4397 = vmatprep.subr.bf16.mxu0 %v7475_v56  ;;  %4938 = vmatprep.subr.bf16.mxu1 %v7482_v55 }
 0x5eb   : > { %4939 = vmatpush1.bf16.msra.mxu1 %v7480_v54 }
 0x5ed   : > { %4398 = vmatpush1.bf16.msra.mxu0 %v7473_v7 }
 0x5f0   : > { %4127 = vmatmul.mubr.bf16.gmra.mrb[192].mxu0 %v7448_v8 }
 0x5f1   : > { %4136 = vmatprep.mubr.bf16.mxu0 %v8075_v0 }
 0x5f8   : > { %4137 = vmatmul.mubr.bf16.gmra.mrb[196].mxu0 %v7452_v58 }
 0x5f9   : > { %4146 = vmatprep.mubr.bf16.mxu0 %v8075_v0 }
 0x600   : > { %4147 = vmatmul.mubr.bf16.gmra.mrb[200].mxu0 %v7456_v37 }
 0x601   : > { %4156 = vmatprep.mubr.bf16.mxu0 %v8075_v0 }
 0x603   : > { %v3278_v50 = vpop.f32.mrb[96].mxu0  ;;  %v6687_v21 = vpop.f32.mrb[160].mxu1 }
 0x604   : > { %v3279_v35 = vadd.f32 %v3278_v50, %v9027_v16  ;;  %v3280_v41 = vpop.f32.mrb[97].mxu0  ;;  %v6688_v59 = vpop.f32.mrb[161].mxu1 }
 0x605   : > { %v3281_v3 = vadd.f32 %v3280_v41, %v9030_v45  ;;  %v6689_v28 = vadd.f32 %v6688_v59, %v6687_v21  ;;  %v3282_v63 = vpop.f32.mrb[98].mxu0  ;;  %v6690_v1 = vpop.f32.mrb[162].mxu1  ;;  %v7468_v21 = vld [vmem:[%s8602_s14 + $0x68] sm:$0xff]  }
 0x606   : > { %v3283_v2 = vadd.f32 %v3282_v63, %v9027_v16  ;;  %v3284_v5 = vpop.f32.mrb[99].mxu0  ;;  %v6691_v9 = vpop.f32.mrb[163].mxu1  ;;  %v3598_v13 = vmax.f32 %v3279_v35, 0.0 }
 0x607   : > { %v3472_v10 = vadd.f32 %v6689_v28, %v9033_v26  ;;  %v3285_v60 = vadd.f32 %v3284_v5, %v9030_v45  ;;  %v6692_v12 = vadd.f32 %v6691_v9, %v6690_v1  ;;  %v3599_v27 = vmax.f32 %v3281_v3, 0.0 }
 0x608   : > { %v3601_v14 = vmax.f32 %v3283_v2, 0.0  ;;  %4157 = vmatmul.mubr.bf16.gmra.mrb[204].mxu0 %v7460_v61 }
 0x609   : > { %v3600_v15 = vmax.f32 %v3472_v10, 0.0  ;;  %v3602_v17 = vmax.f32 %v3285_v60, 0.0  ;;  %v3475_v18 = vadd.f32 %v6692_v12, %v9033_v26  ;;  %4166 = vmatprep.mubr.bf16.mxu0 %v8075_v0 }
 0x60a   : > { %v9044_v22 = vpack.c.bf16 %v3601_v14, %v3598_v13  ;;  %v7483_v14 = vld [vmem:[#allocation17 + $0x20] ss:$8 sps:$4 sm:$0xff]  }
 0x60b   : > { %3726 = vst [vmem:[%s9048_s12] sm:$0xff] %v3600_v15  ;;  %v9051_v23 = vpack.c.bf16 %v3602_v17, %v3599_v27  ;;  %v3603_v24 = vmax.f32 %v3475_v18, 0.0  ;;  %v3288_v57 = vpop.f32.mrb[100].mxu0  ;;  %v6693_v62 = vpop.f32.mrb[164].mxu1  ;;  %v7485_v15 = vld [vmem:[#allocation17 + $0x24] ss:$8 sps:$4 sm:$0xff]  }
 0x60c   : > { %v3289_v25 = vadd.f32 %v3288_v57, %v9027_v16  ;;  %v3290_v29 = vpop.f32.mrb[101].mxu0  ;;  %v6694_v30 = vpop.f32.mrb[165].mxu1  ;;  %4940 = vmatprep.subr.bf16.mxu1 %v7485_v15  ;;  %v7494_v15 = vld [vmem:[#allocation17 + $0x54] ss:$8 sps:$4 sm:$0xff]  }
 0x60d   : > { %3727 = vst [vmem:[%s9048_s12 + $0x8] sm:$0xff] %v3603_v24  ;;  %v3291_v32 = vadd.f32 %v3290_v29, %v9030_v45  ;;  %v6695_v33 = vadd.f32 %v6694_v30, %v6693_v62  ;;  %v3292_v34 = vpop.f32.mrb[102].mxu0  ;;  %v6696_v36 = vpop.f32.mrb[166].mxu1  ;;  %v7472_v29 = vld [vmem:[%s8602_s14 + $0x70] sm:$0xff]   ;;  %4941 = vmatpush1.bf16.msra.mxu1 %v7483_v14 }
 0x60e   : > { %v3293_v38 = vadd.f32 %v3292_v34, %v9027_v16  ;;  %v3294_v39 = vpop.f32.mrb[103].mxu0  ;;  %v6697_v40 = vpop.f32.mrb[167].mxu1  ;;  %v3604_v47 = vmax.f32 %v3289_v25, 0.0 }
 0x60f   : > { %v3480_v43 = vadd.f32 %v6695_v33, %v9033_v26  ;;  %v3295_v44 = vadd.f32 %v3294_v39, %v9030_v45  ;;  %v6698_v46 = vadd.f32 %v6697_v40, %v6696_v36  ;;  %v3605_v48 = vmax.f32 %v3291_v32, 0.0 }
 0x610   : > { %v3607_v49 = vmax.f32 %v3293_v38, 0.0  ;;  %4167 = vmatmul.mubr.bf16.gmra.mrb[208].mxu0 %v7464_v31 }
 0x611   : > { %v3606_v51 = vmax.f32 %v3480_v43, 0.0  ;;  %v3608_v52 = vmax.f32 %v3295_v44, 0.0  ;;  %v3483_v53 = vadd.f32 %v6698_v46, %v9033_v26  ;;  %4176 = vmatprep.mubr.bf16.mxu0 %v8075_v0 }
 0x612   : > { %v9062_v56 = vpack.c.bf16 %v3607_v49, %v3604_v47 }
 0x613   : > { %3728 = vst [vmem:[%s9048_s12 + $0x10] sm:$0xff] %v3606_v51  ;;  %v9065_v7 = vpack.c.bf16 %v3608_v52, %v3605_v48  ;;  %v3609_v8 = vmax.f32 %v3483_v53, 0.0  ;;  %v3298_v58 = vpop.f32.mrb[104].mxu0  ;;  %v6699_v37 = vpop.f32.mrb[168].mxu1  ;;  %v7486_v52 = vld [vmem:[#allocation17 + $0x30] ss:$8 sps:$4 sm:$0xff]  }
 0x614   : > { %v3299_v42 = vadd.f32 %v3298_v58, %v9027_v16  ;;  %v3300_v11 = vpop.f32.mrb[105].mxu0  ;;  %v6700_v50 = vpop.f32.mrb[169].mxu1  ;;  %v7488_v53 = vld [vmem:[#allocation17 + $0x34] ss:$8 sps:$4 sm:$0xff]  }
 0x615   : > { %3729 = vst [vmem:[%s9048_s12 + $0x18] sm:$0xff] %v3609_v8  ;;  %v3301_v35 = vadd.f32 %v3300_v11, %v9030_v45  ;;  %v6701_v41 = vadd.f32 %v6700_v50, %v6699_v37  ;;  %v3302_v59 = vpop.f32.mrb[106].mxu0  ;;  %v6702_v61 = vpop.f32.mrb[170].mxu1  ;;  %4942 = vmatprep.subr.bf16.mxu1 %v7488_v53 }
 0x616   : > { %v3303_v3 = vadd.f32 %v3302_v59, %v9027_v16  ;;  %v3304_v28 = vpop.f32.mrb[107].mxu0  ;;  %v6703_v63 = vpop.f32.mrb[171].mxu1  ;;  %v3610_v9 = vmax.f32 %v3299_v42, 0.0  ;;  %4943 = vmatpush1.bf16.msra.mxu1 %v7486_v52 }
 0x617   : > { %v3488_v1 = vadd.f32 %v6701_v41, %v9033_v26  ;;  %v3305_v2 = vadd.f32 %v3304_v28, %v9030_v45  ;;  %v6704_v5 = vadd.f32 %v6703_v63, %v6702_v61  ;;  %v3611_v10 = vmax.f32 %v3301_v35, 0.0 }
 0x618   : > { %v3613_v60 = vmax.f32 %v3303_v3, 0.0  ;;  %4177 = vmatmul.mubr.bf16.gmra.mrb[212].mxu0 %v7468_v21  ;;  %v7476_v21 = vld [vmem:[%s8602_s14 + $0x78] sm:$0xff]  }
 0x619   : > { %v3612_v12 = vmax.f32 %v3488_v1, 0.0  ;;  %v3614_v13 = vmax.f32 %v3305_v2, 0.0  ;;  %v3491_v27 = vadd.f32 %v6704_v5, %v9033_v26  ;;  %4186 = vmatprep.mubr.bf16.mxu0 %v8075_v0 }
 0x61a   : > { %v9076_v17 = vpack.c.bf16 %v3613_v60, %v3610_v9  ;;  %v7491_v60 = vld [vmem:[#allocation17 + $0x44] ss:$8 sps:$4 sm:$0xff]  }
 0x61b   : > { %3730 = vst [vmem:[%s9048_s12 + $0x20] sm:$0xff] %v3612_v12  ;;  %v9079_v18 = vpack.c.bf16 %v3614_v13, %v3611_v10  ;;  %v3615_v19 = vmax.f32 %v3491_v27, 0.0  ;;  %v3308_v20 = vpop.f32.mrb[108].mxu0  ;;  %v6705_v24 = vpop.f32.mrb[172].mxu1  ;;  %v7489_v10 = vld [vmem:[#allocation17 + $0x40] ss:$8 sps:$4 sm:$0xff]   ;;  %4944 = vmatprep.subr.bf16.mxu1 %v7491_v60 }
 0x61c   : > { %v3309_v57 = vadd.f32 %v3308_v20, %v9027_v16  ;;  %v3310_v62 = vpop.f32.mrb[109].mxu0  ;;  %v6706_v25 = vpop.f32.mrb[173].mxu1  ;;  %4945 = vmatpush1.bf16.msra.mxu1 %v7489_v10  ;;  %v7501_v60 = vld [vmem:[#allocation17 + $0x80] ss:$8 sps:$4 sm:$0xff]  }
 0x61d   : > { %3731 = vst [vmem:[%s9048_s12 + $0x28] sm:$0xff] %v3615_v19  ;;  %v3311_v30 = vadd.f32 %v3310_v62, %v9030_v45  ;;  %v6707_v31 = vadd.f32 %v6706_v25, %v6705_v24  ;;  %v3312_v32 = vpop.f32.mrb[110].mxu0  ;;  %v6708_v33 = vpop.f32.mrb[174].mxu1  ;;  %v7492_v25 = vld [vmem:[#allocation17 + $0x50] ss:$8 sps:$4 sm:$0xff]   ;;  %4946 = vmatprep.subr.bf16.mxu1 %v7494_v15 }
 0x61e   : > { %v3313_v34 = vadd.f32 %v3312_v32, %v9027_v16  ;;  %v3314_v36 = vpop.f32.mrb[111].mxu0  ;;  %v6709_v38 = vpop.f32.mrb[175].mxu1  ;;  %v3616_v44 = vmax.f32 %v3309_v57, 0.0  ;;  %v7497_v32 = vld [vmem:[#allocation17 + $0x64] ss:$8 sps:$4 sm:$0xff]  }
 0x61f   : > { %v3496_v39 = vadd.f32 %v6707_v31, %v9033_v26  ;;  %v3315_v40 = vadd.f32 %v3314_v36, %v9030_v45  ;;  %v6710_v43 = vadd.f32 %v6709_v38, %v6708_v33  ;;  %v3617_v46 = vmax.f32 %v3311_v30, 0.0 }
 0x620   : > { %v3619_v47 = vmax.f32 %v3313_v34, 0.0  ;;  %4187 = vmatmul.mubr.bf16.gmra.mrb[216].mxu0 %v7472_v29  ;;  %4947 = vmatpush1.bf16.msra.mxu1 %v7492_v25 }
 0x621   : > { %v3618_v48 = vmax.f32 %v3496_v39, 0.0  ;;  %v3620_v49 = vmax.f32 %v3315_v40, 0.0  ;;  %v3499_v51 = vadd.f32 %v6710_v43, %v9033_v26  ;;  %4196 = vmatprep.mubr.bf16.mxu0 %v8075_v0  ;;  %4948 = vmatprep.subr.bf16.mxu1 %v7497_v32 }
 0x622   : > { %v9090_v54 = vpack.c.bf16 %v3619_v47, %v3616_v44  ;;  %v7495_v47 = vld [vmem:[#allocation17 + $0x60] ss:$8 sps:$4 sm:$0xff]  }
 0x623   : > { %3732 = vst [vmem:[%s9048_s12 + $0x30] sm:$0xff] %v3618_v48  ;;  %v9093_v55 = vpack.c.bf16 %v3620_v49, %v3617_v46  ;;  %v3621_v8 = vmax.f32 %v3499_v51, 0.0  ;;  %v3318_v58 = vpop.f32.mrb[112].mxu0  ;;  %v6711_v37 = vpop.f32.mrb[176].mxu1  ;;  %v7500_v51 = vld [vmem:[#allocation17 + $0x74] ss:$8 sps:$4 sm:$0xff]  }
 0x624   : > { %v3319_v42 = vadd.f32 %v3318_v58, %v9027_v16  ;;  %v3320_v11 = vpop.f32.mrb[113].mxu0  ;;  %v6712_v50 = vpop.f32.mrb[177].mxu1  ;;  %4949 = vmatpush1.bf16.msra.mxu1 %v7495_v47 }
 0x625   : > { %3733 = vst [vmem:[%s9048_s12 + $0x38] sm:$0xff] %v3621_v8  ;;  %v3321_v0 = vadd.f32 %v3320_v11, %v9030_v45  ;;  %v6713_v35 = vadd.f32 %v6712_v50, %v6711_v37  ;;  %v3322_v41 = vpop.f32.mrb[114].mxu0  ;;  %v6714_v59 = vpop.f32.mrb[178].mxu1  ;;  %4950 = vmatprep.subr.bf16.mxu1 %v7500_v51 }
 0x626   : > { %v3323_v61 = vadd.f32 %v3322_v41, %v9027_v16  ;;  %v3324_v3 = vpop.f32.mrb[115].mxu0  ;;  %v6715_v28 = vpop.f32.mrb[179].mxu1  ;;  %v3622_v5 = vmax.f32 %v3319_v42, 0.0 }
 0x627   : > { %v3504_v63 = vadd.f32 %v6713_v35, %v9033_v26  ;;  %v3325_v1 = vadd.f32 %v3324_v3, %v9030_v45  ;;  %v6716_v2 = vadd.f32 %v6715_v28, %v6714_v59  ;;  %v3623_v12 = vmax.f32 %v3321_v0, 0.0  ;;  %v7503_v59 = vld [vmem:[#allocation17 + $0x84] ss:$8 sps:$4 sm:$0xff]  }
 0x628   : > { %v3625_v9 = vmax.f32 %v3323_v61, 0.0  ;;  %4197 = vmatmul.mubr.bf16.gmra.mrb[220].mxu0 %v7476_v21 }
 0x629   : > { %v3624_v13 = vmax.f32 %v3504_v63, 0.0  ;;  %v3626_v27 = vmax.f32 %v3325_v1, 0.0  ;;  %v3507_v14 = vadd.f32 %v6716_v2, %v9033_v26  ;;  %4399 = vmatprep.mubr.bf16.mxu0 %v9051_v23 }
 0x62a   : > { %v9104_v19 = vpack.c.bf16 %v3625_v9, %v3622_v5 }
 0x62b   : > { %3734 = vst [vmem:[%s9048_s12 + $0x40] sm:$0xff] %v3624_v13  ;;  %v9107_v20 = vpack.c.bf16 %v3626_v27, %v3623_v12  ;;  %v3627_v24 = vmax.f32 %v3507_v14, 0.0  ;;  %v3328_v57 = vpop.f32.mrb[116].mxu0  ;;  %v6717_v62 = vpop.f32.mrb[180].mxu1  ;;  %v7506_v27 = vld [vmem:[#allocation17 + $0x94] ss:$8 sps:$4 sm:$0xff]  }
 0x62c   : > { %v3329_v29 = vadd.f32 %v3328_v57, %v9027_v16  ;;  %v3330_v30 = vpop.f32.mrb[117].mxu0  ;;  %v6718_v31 = vpop.f32.mrb[181].mxu1 }
 0x62d   : > { %3735 = vst [vmem:[%s9048_s12 + $0x48] sm:$0xff] %v3627_v24  ;;  %v3331_v23 = vadd.f32 %v3330_v30, %v9030_v45  ;;  %v6719_v33 = vadd.f32 %v6718_v31, %v6717_v62  ;;  %v3332_v34 = vpop.f32.mrb[118].mxu0  ;;  %v6720_v36 = vpop.f32.mrb[182].mxu1 }
 0x62e   : > { %v3333_v38 = vadd.f32 %v3332_v34, %v9027_v16  ;;  %v3334_v39 = vpop.f32.mrb[119].mxu0  ;;  %v6721_v40 = vpop.f32.mrb[183].mxu1  ;;  %v3628_v48 = vmax.f32 %v3329_v29, 0.0  ;;  %v7509_v34 = vld [vmem:[#allocation17 + $0xa4] ss:$8 sps:$4 sm:$0xff]  }
 0x62f   : > { %v3512_v43 = vadd.f32 %v6719_v33, %v9033_v26  ;;  %v3335_v44 = vadd.f32 %v3334_v39, %v9030_v45  ;;  %v6722_v46 = vadd.f32 %v6721_v40, %v6720_v36  ;;  %v3629_v52 = vmax.f32 %v3331_v23, 0.0 }
 0x630   : > { %v3631_v49 = vmax.f32 %v3333_v38, 0.0  ;;  %4400 = vmatmul.mubr.bf16.vlgmr.msra.gmra.mrb[160].mxu0 %v9044_v22  ;;  %v7498_v22 = vld [vmem:[#allocation17 + $0x70] ss:$8 sps:$4 sm:$0xff]  }
 0x631   : > { %v3630_v53 = vmax.f32 %v3512_v43, 0.0  ;;  %v3632_v8 = vmax.f32 %v3335_v44, 0.0  ;;  %v3515_v58 = vadd.f32 %v6722_v46, %v9033_v26  ;;  %4409 = vmatprep.mubr.bf16.mxu0 %v9065_v7  ;;  %4951 = vmatpush1.bf16.msra.mxu1 %v7498_v22 }
 0x632   : > { %v9118_v37 = vpack.c.bf16 %v3631_v49, %v3628_v48  ;;  %4952 = vmatprep.subr.bf16.mxu1 %v7503_v59  ;;  %v7507_v49 = vld [vmem:[#allocation17 + $0xa0] ss:$8 sps:$4 sm:$0xff]  }
 0x633   : > { %3736 = vst [vmem:[%s9048_s12 + $0x50] sm:$0xff] %v3630_v53  ;;  %v9121_v42 = vpack.c.bf16 %v3632_v8, %v3629_v52  ;;  %v3633_v11 = vmax.f32 %v3515_v58, 0.0  ;;  %v3338_v50 = vpop.f32.mrb[120].mxu0  ;;  %v6723_v21 = vpop.f32.mrb[184].mxu1  ;;  %v7512_v53 = vld [vmem:[#allocation17 + $0xb4] ss:$8 sps:$4 sm:$0xff]  }
 0x634   : > { %v3339_v0 = vadd.f32 %v3338_v50, %v9027_v16  ;;  %v3340_v35 = vpop.f32.mrb[121].mxu0  ;;  %v6724_v41 = vpop.f32.mrb[185].mxu1 }
 0x635   : > { %3737 = vst [vmem:[%s9048_s12 + $0x58] sm:$0xff] %v3633_v11  ;;  %v3341_v61 = vadd.f32 %v3340_v35, %v9030_v45  ;;  %v6725_v7 = vadd.f32 %v6724_v41, %v6723_v21  ;;  %v3342_v3 = vpop.f32.mrb[122].mxu0  ;;  %v6726_v28 = vpop.f32.mrb[186].mxu1  ;;  %4953 = vmatpush1.bf16.msra.mxu1 %v7501_v60 }
 0x636   : > { %v3343_v63 = vadd.f32 %v3342_v3, %v9027_v16  ;;  %v3344_v1 = vpop.f32.mrb[123].mxu0  ;;  %v6727_v2 = vpop.f32.mrb[187].mxu1  ;;  %v3634_v12 = vmax.f32 %v3339_v0, 0.0  ;;  %4954 = vmatprep.subr.bf16.mxu1 %v7506_v27  ;;  %v7515_v3 = vld [vmem:[#allocation17 + $0xc4] ss:$8 sps:$4 sm:$0xff]  }
 0x637   : > { %v3520_v5 = vadd.f32 %v6725_v7, %v9033_v26  ;;  %v3345_v9 = vadd.f32 %v3344_v1, %v9030_v45  ;;  %v6728_v10 = vadd.f32 %v6727_v2, %v6726_v28  ;;  %v3635_v14 = vmax.f32 %v3341_v61, 0.0 }
 0x638   : > { %v3637_v13 = vmax.f32 %v3343_v63, 0.0  ;;  %4410 = vmatmul.mubr.bf16.gmra.mrb[164].mxu0 %v9062_v56  ;;  %v7504_v56 = vld [vmem:[#allocation17 + $0x90] ss:$8 sps:$4 sm:$0xff]  }
 0x639   : > { %v3636_v15 = vmax.f32 %v3520_v5, 0.0  ;;  %v3638_v24 = vmax.f32 %v3345_v9, 0.0  ;;  %v3523_v57 = vadd.f32 %v6728_v10, %v9033_v26  ;;  %4419 = vmatprep.mubr.bf16.mxu0 %v9079_v18  ;;  %4955 = vmatpush1.bf16.msra.mxu1 %v7504_v56 }
 0x63a   : > { %v9132_v62 = vpack.c.bf16 %v3637_v13, %v3634_v12  ;;  %4956 = vmatprep.subr.bf16.mxu1 %v7509_v34  ;;  %v7513_v13 = vld [vmem:[#allocation17 + $0xc0] ss:$8 sps:$4 sm:$0xff]  }
 0x63b   : > { %3738 = vst [vmem:[%s9048_s12 + $0x60] sm:$0xff] %v3636_v15  ;;  %v9135_v25 = vpack.c.bf16 %v3638_v24, %v3635_v14  ;;  %v3639_v29 = vmax.f32 %v3523_v57, 0.0  ;;  %v3348_v30 = vpop.f32.mrb[124].mxu0  ;;  %v6729_v31 = vpop.f32.mrb[188].mxu1  ;;  %v7518_v15 = vld [vmem:[#allocation17 + $0xd4] ss:$8 sps:$4 sm:$0xff]  }
 0x63c   : > { %v3349_v32 = vadd.f32 %v3348_v30, %v9027_v16  ;;  %v3350_v23 = vpop.f32.mrb[125].mxu0  ;;  %v6730_v33 = vpop.f32.mrb[189].mxu1 }
 0x63d   : > { %3739 = vst [vmem:[%s9048_s12 + $0x68] sm:$0xff] %v3639_v29  ;;  %v3351_v36 = vadd.f32 %v3350_v23, %v9030_v45  ;;  %v6731_v18 = vadd.f32 %v6730_v33, %v6729_v31  ;;  %v3352_v38 = vpop.f32.mrb[126].mxu0  ;;  %v6732_v39 = vpop.f32.mrb[190].mxu1  ;;  %4957 = vmatpush1.bf16.msra.mxu1 %v7507_v49 }
 0x63e   : > { %v3353_v40 = vadd.f32 %v3352_v38, %v9027_v16  ;;  %v3354_v43 = vpop.f32.mrb[127].mxu0  ;;  %v6733_v44 = vpop.f32.mrb[191].mxu1  ;;  %v3640_v51 = vmax.f32 %v3349_v32, 0.0  ;;  %4958 = vmatprep.subr.bf16.mxu1 %v7512_v53  ;;  %v7521_v38 = vld [vmem:[#allocation17 + $0xe4] ss:$8 sps:$4 sm:$0xff]  }
 0x63f   : > { %v3528_v46 = vadd.f32 %v6731_v18, %v9033_v26  ;;  %v3355_v47 = vadd.f32 %v3354_v43, %v9030_v45  ;;  %v6734_v48 = vadd.f32 %v6733_v44, %v6732_v39  ;;  %v3641_v8 = vmax.f32 %v3351_v36, 0.0 }
 0x640   : > { %v3643_v52 = vmax.f32 %v3353_v40, 0.0  ;;  %4420 = vmatmul.mubr.bf16.gmra.mrb[168].mxu0 %v9076_v17  ;;  %v7510_v17 = vld [vmem:[#allocation17 + $0xb0] ss:$8 sps:$4 sm:$0xff]  }
 0x641   : > { %v3642_v58 = vmax.f32 %v3528_v46, 0.0  ;;  %v3644_v11 = vmax.f32 %v3355_v47, 0.0  ;;  %v3531_v50 = vadd.f32 %v6734_v48, %v9033_v26  ;;  %4429 = vmatprep.mubr.bf16.mxu0 %v9093_v55  ;;  %4959 = vmatpush1.bf16.msra.mxu1 %v7510_v17 }
 0x642   : > { %v9146_v21 = vpack.c.bf16 %v3643_v52, %v3640_v51  ;;  %4960 = vmatprep.subr.bf16.mxu1 %v7515_v3  ;;  %v7519_v52 = vld [vmem:[#allocation17 + $0xe0] ss:$8 sps:$4 sm:$0xff]  }
 0x643   : > { %3740 = vst [vmem:[%s9048_s12 + $0x70] sm:$0xff] %v3642_v58  ;;  %v9149_v22 = vpack.c.bf16 %v3644_v11, %v3641_v8  ;;  %v3645_v0 = vmax.f32 %v3531_v50, 0.0  ;;  %v3358_v35 = vpop.f32.mrb[128].mxu0  ;;  %v6735_v41 = vpop.f32.mrb[192].mxu1 }
 0x644   : > { %v3359_v59 = vadd.f32 %v3358_v35, %v9027_v16  ;;  %v3360_v61 = vpop.f32.mrb[129].mxu0  ;;  %v6736_v7 = vpop.f32.mrb[193].mxu1 }
 0x645   : > { %3741 = vst [vmem:[%s9048_s12 + $0x78] sm:$0xff] %v3645_v0  ;;  %v3361_v28 = vadd.f32 %v3360_v61, %v9030_v45  ;;  %v6737_v55 = vadd.f32 %v6736_v7, %v6735_v41  ;;  %v3362_v63 = vpop.f32.mrb[130].mxu0  ;;  %v6738_v1 = vpop.f32.mrb[194].mxu1  ;;  %4961 = vmatpush1.bf16.msra.mxu1 %v7513_v13 }
 0x646   : > { %v3363_v2 = vadd.f32 %v3362_v63, %v9027_v16  ;;  %v3364_v5 = vpop.f32.mrb[131].mxu0  ;;  %v6739_v9 = vpop.f32.mrb[195].mxu1  ;;  %v3646_v27 = vmax.f32 %v3359_v59, 0.0  ;;  %4962 = vmatprep.subr.bf16.mxu1 %v7518_v15 }
 0x647   : > { %v3536_v10 = vadd.f32 %v6737_v55, %v9033_v26  ;;  %v3365_v60 = vadd.f32 %v3364_v5, %v9030_v45  ;;  %v6740_v12 = vadd.f32 %v6739_v9, %v6738_v1  ;;  %v3647_v24 = vmax.f32 %v3361_v28, 0.0 }
 0x648   : > { %v3649_v14 = vmax.f32 %v3363_v2, 0.0  ;;  %4430 = vmatmul.mubr.bf16.gmra.mrb[172].mxu0 %v9090_v54  ;;  %v7516_v54 = vld [vmem:[#allocation17 + $0xd0] ss:$8 sps:$4 sm:$0xff]  }
 0x649   : > { %v3648_v57 = vmax.f32 %v3536_v10, 0.0  ;;  %v3650_v29 = vmax.f32 %v3365_v60, 0.0  ;;  %v3539_v30 = vadd.f32 %v6740_v12, %v9033_v26  ;;  %4439 = vmatprep.mubr.bf16.mxu0 %v9107_v20  ;;  %4963 = vmatpush1.bf16.msra.mxu1 %v7516_v54 }
 0x64a   : > { %v9160_v31 = vpack.c.bf16 %v3649_v14, %v3646_v27  ;;  %4964 = vmatprep.subr.bf16.mxu1 %v7521_v38 }
 0x64b   : > { %3742 = vst [vmem:[%s9048_s12 + $0x80] sm:$0xff] %v3648_v57  ;;  %v9163_v56 = vpack.c.bf16 %v3650_v29, %v3647_v24  ;;  %v3651_v32 = vmax.f32 %v3539_v30, 0.0  ;;  %v3368_v23 = vpop.f32.mrb[132].mxu0  ;;  %v6741_v33 = vpop.f32.mrb[196].mxu1 }
 0x64c   : > { %v3369_v34 = vadd.f32 %v3368_v23, %v9027_v16  ;;  %v3370_v36 = vpop.f32.mrb[133].mxu0  ;;  %v6742_v18 = vpop.f32.mrb[197].mxu1 }
 0x64d   : > { %3743 = vst [vmem:[%s9048_s12 + $0x88] sm:$0xff] %v3651_v32  ;;  %v3371_v39 = vadd.f32 %v3370_v36, %v9030_v45  ;;  %v6743_v20 = vadd.f32 %v6742_v18, %v6741_v33  ;;  %v3372_v40 = vpop.f32.mrb[134].mxu0  ;;  %v6744_v43 = vpop.f32.mrb[198].mxu1  ;;  %4965 = vmatpush1.bf16.msra.mxu1 %v7519_v52 }
 0x64e   : > { %v3373_v44 = vadd.f32 %v3372_v40, %v9027_v16  ;;  %v3374_v46 = vpop.f32.mrb[135].mxu0  ;;  %v6745_v47 = vpop.f32.mrb[199].mxu1  ;;  %v3652_v53 = vmax.f32 %v3369_v34, 0.0 }
 0x64f   : > { %v3544_v48 = vadd.f32 %v6743_v20, %v9033_v26  ;;  %v3375_v49 = vadd.f32 %v3374_v46, %v9030_v45  ;;  %v6746_v51 = vadd.f32 %v6745_v47, %v6744_v43  ;;  %v3653_v58 = vmax.f32 %v3371_v39, 0.0 }
 0x650   : > { %v3655_v8 = vmax.f32 %v3373_v44, 0.0  ;;  %4440 = vmatmul.mubr.bf16.gmra.mrb[176].mxu0 %v9104_v19 }
 0x651   : > { %v3654_v11 = vmax.f32 %v3544_v48, 0.0  ;;  %v3656_v50 = vmax.f32 %v3375_v49, 0.0  ;;  %v3547_v0 = vadd.f32 %v6746_v51, %v9033_v26  ;;  %4449 = vmatprep.mubr.bf16.mxu0 %v9121_v42 }
 0x652   : > { %v9174_v35 = vpack.c.bf16 %v3655_v8, %v3652_v53 }
 0x653   : > { %3744 = vst [vmem:[%s9048_s12 + $0x90] sm:$0xff] %v3654_v11  ;;  %v9177_v41 = vpack.c.bf16 %v3656_v50, %v3653_v58  ;;  %v3657_v17 = vmax.f32 %v3547_v0, 0.0  ;;  %v3378_v59 = vpop.f32.mrb[136].mxu0  ;;  %v6747_v61 = vpop.f32.mrb[200].mxu1 }
 0x654   : > { %v3379_v19 = vadd.f32 %v3378_v59, %v9027_v16  ;;  %v3380_v7 = vpop.f32.mrb[137].mxu0  ;;  %v6748_v3 = vpop.f32.mrb[201].mxu1 }
 0x655   : > { %3745 = vst [vmem:[%s9048_s12 + $0x98] sm:$0xff] %v3657_v17  ;;  %v3381_v28 = vadd.f32 %v3380_v7, %v9030_v45  ;;  %v6749_v55 = vadd.f32 %v6748_v3, %v6747_v61  ;;  %v3382_v63 = vpop.f32.mrb[138].mxu0  ;;  %v6750_v1 = vpop.f32.mrb[202].mxu1 }
 0x656   : > { %v3383_v42 = vadd.f32 %v3382_v63, %v9027_v16  ;;  %v3384_v2 = vpop.f32.mrb[139].mxu0  ;;  %v6751_v5 = vpop.f32.mrb[203].mxu1  ;;  %v3658_v12 = vmax.f32 %v3379_v19, 0.0 }
 0x657   : > { %v3552_v9 = vadd.f32 %v6749_v55, %v9033_v26  ;;  %v3385_v10 = vadd.f32 %v3384_v2, %v9030_v45  ;;  %v6752_v60 = vadd.f32 %v6751_v5, %v6750_v1  ;;  %v3659_v27 = vmax.f32 %v3381_v28, 0.0 }
 0x658   : > { %v3661_v13 = vmax.f32 %v3383_v42, 0.0  ;;  %4450 = vmatmul.mubr.bf16.gmra.mrb[180].mxu0 %v9118_v37 }
 0x659   : > { %v3660_v14 = vmax.f32 %v3552_v9, 0.0  ;;  %v3662_v15 = vmax.f32 %v3385_v10, 0.0  ;;  %v3555_v24 = vadd.f32 %v6752_v60, %v9033_v26  ;;  %4459 = vmatprep.mubr.bf16.mxu0 %v9135_v25 }
 0x65a   : > { %v9188_v57 = vpack.c.bf16 %v3661_v13, %v3658_v12 }
 0x65b   : > { %3746 = vst [vmem:[%s9048_s12 + $0xa0] sm:$0xff] %v3660_v14  ;;  %v9191_v29 = vpack.c.bf16 %v3662_v15, %v3659_v27  ;;  %v3663_v30 = vmax.f32 %v3555_v24, 0.0  ;;  %v3388_v32 = vpop.f32.mrb[140].mxu0  ;;  %v6753_v23 = vpop.f32.mrb[204].mxu1 }
 0x65c   : > { %v3389_v33 = vadd.f32 %v3388_v32, %v9027_v16  ;;  %v3390_v54 = vpop.f32.mrb[141].mxu0  ;;  %v6754_v34 = vpop.f32.mrb[205].mxu1 }
 0x65d   : > { %3747 = vst [vmem:[%s9048_s12 + $0xa8] sm:$0xff] %v3663_v30  ;;  %v3391_v37 = vadd.f32 %v3390_v54, %v9030_v45  ;;  %v6755_v36 = vadd.f32 %v6754_v34, %v6753_v23  ;;  %v3392_v18 = vpop.f32.mrb[142].mxu0  ;;  %v6756_v38 = vpop.f32.mrb[206].mxu1 }
 0x65e   : > { %v3393_v25 = vadd.f32 %v3392_v18, %v9027_v16  ;;  %v3394_v39 = vpop.f32.mrb[143].mxu0  ;;  %v6757_v20 = vpop.f32.mrb[207].mxu1  ;;  %v3664_v46 = vmax.f32 %v3389_v33, 0.0 }
 0x65f   : > { %v3560_v40 = vadd.f32 %v6755_v36, %v9033_v26  ;;  %v3395_v43 = vadd.f32 %v3394_v39, %v9030_v45  ;;  %v6758_v44 = vadd.f32 %v6757_v20, %v6756_v38  ;;  %v3665_v48 = vmax.f32 %v3391_v37, 0.0 }
 0x660   : > { %v3667_v47 = vmax.f32 %v3393_v25, 0.0  ;;  %4460 = vmatmul.mubr.bf16.gmra.mrb[184].mxu0 %v9132_v62 }
 0x661   : > { %v3666_v49 = vmax.f32 %v3560_v40, 0.0  ;;  %v3668_v51 = vmax.f32 %v3395_v43, 0.0  ;;  %v3563_v52 = vadd.f32 %v6758_v44, %v9033_v26  ;;  %4469 = vmatprep.mubr.bf16.mxu0 %v9149_v22 }
 0x662   : > { %v9202_v53 = vpack.c.bf16 %v3667_v47, %v3664_v46 }
 0x663   : > { %3748 = vst [vmem:[%s9048_s12 + $0xb0] sm:$0xff] %v3666_v49  ;;  %v9205_v8 = vpack.c.bf16 %v3668_v51, %v3665_v48  ;;  %v3669_v58 = vmax.f32 %v3563_v52, 0.0  ;;  %v3398_v11 = vpop.f32.mrb[144].mxu0  ;;  %v6759_v50 = vpop.f32.mrb[208].mxu1 }
 0x664   : > { %v3399_v0 = vadd.f32 %v3398_v11, %v9027_v16  ;;  %v3400_v17 = vpop.f32.mrb[145].mxu0  ;;  %v6760_v59 = vpop.f32.mrb[209].mxu1 }
 0x665   : > { %3749 = vst [vmem:[%s9048_s12 + $0xb8] sm:$0xff] %v3669_v58  ;;  %v3401_v62 = vadd.f32 %v3400_v17, %v9030_v45  ;;  %v6761_v61 = vadd.f32 %v6760_v59, %v6759_v50  ;;  %v3402_v19 = vpop.f32.mrb[146].mxu0  ;;  %v6762_v7 = vpop.f32.mrb[210].mxu1 }
 0x666   : > { %v3403_v22 = vadd.f32 %v3402_v19, %v9027_v16  ;;  %v3404_v3 = vpop.f32.mrb[147].mxu0  ;;  %v6763_v28 = vpop.f32.mrb[211].mxu1  ;;  %v3670_v42 = vmax.f32 %v3399_v0, 0.0 }
 0x667   : > { %v3568_v55 = vadd.f32 %v6761_v61, %v9033_v26  ;;  %v3405_v63 = vadd.f32 %v3404_v3, %v9030_v45  ;;  %v6764_v1 = vadd.f32 %v6763_v28, %v6762_v7  ;;  %v3671_v5 = vmax.f32 %v3401_v62, 0.0 }
 0x668   : > { %v3673_v2 = vmax.f32 %v3403_v22, 0.0  ;;  %4470 = vmatmul.mubr.bf16.gmra.mrb[188].mxu0 %v9146_v21 }
 0x669   : > { %v3672_v9 = vmax.f32 %v3568_v55, 0.0  ;;  %v3674_v10 = vmax.f32 %v3405_v63, 0.0  ;;  %v3571_v60 = vadd.f32 %v6764_v1, %v9033_v26  ;;  %4479 = vmatprep.mubr.bf16.mxu0 %v9163_v56 }
 0x66a   : > { %v9216_v12 = vpack.c.bf16 %v3673_v2, %v3670_v42 }
 0x66b   : > { %3750 = vst [vmem:[%s9048_s12 + $0xc0] sm:$0xff] %v3672_v9  ;;  %v9219_v13 = vpack.c.bf16 %v3674_v10, %v3671_v5  ;;  %v3675_v27 = vmax.f32 %v3571_v60, 0.0  ;;  %v3408_v14 = vpop.f32.mrb[148].mxu0  ;;  %v6765_v15 = vpop.f32.mrb[212].mxu1 }
 0x66c   : > { %v3409_v24 = vadd.f32 %v3408_v14, %v9027_v16  ;;  %v3410_v30 = vpop.f32.mrb[149].mxu0  ;;  %v6766_v32 = vpop.f32.mrb[213].mxu1 }
 0x66d   : > { %3751 = vst [vmem:[%s9048_s12 + $0xc8] sm:$0xff] %v3675_v27  ;;  %v3411_v21 = vadd.f32 %v3410_v30, %v9030_v45  ;;  %v6767_v23 = vadd.f32 %v6766_v32, %v6765_v15  ;;  %v3412_v33 = vpop.f32.mrb[150].mxu0  ;;  %v6768_v54 = vpop.f32.mrb[214].mxu1 }
 0x66e   : > { %v3413_v56 = vadd.f32 %v3412_v33, %v9027_v16  ;;  %v3414_v34 = vpop.f32.mrb[151].mxu0  ;;  %v6769_v37 = vpop.f32.mrb[215].mxu1  ;;  %v3676_v25 = vmax.f32 %v3409_v24, 0.0 }
 0x66f   : > { %v3576_v36 = vadd.f32 %v6767_v23, %v9033_v26  ;;  %v3415_v18 = vadd.f32 %v3414_v34, %v9030_v45  ;;  %v6770_v38 = vadd.f32 %v6769_v37, %v6768_v54  ;;  %v3677_v20 = vmax.f32 %v3411_v21, 0.0 }
 0x670   : > { %v3679_v39 = vmax.f32 %v3413_v56, 0.0  ;;  %4480 = vmatmul.mubr.bf16.gmra.mrb[192].mxu0 %v9160_v31 }
 0x671   : > { %v3678_v40 = vmax.f32 %v3576_v36, 0.0  ;;  %v3680_v43 = vmax.f32 %v3415_v18, 0.0  ;;  %v3579_v44 = vadd.f32 %v6770_v38, %v9033_v26  ;;  %4489 = vmatprep.mubr.bf16.mxu0 %v9177_v41 }
 0x672   : > { %v9230_v46 = vpack.c.bf16 %v3679_v39, %v3676_v25 }
 0x673   : > { %3752 = vst [vmem:[%s9048_s12 + $0xd0] sm:$0xff] %v3678_v40  ;;  %v9233_v47 = vpack.c.bf16 %v3680_v43, %v3677_v20  ;;  %v3681_v48 = vmax.f32 %v3579_v44, 0.0  ;;  %v3418_v49 = vpop.f32.mrb[152].mxu0  ;;  %v6771_v51 = vpop.f32.mrb[216].mxu1  ;;  %v7522_v20 = vld [vmem:[#allocation17 + $0xf0] ss:$8 sps:$4 sm:$0xff]  }
 0x674   : > { %v3419_v52 = vadd.f32 %v3418_v49, %v9027_v16  ;;  %v3420_v58 = vpop.f32.mrb[153].mxu0  ;;  %v6772_v11 = vpop.f32.mrb[217].mxu1 }
 0x675   : > { %3753 = vst [vmem:[%s9048_s12 + $0xd8] sm:$0xff] %v3681_v48  ;;  %v3421_v31 = vadd.f32 %v3420_v58, %v9030_v45  ;;  %v6773_v50 = vadd.f32 %v6772_v11, %v6771_v51  ;;  %v3422_v0 = vpop.f32.mrb[154].mxu0  ;;  %v6774_v17 = vpop.f32.mrb[218].mxu1 }
 0x676   : > { %v3423_v41 = vadd.f32 %v3422_v0, %v9027_v16  ;;  %v3424_v59 = vpop.f32.mrb[155].mxu0  ;;  %v6775_v62 = vpop.f32.mrb[219].mxu1  ;;  %v3682_v22 = vmax.f32 %v3419_v52, 0.0  ;;  %v7525_v0 = vld [vmem:[#allocation19] ss:$8 sps:$4 sm:$0xff]  }
 0x677   : > { %v3584_v61 = vadd.f32 %v6773_v50, %v9033_v26  ;;  %v3425_v19 = vadd.f32 %v3424_v59, %v9030_v45  ;;  %v6776_v7 = vadd.f32 %v6775_v62, %v6774_v17  ;;  %v3683_v28 = vmax.f32 %v3421_v31, 0.0  ;;  %v7530_v59 = vld [vmem:[#allocation19 + $0x14] ss:$8 sps:$4 sm:$0xff]  }
 0x678   : > { %v3685_v3 = vmax.f32 %v3423_v41, 0.0  ;;  %4490 = vmatmul.mubr.bf16.gmra.mrb[196].mxu0 %v9174_v35 }
 0x679   : > { %v3684_v55 = vmax.f32 %v3584_v61, 0.0  ;;  %v3686_v63 = vmax.f32 %v3425_v19, 0.0  ;;  %v3587_v1 = vadd.f32 %v6776_v7, %v9033_v26  ;;  %4499 = vmatprep.mubr.bf16.mxu0 %v9191_v29 }
 0x67a   : > { %v3722_v42 = vpack.c.bf16 %v3685_v3, %v3682_v22  ;;  %v7528_v3 = vld [vmem:[#allocation19 + $0x10] ss:$8 sps:$4 sm:$0xff]  }
 0x67b   : > { %3754 = vst [vmem:[%s9048_s12 + $0xe0] sm:$0xff] %v3684_v55  ;;  %v3723_v2 = vpack.c.bf16 %v3686_v63, %v3683_v28  ;;  %v3687_v5 = vmax.f32 %v3587_v1, 0.0  ;;  %v3428_v9 = vpop.f32.mrb[156].mxu0  ;;  %v6777_v10 = vpop.f32.mrb[220].mxu1  ;;  %v7533_v63 = vld [vmem:[#allocation19 + $0x24] ss:$8 sps:$4 sm:$0xff]  }
 0x67c   : > { %v3429_v60 = vadd.f32 %v3428_v9, %v9027_v16  ;;  %v3430_v27 = vpop.f32.mrb[157].mxu0  ;;  %v6778_v14 = vpop.f32.mrb[221].mxu1 }
 0x67d   : > { %3755 = vst [vmem:[%s9048_s12 + $0xe8] sm:$0xff] %v3687_v5  ;;  %v3431_v35 = vadd.f32 %v3430_v27, %v9030_v45  ;;  %v6779_v15 = vadd.f32 %v6778_v14, %v6777_v10  ;;  %v3432_v24 = vpop.f32.mrb[158].mxu0  ;;  %v6780_v30 = vpop.f32.mrb[222].mxu1  ;;  %v7531_v10 = vld [vmem:[#allocation19 + $0x20] ss:$8 sps:$4 sm:$0xff]  }
 0x67e   : > { %v3433_v32 = vadd.f32 %v3432_v24, %v9027_v16  ;;  %v3434_v29 = vpop.f32.mrb[159].mxu0  ;;  %v6781_v21 = vpop.f32.mrb[223].mxu1  ;;  %v3688_v56 = vmax.f32 %v3429_v60, 0.0  ;;  %v7536_v14 = vld [vmem:[#allocation19 + $0x34] ss:$8 sps:$4 sm:$0xff]  }
 0x67f   : > { %v3592_v23 = vadd.f32 %v6779_v15, %v9033_v26  ;;  %v3435_v33 = vadd.f32 %v3434_v29, %v9030_v45  ;;  %v6782_v54 = vadd.f32 %v6781_v21, %v6780_v30  ;;  %v3689_v37 = vmax.f32 %v3431_v35, 0.0  ;;  %v7524_v45 = vld [vmem:[#allocation17 + $0xf4] ss:$8 sps:$4 sm:$0xff]   ;;  %v7534_v29 = vld [vmem:[#allocation19 + $0x30] ss:$8 sps:$4 sm:$0xff]  }
 0x680   : > { %v3691_v34 = vmax.f32 %v3433_v32, 0.0  ;;  %4500 = vmatmul.mubr.bf16.gmra.mrb[200].mxu0 %v9188_v57  ;;  %4966 = vmatprep.subr.bf16.mxu1 %v7524_v45  ;;  %v4560_v57 = vld [vmem:[%s9751_s0] sm:$0x3]  ;;  %s9755_s0 = sld [smem:[#allocation53_spill]] }
 0x681   : > { %v3690_v36 = vmax.f32 %v3592_v23, 0.0  ;;  %v3692_v18 = vmax.f32 %v3435_v33, 0.0  ;;  %v3595_v38 = vadd.f32 %v6782_v54, %v9033_v26  ;;  %4509 = vmatprep.mubr.bf16.mxu0 %v9205_v8  ;;  %4967 = vmatpush1.bf16.msra.mxu1 %v7522_v20  ;;  %v7527_v26 = vld [vmem:[#allocation19 + $0x4] ss:$8 sps:$4 sm:$0xff]   ;;  %v9268_v8 = vrot.slane %v4560_v57, %v8673_v6 }
 0x682   : > { %v3724_v16 = vpack.c.bf16 %v3691_v34, %v3688_v56  ;;  %5429 = vmatprep.subr.bf16.mxu1 %v7527_v26  ;;  %v7539_v33 = vld [vmem:[#allocation19 + $0x44] ss:$8 sps:$4 sm:$0xff]  }
 0x683   : > { %3756 = vst [vmem:[%s9048_s12 + $0xf0] sm:$0xff] %v3690_v36  ;;  %v3725_v25 = vpack.c.bf16 %v3692_v18, %v3689_v37  ;;  %v3693_v39 = vmax.f32 %v3595_v38, 0.0  ;;  %v7537_v18 = vld [vmem:[#allocation19 + $0x40] ss:$8 sps:$4 sm:$0xff]  }
 0x685   : > { %3757 = vst [vmem:[%s9048_s12 + $0xf8] sm:$0xff] %v3693_v39  ;;  %s6047_s12 = scalar_lea.sflag [#allocation4], %s8591_s21 }
 0x688   : > { %4510 = vmatmul.mubr.bf16.gmra.mrb[204].mxu0 %v9202_v53  ;;  %v9265_v53 = vrot.slane %v4560_v57, %v8667_v4 }
 0x689   : > { %4519 = vmatprep.mubr.bf16.mxu0 %v9219_v13 }
 0x690   : > { %4520 = vmatmul.mubr.bf16.gmra.mrb[208].mxu0 %v9216_v12 }
 0x691   : > { %4529 = vmatprep.mubr.bf16.mxu0 %v9233_v47 }
 0x698   : > { %4530 = vmatmul.mubr.bf16.gmra.mrb[212].mxu0 %v9230_v46 }
 0x699   : > { %4539 = vmatprep.mubr.bf16.mxu0 %v3723_v2 }
 0x6a0   : > { %4540 = vmatmul.mubr.bf16.gmra.mrb[216].mxu0 %v3722_v42 }
 0x6a1   : > { %4549 = vmatprep.mubr.bf16.mxu0 %v3725_v25  ;;  %v7542_v25 = vld [vmem:[#allocation19 + $0x54] ss:$8 sps:$4 sm:$0xff]  }
 0x6a8   : > { %4550 = vmatmul.mubr.bf16.gmra.mrb[220].mxu0 %v3724_v16 }
 0x703   : > { %v4401_v12 = vpop.f32.mrb[160].mxu0 }
 0x704   : > { %v4572_v13 = vadd.f32 %v9265_v53, %v4401_v12  ;;  %v4403_v40 = vpop.f32.mrb[161].mxu0  ;;  %v7540_v12 = vld [vmem:[#allocation19 + $0x50] ss:$8 sps:$4 sm:$0xff]  }
 0x705   : > { %v4573_v43 = vadd.f32 %v9268_v8, %v4403_v40  ;;  %v4405_v44 = vpop.f32.mrb[162].mxu0 }
 0x706   : > { %v4574_v46 = vadd.f32 %v9265_v53, %v4405_v44  ;;  %v4407_v47 = vpop.f32.mrb[163].mxu0  ;;  %v4636_v49 = vmax.f32 %v4572_v13, 0.0 }
 0x707   : > { %v4575_v48 = vadd.f32 %v9268_v8, %v4407_v47  ;;  %v4637_v52 = vmax.f32 %v4573_v43, 0.0  ;;  %v7545_v43 = vld [vmem:[#allocation19 + $0x64] ss:$8 sps:$4 sm:$0xff]  }
 0x708   : > { %v4638_v51 = vmax.f32 %v4574_v46, 0.0 }
 0x709   : > { %v4639_v58 = vmax.f32 %v4575_v48, 0.0 }
 0x70a   : > { %v4700_v11 = vpack.c.bf16 %v4638_v51, %v4636_v49  ;;  %v7543_v51 = vld [vmem:[#allocation19 + $0x60] ss:$8 sps:$4 sm:$0xff]  }
 0x70b   : > { %v4701_v31 = vpack.c.bf16 %v4639_v58, %v4637_v52  ;;  %v4411_v50 = vpop.f32.mrb[164].mxu0 }
 0x70c   : > { %v4576_v17 = vadd.f32 %v9265_v53, %v4411_v50  ;;  %v4413_v41 = vpop.f32.mrb[165].mxu0 }
 0x70d   : > { %v4577_v62 = vadd.f32 %v9268_v8, %v4413_v41  ;;  %v4415_v61 = vpop.f32.mrb[166].mxu0  ;;  %4968 = vmatprep.mubr.bf16.mxu1 %v4701_v31 }
 0x70e   : > { %v4578_v19 = vadd.f32 %v9265_v53, %v4415_v61  ;;  %v4417_v7 = vpop.f32.mrb[167].mxu0  ;;  %4969 = vmatmul.mubr.bf16.vlgmr.msra.gmra.mrb[224].mxu1 %v4700_v11  ;;  %v4640_v28 = vmax.f32 %v4576_v17, 0.0  ;;  %v7548_v11 = vld [vmem:[#allocation19 + $0x74] ss:$8 sps:$4 sm:$0xff]  }
 0x70f   : > { %v4579_v22 = vadd.f32 %v9268_v8, %v4417_v7  ;;  %5430 = vmatpush1.bf16.msra.mxu1 %v7525_v0  ;;  %v4641_v1 = vmax.f32 %v4577_v62, 0.0 }
 0x710   : > { %v4642_v55 = vmax.f32 %v4578_v19, 0.0  ;;  %5431 = vmatprep.subr.bf16.mxu1 %v7530_v59  ;;  %v7546_v59 = vld [vmem:[#allocation19 + $0x70] ss:$8 sps:$4 sm:$0xff]   ;;  %v7551_v19 = vld [vmem:[#allocation19 + $0x84] ss:$8 sps:$4 sm:$0xff]  }
 0x711   : > { %v4643_v42 = vmax.f32 %v4579_v22, 0.0 }
 0x712   : > { %v4702_v2 = vpack.c.bf16 %v4642_v55, %v4640_v28 }
 0x713   : > { %v4703_v5 = vpack.c.bf16 %v4643_v42, %v4641_v1  ;;  %v4421_v9 = vpop.f32.mrb[168].mxu0  ;;  %5432 = vmatpush1.bf16.msra.mxu1 %v7528_v3 }
 0x714   : > { %v4580_v60 = vadd.f32 %v9265_v53, %v4421_v9  ;;  %v4423_v27 = vpop.f32.mrb[169].mxu0  ;;  %5433 = vmatprep.subr.bf16.mxu1 %v7533_v63  ;;  %v7549_v63 = vld [vmem:[#allocation19 + $0x80] ss:$8 sps:$4 sm:$0xff]  }
 0x715   : > { %v4581_v35 = vadd.f32 %v9268_v8, %v4423_v27  ;;  %v4425_v15 = vpop.f32.mrb[170].mxu0  ;;  %4978 = vmatprep.mubr.bf16.mxu1 %v4703_v5 }
 0x716   : > { %v4582_v24 = vadd.f32 %v9265_v53, %v4425_v15  ;;  %v4427_v30 = vpop.f32.mrb[171].mxu0  ;;  %4979 = vmatmul.mubr.bf16.gmra.mrb[228].mxu1 %v4702_v2  ;;  %v4644_v21 = vmax.f32 %v4580_v60, 0.0  ;;  %v7554_v2 = vld [vmem:[#allocation19 + $0x94] ss:$8 sps:$4 sm:$0xff]  }
 0x717   : > { %v4583_v32 = vadd.f32 %v9268_v8, %v4427_v30  ;;  %5434 = vmatpush1.bf16.msra.mxu1 %v7531_v10  ;;  %v4645_v54 = vmax.f32 %v4581_v35, 0.0 }
 0x718   : > { %v4646_v23 = vmax.f32 %v4582_v24, 0.0  ;;  %5435 = vmatprep.subr.bf16.mxu1 %v7536_v14  ;;  %v7552_v14 = vld [vmem:[#allocation19 + $0x90] ss:$8 sps:$4 sm:$0xff]   ;;  %v7557_v24 = vld [vmem:[#allocation19 + $0xa4] ss:$8 sps:$4 sm:$0xff]  }
 0x719   : > { %v4647_v56 = vmax.f32 %v4583_v32, 0.0 }
 0x71a   : > { %v4704_v34 = vpack.c.bf16 %v4646_v23, %v4644_v21 }
 0x71b   : > { %v4705_v37 = vpack.c.bf16 %v4647_v56, %v4645_v54  ;;  %v4431_v36 = vpop.f32.mrb[172].mxu0  ;;  %5436 = vmatpush1.bf16.msra.mxu1 %v7534_v29 }
 0x71c   : > { %v4584_v38 = vadd.f32 %v9265_v53, %v4431_v36  ;;  %v4433_v16 = vpop.f32.mrb[173].mxu0  ;;  %5437 = vmatprep.subr.bf16.mxu1 %v7539_v33  ;;  %v7555_v33 = vld [vmem:[#allocation19 + $0xa0] ss:$8 sps:$4 sm:$0xff]  }
 0x71d   : > { %v4585_v39 = vadd.f32 %v9268_v8, %v4433_v16  ;;  %v4435_v45 = vpop.f32.mrb[174].mxu0  ;;  %4988 = vmatprep.mubr.bf16.mxu1 %v4705_v37 }
 0x71e   : > { %v4586_v20 = vadd.f32 %v9265_v53, %v4435_v45  ;;  %v4437_v26 = vpop.f32.mrb[175].mxu0  ;;  %4989 = vmatmul.mubr.bf16.gmra.mrb[232].mxu1 %v4704_v34  ;;  %v4648_v13 = vmax.f32 %v4584_v38, 0.0  ;;  %v7560_v34 = vld [vmem:[#allocation19 + $0xb4] ss:$8 sps:$4 sm:$0xff]  }
 0x71f   : > { %v4587_v57 = vadd.f32 %v9268_v8, %v4437_v26  ;;  %5438 = vmatpush1.bf16.msra.mxu1 %v7537_v18  ;;  %v4649_v44 = vmax.f32 %v4585_v39, 0.0 }
 0x720   : > { %v4650_v40 = vmax.f32 %v4586_v20, 0.0  ;;  %5439 = vmatprep.subr.bf16.mxu1 %v7542_v25  ;;  %v7558_v25 = vld [vmem:[#allocation19 + $0xb0] ss:$8 sps:$4 sm:$0xff]   ;;  %v7563_v20 = vld [vmem:[#allocation19 + $0xc4] ss:$8 sps:$4 sm:$0xff]  }
 0x721   : > { %v4651_v46 = vmax.f32 %v4587_v57, 0.0 }
 0x722   : > { %v4706_v47 = vpack.c.bf16 %v4650_v40, %v4648_v13 }
 0x723   : > { %v4707_v48 = vpack.c.bf16 %v4651_v46, %v4649_v44  ;;  %v4441_v49 = vpop.f32.mrb[176].mxu0  ;;  %5440 = vmatpush1.bf16.msra.mxu1 %v7540_v12 }
 0x724   : > { %v4588_v52 = vadd.f32 %v9265_v53, %v4441_v49  ;;  %v4443_v58 = vpop.f32.mrb[177].mxu0  ;;  %5441 = vmatprep.subr.bf16.mxu1 %v7545_v43  ;;  %v7561_v43 = vld [vmem:[#allocation19 + $0xc0] ss:$8 sps:$4 sm:$0xff]  }
 0x725   : > { %v4589_v31 = vadd.f32 %v9268_v8, %v4443_v58  ;;  %v4445_v50 = vpop.f32.mrb[178].mxu0  ;;  %4998 = vmatprep.mubr.bf16.mxu1 %v4707_v48 }
 0x726   : > { %v4590_v0 = vadd.f32 %v9265_v53, %v4445_v50  ;;  %v4447_v17 = vpop.f32.mrb[179].mxu0  ;;  %4999 = vmatmul.mubr.bf16.gmra.mrb[236].mxu1 %v4706_v47  ;;  %v4652_v62 = vmax.f32 %v4588_v52, 0.0  ;;  %v7566_v47 = vld [vmem:[#allocation19 + $0xd4] ss:$8 sps:$4 sm:$0xff]  }
 0x727   : > { %v4591_v41 = vadd.f32 %v9268_v8, %v4447_v17  ;;  %5442 = vmatpush1.bf16.msra.mxu1 %v7543_v51  ;;  %v4653_v7 = vmax.f32 %v4589_v31, 0.0 }
 0x728   : > { %v4654_v61 = vmax.f32 %v4590_v0, 0.0  ;;  %5443 = vmatprep.subr.bf16.mxu1 %v7548_v11  ;;  %v7564_v11 = vld [vmem:[#allocation19 + $0xd0] ss:$8 sps:$4 sm:$0xff]   ;;  %v7569_v0 = vld [vmem:[#allocation19 + $0xe4] ss:$8 sps:$4 sm:$0xff]  }
 0x729   : > { %v4655_v22 = vmax.f32 %v4591_v41, 0.0 }
 0x72a   : > { %v4708_v3 = vpack.c.bf16 %v4654_v61, %v4652_v62 }
 0x72b   : > { %v4709_v28 = vpack.c.bf16 %v4655_v22, %v4653_v7  ;;  %v4451_v55 = vpop.f32.mrb[180].mxu0  ;;  %5444 = vmatpush1.bf16.msra.mxu1 %v7546_v59 }
 0x72c   : > { %v4592_v1 = vadd.f32 %v9265_v53, %v4451_v55  ;;  %v4453_v42 = vpop.f32.mrb[181].mxu0  ;;  %5445 = vmatprep.subr.bf16.mxu1 %v7551_v19  ;;  %v7567_v19 = vld [vmem:[#allocation19 + $0xe0] ss:$8 sps:$4 sm:$0xff]  }
 0x72d   : > { %v4593_v5 = vadd.f32 %v9268_v8, %v4453_v42  ;;  %v4455_v9 = vpop.f32.mrb[182].mxu0  ;;  %5008 = vmatprep.mubr.bf16.mxu1 %v4709_v28 }
 0x72e   : > { %v4594_v10 = vadd.f32 %v9265_v53, %v4455_v9  ;;  %v4457_v60 = vpop.f32.mrb[183].mxu0  ;;  %5009 = vmatmul.mubr.bf16.gmra.mrb[240].mxu1 %v4708_v3  ;;  %v4656_v35 = vmax.f32 %v4592_v1, 0.0 }
 0x72f   : > { %v4595_v27 = vadd.f32 %v9268_v8, %v4457_v60  ;;  %5446 = vmatpush1.bf16.msra.mxu1 %v7549_v63  ;;  %v4657_v30 = vmax.f32 %v4593_v5, 0.0 }
 0x730   : > { %v4658_v15 = vmax.f32 %v4594_v10, 0.0  ;;  %5447 = vmatprep.subr.bf16.mxu1 %v7554_v2 }
 0x731   : > { %v4659_v32 = vmax.f32 %v4595_v27, 0.0 }
 0x732   : > { %v4710_v29 = vpack.c.bf16 %v4658_v15, %v4656_v35 }
 0x733   : > { %v4711_v21 = vpack.c.bf16 %v4659_v32, %v4657_v30  ;;  %v4461_v23 = vpop.f32.mrb[184].mxu0  ;;  %5448 = vmatpush1.bf16.msra.mxu1 %v7552_v14 }
 0x734   : > { %v4596_v54 = vadd.f32 %v9265_v53, %v4461_v23  ;;  %v4463_v56 = vpop.f32.mrb[185].mxu0  ;;  %5449 = vmatprep.subr.bf16.mxu1 %v7557_v24 }
 0x735   : > { %v4597_v37 = vadd.f32 %v9268_v8, %v4463_v56  ;;  %v4465_v36 = vpop.f32.mrb[186].mxu0  ;;  %5018 = vmatprep.mubr.bf16.mxu1 %v4711_v21 }
 0x736   : > { %v4598_v18 = vadd.f32 %v9265_v53, %v4465_v36  ;;  %v4467_v38 = vpop.f32.mrb[187].mxu0  ;;  %5019 = vmatmul.mubr.bf16.gmra.mrb[244].mxu1 %v4710_v29  ;;  %v4660_v39 = vmax.f32 %v4596_v54, 0.0 }
 0x737   : > { %v4599_v16 = vadd.f32 %v9268_v8, %v4467_v38  ;;  %5450 = vmatpush1.bf16.msra.mxu1 %v7555_v33  ;;  %v4661_v26 = vmax.f32 %v4597_v37, 0.0 }
 0x738   : > { %v4662_v45 = vmax.f32 %v4598_v18, 0.0  ;;  %5451 = vmatprep.subr.bf16.mxu1 %v7560_v34 }
 0x739   : > { %v4663_v57 = vmax.f32 %v4599_v16, 0.0 }
 0x73a   : > { %v4712_v12 = vpack.c.bf16 %v4662_v45, %v4660_v39 }
 0x73b   : > { %v4713_v13 = vpack.c.bf16 %v4663_v57, %v4661_v26  ;;  %v4471_v40 = vpop.f32.mrb[188].mxu0  ;;  %5452 = vmatpush1.bf16.msra.mxu1 %v7558_v25 }
 0x73c   : > { %v4600_v44 = vadd.f32 %v9265_v53, %v4471_v40  ;;  %v4473_v46 = vpop.f32.mrb[189].mxu0  ;;  %5453 = vmatprep.subr.bf16.mxu1 %v7563_v20 }
 0x73d   : > { %v4601_v48 = vadd.f32 %v9268_v8, %v4473_v46  ;;  %v4475_v49 = vpop.f32.mrb[190].mxu0  ;;  %5028 = vmatprep.mubr.bf16.mxu1 %v4713_v13 }
 0x73e   : > { %v4602_v51 = vadd.f32 %v9265_v53, %v4475_v49  ;;  %v4477_v52 = vpop.f32.mrb[191].mxu0  ;;  %5029 = vmatmul.mubr.bf16.gmra.mrb[248].mxu1 %v4712_v12  ;;  %v4664_v31 = vmax.f32 %v4600_v44, 0.0 }
 0x73f   : > { %v4603_v58 = vadd.f32 %v9268_v8, %v4477_v52  ;;  %5454 = vmatpush1.bf16.msra.mxu1 %v7561_v43  ;;  %v4665_v17 = vmax.f32 %v4601_v48, 0.0 }
 0x740   : > { %v4666_v50 = vmax.f32 %v4602_v51, 0.0  ;;  %5455 = vmatprep.subr.bf16.mxu1 %v7566_v47 }
 0x741   : > { %v4667_v41 = vmax.f32 %v4603_v58, 0.0 }
 0x742   : > { %v4714_v59 = vpack.c.bf16 %v4666_v50, %v4664_v31 }
 0x743   : > { %v4715_v62 = vpack.c.bf16 %v4667_v41, %v4665_v17  ;;  %v4481_v61 = vpop.f32.mrb[192].mxu0  ;;  %5456 = vmatpush1.bf16.msra.mxu1 %v7564_v11 }
 0x744   : > { %v4604_v7 = vadd.f32 %v9265_v53, %v4481_v61  ;;  %v4483_v22 = vpop.f32.mrb[193].mxu0  ;;  %5457 = vmatprep.subr.bf16.mxu1 %v7569_v0 }
 0x745   : > { %v4605_v3 = vadd.f32 %v9268_v8, %v4483_v22  ;;  %v4485_v28 = vpop.f32.mrb[194].mxu0  ;;  %5038 = vmatprep.mubr.bf16.mxu1 %v4715_v62 }
 0x746   : > { %v4606_v55 = vadd.f32 %v9265_v53, %v4485_v28  ;;  %v4487_v63 = vpop.f32.mrb[195].mxu0  ;;  %5039 = vmatmul.mubr.bf16.gmra.mrb[252].mxu1 %v4714_v59  ;;  %v4668_v42 = vmax.f32 %v4604_v7, 0.0 }
 0x747   : > { %v4607_v1 = vadd.f32 %v9268_v8, %v4487_v63  ;;  %5458 = vmatpush1.bf16.msra.mxu1 %v7567_v19  ;;  %v4669_v5 = vmax.f32 %v4605_v3, 0.0  ;;  %v7572_v3 = vld [vmem:[#allocation19 + $0xf4] ss:$8 sps:$4 sm:$0xff]  }
 0x748   : > { %v4670_v2 = vmax.f32 %v4606_v55, 0.0  ;;  %v7570_v55 = vld [vmem:[#allocation19 + $0xf0] ss:$8 sps:$4 sm:$0xff]   ;;  %5459 = vmatprep.subr.bf16.mxu1 %v7572_v3 }
 0x749   : > { %v4671_v9 = vmax.f32 %v4607_v1, 0.0 }
 0x74a   : > { %v4716_v10 = vpack.c.bf16 %v4670_v2, %v4668_v42 }
 0x74b   : > { %v4717_v60 = vpack.c.bf16 %v4671_v9, %v4669_v5  ;;  %v4491_v27 = vpop.f32.mrb[196].mxu0  ;;  %5460 = vmatpush1.bf16.msra.mxu1 %v7570_v55 }
 0x74c   : > { %v4608_v14 = vadd.f32 %v9265_v53, %v4491_v27  ;;  %v4493_v35 = vpop.f32.mrb[197].mxu0 }
 0x74d   : > { %v4609_v15 = vadd.f32 %v9268_v8, %v4493_v35  ;;  %v4495_v24 = vpop.f32.mrb[198].mxu0  ;;  %5048 = vmatprep.mubr.bf16.mxu1 %v4717_v60 }
 0x74e   : > { %v4610_v30 = vadd.f32 %v9265_v53, %v4495_v24  ;;  %v4497_v32 = vpop.f32.mrb[199].mxu0  ;;  %5049 = vmatmul.mubr.bf16.gmra.mrb[0].mxu1 %v4716_v10  ;;  %v4672_v21 = vmax.f32 %v4608_v14, 0.0 }
 0x74f   : > { %v4611_v29 = vadd.f32 %v9268_v8, %v4497_v32  ;;  %v4673_v33 = vmax.f32 %v4609_v15, 0.0 }
 0x750   : > { %v4674_v23 = vmax.f32 %v4610_v30, 0.0 }
 0x751   : > { %v4675_v54 = vmax.f32 %v4611_v29, 0.0 }
 0x752   : > { %v4718_v56 = vpack.c.bf16 %v4674_v23, %v4672_v21 }
 0x753   : > { %v4719_v34 = vpack.c.bf16 %v4675_v54, %v4673_v33  ;;  %v4501_v37 = vpop.f32.mrb[200].mxu0 }
 0x754   : > { %v4612_v36 = vadd.f32 %v9265_v53, %v4501_v37  ;;  %v4503_v18 = vpop.f32.mrb[201].mxu0 }
 0x755   : > { %v4613_v38 = vadd.f32 %v9268_v8, %v4503_v18  ;;  %v4505_v16 = vpop.f32.mrb[202].mxu0  ;;  %5058 = vmatprep.mubr.bf16.mxu1 %v4719_v34 }
 0x756   : > { %v4614_v25 = vadd.f32 %v9265_v53, %v4505_v16  ;;  %v4507_v39 = vpop.f32.mrb[203].mxu0  ;;  %5059 = vmatmul.mubr.bf16.gmra.mrb[4].mxu1 %v4718_v56  ;;  %v4676_v20 = vmax.f32 %v4612_v36, 0.0 }
 0x757   : > { %v4615_v45 = vadd.f32 %v9268_v8, %v4507_v39  ;;  %v4677_v57 = vmax.f32 %v4613_v38, 0.0 }
 0x758   : > { %v4678_v26 = vmax.f32 %v4614_v25, 0.0 }
 0x759   : > { %v4679_v12 = vmax.f32 %v4615_v45, 0.0 }
 0x75a   : > { %v4720_v13 = vpack.c.bf16 %v4678_v26, %v4676_v20 }
 0x75b   : > { %v4721_v40 = vpack.c.bf16 %v4679_v12, %v4677_v57  ;;  %v4511_v43 = vpop.f32.mrb[204].mxu0 }
 0x75c   : > { %v4616_v44 = vadd.f32 %v9265_v53, %v4511_v43  ;;  %v4513_v46 = vpop.f32.mrb[205].mxu0 }
 0x75d   : > { %v4617_v47 = vadd.f32 %v9268_v8, %v4513_v46  ;;  %v4515_v48 = vpop.f32.mrb[206].mxu0  ;;  %5068 = vmatprep.mubr.bf16.mxu1 %v4721_v40 }
 0x75e   : > { %v4618_v49 = vadd.f32 %v9265_v53, %v4515_v48  ;;  %v4517_v51 = vpop.f32.mrb[207].mxu0  ;;  %5069 = vmatmul.mubr.bf16.gmra.mrb[8].mxu1 %v4720_v13  ;;  %v4680_v58 = vmax.f32 %v4616_v44, 0.0 }
 0x75f   : > { %v4619_v52 = vadd.f32 %v9268_v8, %v4517_v51  ;;  %v4681_v31 = vmax.f32 %v4617_v47, 0.0 }
 0x760   : > { %v4682_v11 = vmax.f32 %v4618_v49, 0.0 }
 0x761   : > { %v4683_v50 = vmax.f32 %v4619_v52, 0.0 }
 0x762   : > { %v4722_v0 = vpack.c.bf16 %v4682_v11, %v4680_v58 }
 0x763   : > { %v4723_v17 = vpack.c.bf16 %v4683_v50, %v4681_v31  ;;  %v4521_v41 = vpop.f32.mrb[208].mxu0 }
 0x764   : > { %v4620_v59 = vadd.f32 %v9265_v53, %v4521_v41  ;;  %v4523_v62 = vpop.f32.mrb[209].mxu0  ;;  %v7575_v41 = vld [vmem:[#allocation20 + $0x48] sm:$0xff]  }
 0x765   : > { %v4621_v61 = vadd.f32 %v9268_v8, %v4523_v62  ;;  %v4525_v19 = vpop.f32.mrb[210].mxu0  ;;  %5078 = vmatprep.mubr.bf16.mxu1 %v4723_v17  ;;  %v7574_v17 = vld [vmem:[#allocation20] sm:$0xff]  }
 0x766   : > { %v4622_v7 = vadd.f32 %v9265_v53, %v4525_v19  ;;  %v4527_v22 = vpop.f32.mrb[211].mxu0  ;;  %5079 = vmatmul.mubr.bf16.gmra.mrb[12].mxu1 %v4722_v0  ;;  %v4684_v63 = vmax.f32 %v4620_v59, 0.0  ;;  %v7573_v0 = vld [vmem:[#allocation20 + $0x40] sm:$0xff]   ;;  %v7576_v59 = vld [vmem:[#allocation20 + $0x8] sm:$0xff]  }
 0x767   : > { %v4623_v28 = vadd.f32 %v9268_v8, %v4527_v22  ;;  %v4685_v42 = vmax.f32 %v4621_v61, 0.0  ;;  %6783 = vmatprep.subr.bf16.mxu0 %v7573_v0 }
 0x768   : > { %v4686_v1 = vmax.f32 %v4622_v7, 0.0  ;;  %6784 = vmatpush3.bf16.msra.mxu0 %v7574_v17 }
 0x769   : > { %v4687_v2 = vmax.f32 %v4623_v28, 0.0  ;;  %6785 = vmatprep.subr.bf16.mxu0 %v7575_v41 }
 0x76a   : > { %v4724_v5 = vpack.c.bf16 %v4686_v1, %v4684_v63  ;;  %v7577_v63 = vld [vmem:[#allocation20 + $0x50] sm:$0xff]  }
 0x76b   : > { %v4725_v9 = vpack.c.bf16 %v4687_v2, %v4685_v42  ;;  %v4531_v10 = vpop.f32.mrb[212].mxu0  ;;  %v7578_v1 = vld [vmem:[#allocation20 + $0x10] sm:$0xff]   ;;  %v7579_v42 = vld [vmem:[#allocation20 + $0x58] sm:$0xff]  }
 0x76c   : > { %v4624_v60 = vadd.f32 %v9265_v53, %v4531_v10  ;;  %v4533_v27 = vpop.f32.mrb[213].mxu0  ;;  %6786 = vmatpush3.bf16.msra.mxu0 %v7576_v59 }
 0x76d   : > { %v4625_v14 = vadd.f32 %v9268_v8, %v4533_v27  ;;  %v4535_v35 = vpop.f32.mrb[214].mxu0  ;;  %5088 = vmatprep.mubr.bf16.mxu1 %v4725_v9  ;;  %6787 = vmatprep.subr.bf16.mxu0 %v7577_v63  ;;  %v7580_v27 = vld [vmem:[#allocation20 + $0x18] sm:$0xff]  }
 0x76e   : > { %v4626_v15 = vadd.f32 %v9265_v53, %v4535_v35  ;;  %v4537_v24 = vpop.f32.mrb[215].mxu0  ;;  %5089 = vmatmul.mubr.bf16.gmra.mrb[16].mxu1 %v4724_v5  ;;  %v4688_v32 = vmax.f32 %v4624_v60, 0.0  ;;  %v7581_v35 = vld [vmem:[#allocation20 + $0x60] sm:$0xff]  }
 0x76f   : > { %v4627_v30 = vadd.f32 %v9268_v8, %v4537_v24  ;;  %v4689_v21 = vmax.f32 %v4625_v14, 0.0 }
 0x770   : > { %v4690_v29 = vmax.f32 %v4626_v15, 0.0  ;;  %6788 = vmatpush3.bf16.msra.mxu0 %v7578_v1 }
 0x771   : > { %v4691_v23 = vmax.f32 %v4627_v30, 0.0  ;;  %6789 = vmatprep.subr.bf16.mxu0 %v7579_v42 }
 0x772   : > { %v4726_v33 = vpack.c.bf16 %v4690_v29, %v4688_v32 }
 0x773   : > { %v4727_v54 = vpack.c.bf16 %v4691_v23, %v4689_v21  ;;  %v4541_v56 = vpop.f32.mrb[216].mxu0  ;;  %v7582_v23 = vld [vmem:[#allocation20 + $0x20] sm:$0xff]  }
 0x774   : > { %v4628_v34 = vadd.f32 %v9265_v53, %v4541_v56  ;;  %v4543_v37 = vpop.f32.mrb[217].mxu0  ;;  %6790 = vmatpush3.bf16.msra.mxu0 %v7580_v27  ;;  %v7583_v56 = vld [vmem:[#allocation20 + $0x68] sm:$0xff]  }
 0x775   : > { %v4629_v36 = vadd.f32 %v9268_v8, %v4543_v37  ;;  %v4545_v18 = vpop.f32.mrb[218].mxu0  ;;  %5098 = vmatprep.mubr.bf16.mxu1 %v4727_v54  ;;  %6791 = vmatprep.subr.bf16.mxu0 %v7581_v35 }
 0x776   : > { %v4630_v38 = vadd.f32 %v9265_v53, %v4545_v18  ;;  %v4547_v16 = vpop.f32.mrb[219].mxu0  ;;  %5099 = vmatmul.mubr.bf16.gmra.mrb[20].mxu1 %v4726_v33  ;;  %v4692_v39 = vmax.f32 %v4628_v34, 0.0 }
 0x777   : > { %v4631_v25 = vadd.f32 %v9268_v8, %v4547_v16  ;;  %v4693_v20 = vmax.f32 %v4629_v36, 0.0  ;;  %v7584_v16 = vld [vmem:[#allocation20 + $0x28] sm:$0xff]  }
 0x778   : > { %v4694_v45 = vmax.f32 %v4630_v38, 0.0  ;;  %6792 = vmatpush3.bf16.msra.mxu0 %v7582_v23 }
 0x779   : > { %v4695_v26 = vmax.f32 %v4631_v25, 0.0  ;;  %6793 = vmatprep.subr.bf16.mxu0 %v7583_v56 }
 0x77a   : > { %v4728_v57 = vpack.c.bf16 %v4694_v45, %v4692_v39  ;;  %v7585_v39 = vld [vmem:[#allocation20 + $0x70] sm:$0xff]  }
 0x77b   : > { %v4729_v12 = vpack.c.bf16 %v4695_v26, %v4693_v20  ;;  %v4551_v13 = vpop.f32.mrb[220].mxu0 }
 0x77c   : > { %v4632_v40 = vadd.f32 %v9265_v53, %v4551_v13  ;;  %v4553_v43 = vpop.f32.mrb[221].mxu0  ;;  %6794 = vmatpush3.bf16.msra.mxu0 %v7584_v16 }
 0x77d   : > { %v4633_v44 = vadd.f32 %v9268_v8, %v4553_v43  ;;  %v4555_v46 = vpop.f32.mrb[222].mxu0  ;;  %5108 = vmatprep.mubr.bf16.mxu1 %v4729_v12  ;;  %6795 = vmatprep.subr.bf16.mxu0 %v7585_v39 }
 0x77e   : > { %v4634_v47 = vadd.f32 %v9265_v53, %v4555_v46  ;;  %v4557_v48 = vpop.f32.mrb[223].mxu0  ;;  %5109 = vmatmul.mubr.bf16.gmra.mrb[24].mxu1 %v4728_v57  ;;  %v4696_v51 = vmax.f32 %v4632_v40, 0.0  ;;  %v4764_v53 = vld [vmem:[%s9752_s4] sm:$0x3]  ;;  %v7586_v40 = vld [vmem:[#allocation20 + $0x30] sm:$0xff]   ;;  %v7587_v46 = vld [vmem:[#allocation20 + $0x78] sm:$0xff]  }
 0x77f   : > { %v4635_v49 = vadd.f32 %v9268_v8, %v4557_v48  ;;  %v4697_v58 = vmax.f32 %v4633_v44, 0.0  ;;  %v9338_v8 = vrot.slane %v4764_v53, %v8667_v4  ;;  %v9341_v62 = vrot.slane %v4764_v53, %v8673_v6  ;;  %s7933_s4 = sshll.u32 %s8076_s5, 4  ;;  %s7934_s4 = int_to_ptr.vmem [resolvable:$false] %s7933_s4 }
 0x780   : > { %v4698_v52 = vmax.f32 %v4634_v47, 0.0  ;;  %6796 = vmatpush3.bf16.msra.mxu0 %v7586_v40  ;;  %s7935_s27 = scalar_lea.vmem %s7934_s4, 8192  ;;  %p7936_p12 = scmp.lt.s32.totalorder %s9494_s7, %s7934_s4 }
 0x781   : > { %v4699_v11 = vmax.f32 %v4635_v49, 0.0  ;;  %6797 = vmatprep.subr.bf16.mxu0 %v7587_v46  ;;  %p7937_p1 = scmp.lt.s32.totalorder %s7935_s27, %s7929_s18 }
 0x782   : > { %v4730_v31 = vpack.c.bf16 %v4698_v52, %v4696_v51 }
 0x783   : > { %v4731_v50 = vpack.c.bf16 %v4699_v11, %v4697_v58  ;;  %v7588_v58 = vld [vmem:[#allocation20 + $0x38] sm:$0xff]   ;;  %p7938_p13 = por %p7937_p1, %p7936_p12 }
 0x784   : > { %6798 = vmatpush3.bf16.msra.mxu0 %v7588_v58 }
 0x785   : > { %5118 = vmatprep.mubr.bf16.mxu1 %v4731_v50  ;;  %p7939_p0 = pnand %p7938_p13, %p7932_p3 }
 0x786   : > { %5119 = vmatmul.mubr.bf16.gmra.mrb[28].mxu1 %v4730_v31 }
 0x7e1   : > { %v4970_v61 = vpop.f32.mrb[224].mxu1 }
 0x7e2   : > { %v4971_v19 = vadd.f32 %v4970_v61, %v9338_v8  ;;  %v4972_v7 = vpop.f32.mrb[225].mxu1 }
 0x7e3   : > { %v4973_v22 = vadd.f32 %v4972_v7, %v9341_v62  ;;  %v4974_v3 = vpop.f32.mrb[226].mxu1 }
 0x7e4   : > { %v4975_v28 = vadd.f32 %v4974_v3, %v9338_v8  ;;  %v4976_v55 = vpop.f32.mrb[227].mxu1  ;;  %v5129_v5 = vmax.f32 %v4971_v19, 0.0 }
 0x7e5   : > { %v4977_v2 = vadd.f32 %v4976_v55, %v9341_v62  ;;  %v5130_v10 = vmax.f32 %v4973_v22, 0.0 }
 0x7e6   : > { %v5131_v9 = vmax.f32 %v4975_v28, 0.0 }
 0x7e7   : > { %v5132_v60 = vmax.f32 %v4977_v2, 0.0 }
 0x7e8   : > { %v5193_v14 = vpack.c.bf16 %v5131_v9, %v5129_v5 }
 0x7e9   : > { %v5194_v15 = vpack.c.bf16 %v5132_v60, %v5130_v10  ;;  %v4980_v24 = vpop.f32.mrb[228].mxu1 }
 0x7ea   : > { %v4981_v30 = vadd.f32 %v4980_v24, %v9338_v8  ;;  %v4982_v32 = vpop.f32.mrb[229].mxu1 }
 0x7eb   : > { %v4983_v29 = vadd.f32 %v4982_v32, %v9341_v62  ;;  %v4984_v21 = vpop.f32.mrb[230].mxu1  ;;  %5461 = vmatprep.mubr.bf16.mxu1 %v5194_v15 }
 0x7ec   : > { %v4985_v33 = vadd.f32 %v4984_v21, %v9338_v8  ;;  %v4986_v54 = vpop.f32.mrb[231].mxu1  ;;  %5462 = vmatmul.mubr.bf16.vlgmr.msra.gmra.mrb[32].mxu1 %v5193_v14  ;;  %v5133_v37 = vmax.f32 %v4981_v30, 0.0 }
 0x7ed   : > { %v4987_v34 = vadd.f32 %v4986_v54, %v9341_v62  ;;  %v5134_v18 = vmax.f32 %v4983_v29, 0.0 }
 0x7ee   : > { %v5135_v36 = vmax.f32 %v4985_v33, 0.0 }
 0x7ef   : > { %v5136_v38 = vmax.f32 %v4987_v34, 0.0 }
 0x7f0   : > { %v5195_v25 = vpack.c.bf16 %v5135_v36, %v5133_v37 }
 0x7f1   : > { %v5196_v45 = vpack.c.bf16 %v5136_v38, %v5134_v18  ;;  %v4990_v20 = vpop.f32.mrb[232].mxu1 }
 0x7f2   : > { %v4991_v26 = vadd.f32 %v4990_v20, %v9338_v8  ;;  %v4992_v57 = vpop.f32.mrb[233].mxu1 }
 0x7f3   : > { %v4993_v12 = vadd.f32 %v4992_v57, %v9341_v62  ;;  %v4994_v13 = vpop.f32.mrb[234].mxu1  ;;  %5471 = vmatprep.mubr.bf16.mxu1 %v5196_v45 }
 0x7f4   : > { %v4995_v43 = vadd.f32 %v4994_v13, %v9338_v8  ;;  %v4996_v44 = vpop.f32.mrb[235].mxu1  ;;  %5472 = vmatmul.mubr.bf16.gmra.mrb[36].mxu1 %v5195_v25  ;;  %v5137_v48 = vmax.f32 %v4991_v26, 0.0 }
 0x7f5   : > { %v4997_v47 = vadd.f32 %v4996_v44, %v9341_v62  ;;  %v5138_v51 = vmax.f32 %v4993_v12, 0.0 }
 0x7f6   : > { %v5139_v49 = vmax.f32 %v4995_v43, 0.0 }
 0x7f7   : > { %v5140_v52 = vmax.f32 %v4997_v47, 0.0 }
 0x7f8   : > { %v5197_v11 = vpack.c.bf16 %v5139_v49, %v5137_v48 }
 0x7f9   : > { %v5198_v31 = vpack.c.bf16 %v5140_v52, %v5138_v51  ;;  %v5000_v50 = vpop.f32.mrb[236].mxu1 }
 0x7fa   : > { %v5001_v0 = vadd.f32 %v5000_v50, %v9338_v8  ;;  %v5002_v17 = vpop.f32.mrb[237].mxu1 }
 0x7fb   : > { %v5003_v53 = vadd.f32 %v5002_v17, %v9341_v62  ;;  %v5004_v41 = vpop.f32.mrb[238].mxu1  ;;  %5481 = vmatprep.mubr.bf16.mxu1 %v5198_v31 }
 0x7fc   : > { %v5005_v59 = vadd.f32 %v5004_v41, %v9338_v8  ;;  %v5006_v61 = vpop.f32.mrb[239].mxu1  ;;  %5482 = vmatmul.mubr.bf16.gmra.mrb[40].mxu1 %v5197_v11  ;;  %v5141_v7 = vmax.f32 %v5001_v0, 0.0 }
 0x7fd   : > { %v5007_v19 = vadd.f32 %v5006_v61, %v9341_v62  ;;  %v5142_v3 = vmax.f32 %v5003_v53, 0.0 }
 0x7fe   : > { %v5143_v22 = vmax.f32 %v5005_v59, 0.0 }
 0x7ff   : > { %v5144_v28 = vmax.f32 %v5007_v19, 0.0 }
 0x800   : > { %v5199_v55 = vpack.c.bf16 %v5143_v22, %v5141_v7 }
 0x801   : > { %v5200_v63 = vpack.c.bf16 %v5144_v28, %v5142_v3  ;;  %v5010_v1 = vpop.f32.mrb[240].mxu1 }
 0x802   : > { %v5011_v42 = vadd.f32 %v5010_v1, %v9338_v8  ;;  %v5012_v2 = vpop.f32.mrb[241].mxu1 }
 0x803   : > { %v5013_v5 = vadd.f32 %v5012_v2, %v9341_v62  ;;  %v5014_v9 = vpop.f32.mrb[242].mxu1  ;;  %5491 = vmatprep.mubr.bf16.mxu1 %v5200_v63 }
 0x804   : > { %v5015_v10 = vadd.f32 %v5014_v9, %v9338_v8  ;;  %v5016_v60 = vpop.f32.mrb[243].mxu1  ;;  %5492 = vmatmul.mubr.bf16.gmra.mrb[44].mxu1 %v5199_v55  ;;  %v5145_v14 = vmax.f32 %v5011_v42, 0.0 }
 0x805   : > { %v5017_v27 = vadd.f32 %v5016_v60, %v9341_v62  ;;  %v5146_v15 = vmax.f32 %v5013_v5, 0.0 }
 0x806   : > { %v5147_v35 = vmax.f32 %v5015_v10, 0.0 }
 0x807   : > { %v5148_v24 = vmax.f32 %v5017_v27, 0.0 }
 0x808   : > { %v5201_v30 = vpack.c.bf16 %v5147_v35, %v5145_v14 }
 0x809   : > { %v5202_v32 = vpack.c.bf16 %v5148_v24, %v5146_v15  ;;  %v5020_v29 = vpop.f32.mrb[244].mxu1 }
 0x80a   : > { %v5021_v21 = vadd.f32 %v5020_v29, %v9338_v8  ;;  %v5022_v23 = vpop.f32.mrb[245].mxu1 }
 0x80b   : > { %v5023_v33 = vadd.f32 %v5022_v23, %v9341_v62  ;;  %v5024_v54 = vpop.f32.mrb[246].mxu1  ;;  %5501 = vmatprep.mubr.bf16.mxu1 %v5202_v32 }
 0x80c   : > { %v5025_v56 = vadd.f32 %v5024_v54, %v9338_v8  ;;  %v5026_v34 = vpop.f32.mrb[247].mxu1  ;;  %5502 = vmatmul.mubr.bf16.gmra.mrb[48].mxu1 %v5201_v30  ;;  %v5149_v36 = vmax.f32 %v5021_v21, 0.0 }
 0x80d   : > { %v5027_v37 = vadd.f32 %v5026_v34, %v9341_v62  ;;  %v5150_v38 = vmax.f32 %v5023_v33, 0.0 }
 0x80e   : > { %v5151_v18 = vmax.f32 %v5025_v56, 0.0 }
 0x80f   : > { %v5152_v16 = vmax.f32 %v5027_v37, 0.0 }
 0x810   : > { %v5203_v25 = vpack.c.bf16 %v5151_v18, %v5149_v36 }
 0x811   : > { %v5204_v39 = vpack.c.bf16 %v5152_v16, %v5150_v38  ;;  %v5030_v45 = vpop.f32.mrb[248].mxu1 }
 0x812   : > { %v5031_v20 = vadd.f32 %v5030_v45, %v9338_v8  ;;  %v5032_v26 = vpop.f32.mrb[249].mxu1 }
 0x813   : > { %v5033_v57 = vadd.f32 %v5032_v26, %v9341_v62  ;;  %v5034_v12 = vpop.f32.mrb[250].mxu1  ;;  %5511 = vmatprep.mubr.bf16.mxu1 %v5204_v39 }
 0x814   : > { %v5035_v13 = vadd.f32 %v5034_v12, %v9338_v8  ;;  %v5036_v40 = vpop.f32.mrb[251].mxu1  ;;  %5512 = vmatmul.mubr.bf16.gmra.mrb[52].mxu1 %v5203_v25  ;;  %v5153_v44 = vmax.f32 %v5031_v20, 0.0 }
 0x815   : > { %v5037_v43 = vadd.f32 %v5036_v40, %v9341_v62  ;;  %v5154_v47 = vmax.f32 %v5033_v57, 0.0 }
 0x816   : > { %v5155_v46 = vmax.f32 %v5035_v13, 0.0 }
 0x817   : > { %v5156_v48 = vmax.f32 %v5037_v43, 0.0 }
 0x818   : > { %v5205_v49 = vpack.c.bf16 %v5155_v46, %v5153_v44 }
 0x819   : > { %v5206_v51 = vpack.c.bf16 %v5156_v48, %v5154_v47  ;;  %v5040_v52 = vpop.f32.mrb[252].mxu1 }
 0x81a   : > { %v5041_v58 = vadd.f32 %v5040_v52, %v9338_v8  ;;  %v5042_v11 = vpop.f32.mrb[253].mxu1 }
 0x81b   : > { %v5043_v31 = vadd.f32 %v5042_v11, %v9341_v62  ;;  %v5044_v50 = vpop.f32.mrb[254].mxu1  ;;  %5521 = vmatprep.mubr.bf16.mxu1 %v5206_v51 }
 0x81c   : > { %v5045_v0 = vadd.f32 %v5044_v50, %v9338_v8  ;;  %v5046_v17 = vpop.f32.mrb[255].mxu1  ;;  %5522 = vmatmul.mubr.bf16.gmra.mrb[56].mxu1 %v5205_v49  ;;  %v5157_v41 = vmax.f32 %v5041_v58, 0.0 }
 0x81d   : > { %v5047_v53 = vadd.f32 %v5046_v17, %v9341_v62  ;;  %v5158_v61 = vmax.f32 %v5043_v31, 0.0 }
 0x81e   : > { %v5159_v59 = vmax.f32 %v5045_v0, 0.0 }
 0x81f   : > { %v5160_v19 = vmax.f32 %v5047_v53, 0.0 }
 0x820   : > { %v5207_v7 = vpack.c.bf16 %v5159_v59, %v5157_v41 }
 0x821   : > { %v5208_v22 = vpack.c.bf16 %v5160_v19, %v5158_v61  ;;  %v5050_v3 = vpop.f32.mrb[0].mxu1 }
 0x822   : > { %v5051_v28 = vadd.f32 %v5050_v3, %v9338_v8  ;;  %v5052_v55 = vpop.f32.mrb[1].mxu1 }
 0x823   : > { %v5053_v63 = vadd.f32 %v5052_v55, %v9341_v62  ;;  %v5054_v1 = vpop.f32.mrb[2].mxu1  ;;  %5531 = vmatprep.mubr.bf16.mxu1 %v5208_v22 }
 0x824   : > { %v5055_v42 = vadd.f32 %v5054_v1, %v9338_v8  ;;  %v5056_v2 = vpop.f32.mrb[3].mxu1  ;;  %5532 = vmatmul.mubr.bf16.gmra.mrb[60].mxu1 %v5207_v7  ;;  %v5161_v9 = vmax.f32 %v5051_v28, 0.0 }
 0x825   : > { %v5057_v5 = vadd.f32 %v5056_v2, %v9341_v62  ;;  %v5162_v60 = vmax.f32 %v5053_v63, 0.0 }
 0x826   : > { %v5163_v10 = vmax.f32 %v5055_v42, 0.0 }
 0x827   : > { %v5164_v27 = vmax.f32 %v5057_v5, 0.0 }
 0x828   : > { %v5209_v14 = vpack.c.bf16 %v5163_v10, %v5161_v9 }
 0x829   : > { %v5210_v35 = vpack.c.bf16 %v5164_v27, %v5162_v60  ;;  %v5060_v15 = vpop.f32.mrb[4].mxu1 }
 0x82a   : > { %v5061_v24 = vadd.f32 %v5060_v15, %v9338_v8  ;;  %v5062_v30 = vpop.f32.mrb[5].mxu1 }
 0x82b   : > { %v5063_v32 = vadd.f32 %v5062_v30, %v9341_v62  ;;  %v5064_v29 = vpop.f32.mrb[6].mxu1  ;;  %5541 = vmatprep.mubr.bf16.mxu1 %v5210_v35 }
 0x82c   : > { %v5065_v21 = vadd.f32 %v5064_v29, %v9338_v8  ;;  %v5066_v23 = vpop.f32.mrb[7].mxu1  ;;  %5542 = vmatmul.mubr.bf16.gmra.mrb[64].mxu1 %v5209_v14  ;;  %v5165_v54 = vmax.f32 %v5061_v24, 0.0 }
 0x82d   : > { %v5067_v33 = vadd.f32 %v5066_v23, %v9341_v62  ;;  %v5166_v34 = vmax.f32 %v5063_v32, 0.0 }
 0x82e   : > { %v5167_v56 = vmax.f32 %v5065_v21, 0.0 }
 0x82f   : > { %v5168_v37 = vmax.f32 %v5067_v33, 0.0 }
 0x830   : > { %v5211_v36 = vpack.c.bf16 %v5167_v56, %v5165_v54 }
 0x831   : > { %v5212_v18 = vpack.c.bf16 %v5168_v37, %v5166_v34  ;;  %v5070_v38 = vpop.f32.mrb[8].mxu1 }
 0x832   : > { %v5071_v16 = vadd.f32 %v5070_v38, %v9338_v8  ;;  %v5072_v25 = vpop.f32.mrb[9].mxu1 }
 0x833   : > { %v5073_v39 = vadd.f32 %v5072_v25, %v9341_v62  ;;  %v5074_v45 = vpop.f32.mrb[10].mxu1  ;;  %5551 = vmatprep.mubr.bf16.mxu1 %v5212_v18 }
 0x834   : > { %v5075_v20 = vadd.f32 %v5074_v45, %v9338_v8  ;;  %v5076_v26 = vpop.f32.mrb[11].mxu1  ;;  %5552 = vmatmul.mubr.bf16.gmra.mrb[68].mxu1 %v5211_v36  ;;  %v5169_v12 = vmax.f32 %v5071_v16, 0.0 }
 0x835   : > { %v5077_v57 = vadd.f32 %v5076_v26, %v9341_v62  ;;  %v5170_v40 = vmax.f32 %v5073_v39, 0.0 }
 0x836   : > { %v5171_v13 = vmax.f32 %v5075_v20, 0.0 }
 0x837   : > { %v5172_v43 = vmax.f32 %v5077_v57, 0.0 }
 0x838   : > { %v5213_v44 = vpack.c.bf16 %v5171_v13, %v5169_v12 }
 0x839   : > { %v5214_v46 = vpack.c.bf16 %v5172_v43, %v5170_v40  ;;  %v5080_v47 = vpop.f32.mrb[12].mxu1 }
 0x83a   : > { %v5081_v48 = vadd.f32 %v5080_v47, %v9338_v8  ;;  %v5082_v49 = vpop.f32.mrb[13].mxu1 }
 0x83b   : > { %v5083_v51 = vadd.f32 %v5082_v49, %v9341_v62  ;;  %v5084_v52 = vpop.f32.mrb[14].mxu1  ;;  %5561 = vmatprep.mubr.bf16.mxu1 %v5214_v46 }
 0x83c   : > { %v5085_v58 = vadd.f32 %v5084_v52, %v9338_v8  ;;  %v5086_v11 = vpop.f32.mrb[15].mxu1  ;;  %5562 = vmatmul.mubr.bf16.gmra.mrb[72].mxu1 %v5213_v44  ;;  %v5173_v50 = vmax.f32 %v5081_v48, 0.0 }
 0x83d   : > { %v5087_v31 = vadd.f32 %v5086_v11, %v9341_v62  ;;  %v5174_v17 = vmax.f32 %v5083_v51, 0.0 }
 0x83e   : > { %v5175_v0 = vmax.f32 %v5085_v58, 0.0 }
 0x83f   : > { %v5176_v53 = vmax.f32 %v5087_v31, 0.0 }
 0x840   : > { %v5215_v41 = vpack.c.bf16 %v5175_v0, %v5173_v50 }
 0x841   : > { %v5216_v59 = vpack.c.bf16 %v5176_v53, %v5174_v17  ;;  %v5090_v61 = vpop.f32.mrb[16].mxu1  ;;  %v5257_v17 = vld [vmem:[%s9753_s24] sm:$0x3] }
 0x842   : > { %v5091_v19 = vadd.f32 %v5090_v61, %v9338_v8  ;;  %v5092_v7 = vpop.f32.mrb[17].mxu1  ;;  %v9411_v53 = vrot.slane %v5257_v17, %v8667_v4 }
 0x843   : > { %v5093_v22 = vadd.f32 %v5092_v7, %v9341_v62  ;;  %v5094_v3 = vpop.f32.mrb[18].mxu1  ;;  %5571 = vmatprep.mubr.bf16.mxu1 %v5216_v59 }
 0x844   : > { %v5095_v28 = vadd.f32 %v5094_v3, %v9338_v8  ;;  %v5096_v55 = vpop.f32.mrb[19].mxu1  ;;  %5572 = vmatmul.mubr.bf16.gmra.mrb[76].mxu1 %v5215_v41  ;;  %v5177_v1 = vmax.f32 %v5091_v19, 0.0 }
 0x845   : > { %v5097_v63 = vadd.f32 %v5096_v55, %v9341_v62  ;;  %v5178_v2 = vmax.f32 %v5093_v22, 0.0 }
 0x846   : > { %v5179_v42 = vmax.f32 %v5095_v28, 0.0 }
 0x847   : > { %v5180_v5 = vmax.f32 %v5097_v63, 0.0 }
 0x848   : > { %v5217_v9 = vpack.c.bf16 %v5179_v42, %v5177_v1 }
 0x849   : > { %v5218_v10 = vpack.c.bf16 %v5180_v5, %v5178_v2  ;;  %v5100_v60 = vpop.f32.mrb[20].mxu1 }
 0x84a   : > { %v5101_v27 = vadd.f32 %v5100_v60, %v9338_v8  ;;  %v5102_v14 = vpop.f32.mrb[21].mxu1 }
 0x84b   : > { %v5103_v35 = vadd.f32 %v5102_v14, %v9341_v62  ;;  %v5104_v15 = vpop.f32.mrb[22].mxu1  ;;  %5581 = vmatprep.mubr.bf16.mxu1 %v5218_v10 }
 0x84c   : > { %v5105_v24 = vadd.f32 %v5104_v15, %v9338_v8  ;;  %v5106_v30 = vpop.f32.mrb[23].mxu1  ;;  %5582 = vmatmul.mubr.bf16.gmra.mrb[80].mxu1 %v5217_v9  ;;  %v5181_v29 = vmax.f32 %v5101_v27, 0.0 }
 0x84d   : > { %v5107_v32 = vadd.f32 %v5106_v30, %v9341_v62  ;;  %v5182_v23 = vmax.f32 %v5103_v35, 0.0 }
 0x84e   : > { %v5183_v21 = vmax.f32 %v5105_v24, 0.0 }
 0x84f   : > { %v5184_v33 = vmax.f32 %v5107_v32, 0.0 }
 0x850   : > { %v5219_v54 = vpack.c.bf16 %v5183_v21, %v5181_v29 }
 0x851   : > { %v5220_v56 = vpack.c.bf16 %v5184_v33, %v5182_v23  ;;  %v5110_v34 = vpop.f32.mrb[24].mxu1 }
 0x852   : > { %v5111_v37 = vadd.f32 %v5110_v34, %v9338_v8  ;;  %v5112_v36 = vpop.f32.mrb[25].mxu1 }
 0x853   : > { %v5113_v18 = vadd.f32 %v5112_v36, %v9341_v62  ;;  %v5114_v38 = vpop.f32.mrb[26].mxu1  ;;  %5591 = vmatprep.mubr.bf16.mxu1 %v5220_v56 }
 0x854   : > { %v5115_v16 = vadd.f32 %v5114_v38, %v9338_v8  ;;  %v5116_v25 = vpop.f32.mrb[27].mxu1  ;;  %5592 = vmatmul.mubr.bf16.gmra.mrb[84].mxu1 %v5219_v54  ;;  %v5185_v45 = vmax.f32 %v5111_v37, 0.0 }
 0x855   : > { %v5117_v39 = vadd.f32 %v5116_v25, %v9341_v62  ;;  %v5186_v26 = vmax.f32 %v5113_v18, 0.0 }
 0x856   : > { %v5187_v20 = vmax.f32 %v5115_v16, 0.0 }
 0x857   : > { %v5188_v57 = vmax.f32 %v5117_v39, 0.0 }
 0x858   : > { %v5221_v12 = vpack.c.bf16 %v5187_v20, %v5185_v45 }
 0x859   : > { %v5222_v13 = vpack.c.bf16 %v5188_v57, %v5186_v26  ;;  %v5120_v40 = vpop.f32.mrb[28].mxu1 }
 0x85a   : > { %v5121_v43 = vadd.f32 %v5120_v40, %v9338_v8  ;;  %v5122_v44 = vpop.f32.mrb[29].mxu1 }
 0x85b   : > { %v5123_v46 = vadd.f32 %v5122_v44, %v9341_v62  ;;  %v5124_v47 = vpop.f32.mrb[30].mxu1  ;;  %5601 = vmatprep.mubr.bf16.mxu1 %v5222_v13 }
 0x85c   : > { %v5125_v48 = vadd.f32 %v5124_v47, %v9338_v8  ;;  %v5126_v49 = vpop.f32.mrb[31].mxu1  ;;  %5602 = vmatmul.mubr.bf16.gmra.mrb[88].mxu1 %v5221_v12  ;;  %v5189_v52 = vmax.f32 %v5121_v43, 0.0  ;;  %v9414_v8 = vrot.slane %v5257_v17, %v8673_v6 }
 0x85d   : > { %v5127_v51 = vadd.f32 %v5126_v49, %v9341_v62  ;;  %v5190_v11 = vmax.f32 %v5123_v46, 0.0 }
 0x85e   : > { %v5191_v58 = vmax.f32 %v5125_v48, 0.0 }
 0x85f   : > { %v5192_v31 = vmax.f32 %v5127_v51, 0.0 }
 0x860   : > { %v5223_v50 = vpack.c.bf16 %v5191_v58, %v5189_v52 }
 0x861   : > { %v5224_v0 = vpack.c.bf16 %v5192_v31, %v5190_v11 }
 0x863   : > { %5611 = vmatprep.mubr.bf16.mxu1 %v5224_v0 }
 0x864   : > { %5612 = vmatmul.mubr.bf16.gmra.mrb[92].mxu1 %v5223_v50 }
 0x8bf   : > { %v5463_v41 = vpop.f32.mrb[32].mxu1 }
 0x8c0   : > { %v5464_v62 = vadd.f32 %v5463_v41, %v9411_v53  ;;  %v5465_v59 = vpop.f32.mrb[33].mxu1 }
 0x8c1   : > { %v5466_v61 = vadd.f32 %v5465_v59, %v9414_v8  ;;  %v5467_v19 = vpop.f32.mrb[34].mxu1 }
 0x8c2   : > { %v5468_v7 = vadd.f32 %v5467_v19, %v9411_v53  ;;  %v5469_v22 = vpop.f32.mrb[35].mxu1  ;;  %v5622_v28 = vmax.f32 %v5464_v62, 0.0 }
 0x8c3   : > { %v5470_v3 = vadd.f32 %v5469_v22, %v9414_v8  ;;  %v5623_v63 = vmax.f32 %v5466_v61, 0.0 }
 0x8c4   : > { %v5624_v55 = vmax.f32 %v5468_v7, 0.0 }
 0x8c5   : > { %v5625_v4 = vmax.f32 %v5470_v3, 0.0 }
 0x8c6   : > { %v5686_v1 = vpack.c.bf16 %v5624_v55, %v5622_v28 }
 0x8c7   : > { %v5687_v42 = vpack.c.bf16 %v5625_v4, %v5623_v63  ;;  %v5473_v6 = vpop.f32.mrb[36].mxu1 }
 0x8c8   : > { %v5474_v2 = vadd.f32 %v5473_v6, %v9411_v53  ;;  %v5475_v5 = vpop.f32.mrb[37].mxu1 }
 0x8c9   : > { %v5476_v9 = vadd.f32 %v5475_v5, %v9414_v8  ;;  %v5477_v10 = vpop.f32.mrb[38].mxu1  ;;  %5885 = vmatprep.mubr.bf16.mxu0 %v5687_v42 }
 0x8ca   : > { %v5478_v60 = vadd.f32 %v5477_v10, %v9411_v53  ;;  %v5479_v27 = vpop.f32.mrb[39].mxu1  ;;  %5886 = vmatmul.mubr.bf16.vlgmr.msra.gmra.mrb[224].mxu0 %v5686_v1  ;;  %v5626_v35 = vmax.f32 %v5474_v2, 0.0 }
 0x8cb   : > { %v5480_v14 = vadd.f32 %v5479_v27, %v9414_v8  ;;  %v5627_v24 = vmax.f32 %v5476_v9, 0.0 }
 0x8cc   : > { %v5628_v15 = vmax.f32 %v5478_v60, 0.0 }
 0x8cd   : > { %v5629_v30 = vmax.f32 %v5480_v14, 0.0 }
 0x8ce   : > { %v5688_v32 = vpack.c.bf16 %v5628_v15, %v5626_v35 }
 0x8cf   : > { %v5689_v29 = vpack.c.bf16 %v5629_v30, %v5627_v24  ;;  %v5483_v21 = vpop.f32.mrb[40].mxu1 }
 0x8d0   : > { %v5484_v23 = vadd.f32 %v5483_v21, %v9411_v53  ;;  %v5485_v33 = vpop.f32.mrb[41].mxu1 }
 0x8d1   : > { %v5486_v54 = vadd.f32 %v5485_v33, %v9414_v8  ;;  %v5487_v56 = vpop.f32.mrb[42].mxu1  ;;  %5893 = vmatprep.mubr.bf16.mxu0 %v5689_v29 }
 0x8d2   : > { %v5488_v34 = vadd.f32 %v5487_v56, %v9411_v53  ;;  %v5489_v37 = vpop.f32.mrb[43].mxu1  ;;  %5894 = vmatmul.mubr.bf16.gmra.mrb[228].mxu0 %v5688_v32  ;;  %v5630_v18 = vmax.f32 %v5484_v23, 0.0 }
 0x8d3   : > { %v5490_v36 = vadd.f32 %v5489_v37, %v9414_v8  ;;  %v5631_v16 = vmax.f32 %v5486_v54, 0.0 }
 0x8d4   : > { %v5632_v38 = vmax.f32 %v5488_v34, 0.0 }
 0x8d5   : > { %v5633_v25 = vmax.f32 %v5490_v36, 0.0 }
 0x8d6   : > { %v5690_v39 = vpack.c.bf16 %v5632_v38, %v5630_v18 }
 0x8d7   : > { %v5691_v45 = vpack.c.bf16 %v5633_v25, %v5631_v16  ;;  %v5493_v20 = vpop.f32.mrb[44].mxu1 }
 0x8d8   : > { %v5494_v26 = vadd.f32 %v5493_v20, %v9411_v53  ;;  %v5495_v57 = vpop.f32.mrb[45].mxu1 }
 0x8d9   : > { %v5496_v12 = vadd.f32 %v5495_v57, %v9414_v8  ;;  %v5497_v13 = vpop.f32.mrb[46].mxu1  ;;  %5901 = vmatprep.mubr.bf16.mxu0 %v5691_v45 }
 0x8da   : > { %v5498_v40 = vadd.f32 %v5497_v13, %v9411_v53  ;;  %v5499_v43 = vpop.f32.mrb[47].mxu1  ;;  %5902 = vmatmul.mubr.bf16.gmra.mrb[232].mxu0 %v5690_v39  ;;  %v5634_v46 = vmax.f32 %v5494_v26, 0.0 }
 0x8db   : > { %v5500_v44 = vadd.f32 %v5499_v43, %v9414_v8  ;;  %v5635_v48 = vmax.f32 %v5496_v12, 0.0 }
 0x8dc   : > { %v5636_v47 = vmax.f32 %v5498_v40, 0.0 }
 0x8dd   : > { %v5637_v49 = vmax.f32 %v5500_v44, 0.0 }
 0x8de   : > { %v5692_v51 = vpack.c.bf16 %v5636_v47, %v5634_v46 }
 0x8df   : > { %v5693_v52 = vpack.c.bf16 %v5637_v49, %v5635_v48  ;;  %v5503_v58 = vpop.f32.mrb[48].mxu1 }
 0x8e0   : > { %v5504_v11 = vadd.f32 %v5503_v58, %v9411_v53  ;;  %v5505_v31 = vpop.f32.mrb[49].mxu1 }
 0x8e1   : > { %v5506_v50 = vadd.f32 %v5505_v31, %v9414_v8  ;;  %v5507_v0 = vpop.f32.mrb[50].mxu1  ;;  %5909 = vmatprep.mubr.bf16.mxu0 %v5693_v52 }
 0x8e2   : > { %v5508_v17 = vadd.f32 %v5507_v0, %v9411_v53  ;;  %v5509_v41 = vpop.f32.mrb[51].mxu1  ;;  %5910 = vmatmul.mubr.bf16.gmra.mrb[236].mxu0 %v5692_v51  ;;  %v5638_v59 = vmax.f32 %v5504_v11, 0.0 }
 0x8e3   : > { %v5510_v62 = vadd.f32 %v5509_v41, %v9414_v8  ;;  %v5639_v19 = vmax.f32 %v5506_v50, 0.0 }
 0x8e4   : > { %v5640_v61 = vmax.f32 %v5508_v17, 0.0 }
 0x8e5   : > { %v5641_v7 = vmax.f32 %v5510_v62, 0.0 }
 0x8e6   : > { %v5694_v22 = vpack.c.bf16 %v5640_v61, %v5638_v59 }
 0x8e7   : > { %v5695_v3 = vpack.c.bf16 %v5641_v7, %v5639_v19  ;;  %v5513_v28 = vpop.f32.mrb[52].mxu1 }
 0x8e8   : > { %v5514_v55 = vadd.f32 %v5513_v28, %v9411_v53  ;;  %v5515_v63 = vpop.f32.mrb[53].mxu1 }
 0x8e9   : > { %v5516_v4 = vadd.f32 %v5515_v63, %v9414_v8  ;;  %v5517_v1 = vpop.f32.mrb[54].mxu1  ;;  %5917 = vmatprep.mubr.bf16.mxu0 %v5695_v3 }
 0x8ea   : > { %v5518_v42 = vadd.f32 %v5517_v1, %v9411_v53  ;;  %v5519_v6 = vpop.f32.mrb[55].mxu1  ;;  %5918 = vmatmul.mubr.bf16.gmra.mrb[240].mxu0 %v5694_v22  ;;  %v5642_v5 = vmax.f32 %v5514_v55, 0.0 }
 0x8eb   : > { %v5520_v2 = vadd.f32 %v5519_v6, %v9414_v8  ;;  %v5643_v10 = vmax.f32 %v5516_v4, 0.0 }
 0x8ec   : > { %v5644_v9 = vmax.f32 %v5518_v42, 0.0 }
 0x8ed   : > { %v5645_v60 = vmax.f32 %v5520_v2, 0.0 }
 0x8ee   : > { %v5696_v27 = vpack.c.bf16 %v5644_v9, %v5642_v5 }
 0x8ef   : > { %v5697_v14 = vpack.c.bf16 %v5645_v60, %v5643_v10  ;;  %v5523_v35 = vpop.f32.mrb[56].mxu1 }
 0x8f0   : > { %v5524_v15 = vadd.f32 %v5523_v35, %v9411_v53  ;;  %v5525_v24 = vpop.f32.mrb[57].mxu1 }
 0x8f1   : > { %v5526_v30 = vadd.f32 %v5525_v24, %v9414_v8  ;;  %v5527_v32 = vpop.f32.mrb[58].mxu1  ;;  %5925 = vmatprep.mubr.bf16.mxu0 %v5697_v14 }
 0x8f2   : > { %v5528_v29 = vadd.f32 %v5527_v32, %v9411_v53  ;;  %v5529_v21 = vpop.f32.mrb[59].mxu1  ;;  %5926 = vmatmul.mubr.bf16.gmra.mrb[244].mxu0 %v5696_v27  ;;  %v5646_v33 = vmax.f32 %v5524_v15, 0.0 }
 0x8f3   : > { %v5530_v23 = vadd.f32 %v5529_v21, %v9414_v8  ;;  %v5647_v56 = vmax.f32 %v5526_v30, 0.0 }
 0x8f4   : > { %v5648_v54 = vmax.f32 %v5528_v29, 0.0 }
 0x8f5   : > { %v5649_v34 = vmax.f32 %v5530_v23, 0.0 }
 0x8f6   : > { %v5698_v37 = vpack.c.bf16 %v5648_v54, %v5646_v33 }
 0x8f7   : > { %v5699_v36 = vpack.c.bf16 %v5649_v34, %v5647_v56  ;;  %v5533_v18 = vpop.f32.mrb[60].mxu1 }
 0x8f8   : > { %v5534_v38 = vadd.f32 %v5533_v18, %v9411_v53  ;;  %v5535_v16 = vpop.f32.mrb[61].mxu1 }
 0x8f9   : > { %v5536_v25 = vadd.f32 %v5535_v16, %v9414_v8  ;;  %v5537_v39 = vpop.f32.mrb[62].mxu1  ;;  %5933 = vmatprep.mubr.bf16.mxu0 %v5699_v36 }
 0x8fa   : > { %v5538_v45 = vadd.f32 %v5537_v39, %v9411_v53  ;;  %v5539_v20 = vpop.f32.mrb[63].mxu1  ;;  %5934 = vmatmul.mubr.bf16.gmra.mrb[248].mxu0 %v5698_v37  ;;  %v5650_v57 = vmax.f32 %v5534_v38, 0.0 }
 0x8fb   : > { %v5540_v26 = vadd.f32 %v5539_v20, %v9414_v8  ;;  %v5651_v13 = vmax.f32 %v5536_v25, 0.0 }
 0x8fc   : > { %v5652_v12 = vmax.f32 %v5538_v45, 0.0 }
 0x8fd   : > { %v5653_v40 = vmax.f32 %v5540_v26, 0.0 }
 0x8fe   : > { %v5700_v43 = vpack.c.bf16 %v5652_v12, %v5650_v57 }
 0x8ff   : > { %v5701_v44 = vpack.c.bf16 %v5653_v40, %v5651_v13  ;;  %v5543_v46 = vpop.f32.mrb[64].mxu1 }
 0x900   : > { %v5544_v47 = vadd.f32 %v5543_v46, %v9411_v53  ;;  %v5545_v48 = vpop.f32.mrb[65].mxu1 }
 0x901   : > { %v5546_v49 = vadd.f32 %v5545_v48, %v9414_v8  ;;  %v5547_v51 = vpop.f32.mrb[66].mxu1  ;;  %5941 = vmatprep.mubr.bf16.mxu0 %v5701_v44 }
 0x902   : > { %v5548_v52 = vadd.f32 %v5547_v51, %v9411_v53  ;;  %v5549_v58 = vpop.f32.mrb[67].mxu1  ;;  %5942 = vmatmul.mubr.bf16.gmra.mrb[252].mxu0 %v5700_v43  ;;  %v5654_v31 = vmax.f32 %v5544_v47, 0.0 }
 0x903   : > { %v5550_v11 = vadd.f32 %v5549_v58, %v9414_v8  ;;  %v5655_v0 = vmax.f32 %v5546_v49, 0.0 }
 0x904   : > { %v5656_v50 = vmax.f32 %v5548_v52, 0.0 }
 0x905   : > { %v5657_v17 = vmax.f32 %v5550_v11, 0.0 }
 0x906   : > { %v5702_v41 = vpack.c.bf16 %v5656_v50, %v5654_v31 }
 0x907   : > { %v5703_v62 = vpack.c.bf16 %v5657_v17, %v5655_v0  ;;  %v5553_v59 = vpop.f32.mrb[68].mxu1 }
 0x908   : > { %v5554_v61 = vadd.f32 %v5553_v59, %v9411_v53  ;;  %v5555_v19 = vpop.f32.mrb[69].mxu1 }
 0x909   : > { %v5556_v7 = vadd.f32 %v5555_v19, %v9414_v8  ;;  %v5557_v22 = vpop.f32.mrb[70].mxu1  ;;  %5949 = vmatprep.mubr.bf16.mxu0 %v5703_v62 }
 0x90a   : > { %v5558_v3 = vadd.f32 %v5557_v22, %v9411_v53  ;;  %v5559_v28 = vpop.f32.mrb[71].mxu1  ;;  %5950 = vmatmul.mubr.bf16.gmra.mrb[0].mxu0 %v5702_v41  ;;  %v5658_v63 = vmax.f32 %v5554_v61, 0.0 }
 0x90b   : > { %v5560_v55 = vadd.f32 %v5559_v28, %v9414_v8  ;;  %v5659_v1 = vmax.f32 %v5556_v7, 0.0 }
 0x90c   : > { %v5660_v4 = vmax.f32 %v5558_v3, 0.0 }
 0x90d   : > { %v5661_v42 = vmax.f32 %v5560_v55, 0.0 }
 0x90e   : > { %v5704_v6 = vpack.c.bf16 %v5660_v4, %v5658_v63 }
 0x90f   : > { %v5705_v2 = vpack.c.bf16 %v5661_v42, %v5659_v1  ;;  %v5563_v5 = vpop.f32.mrb[72].mxu1 }
 0x910   : > { %v5564_v9 = vadd.f32 %v5563_v5, %v9411_v53  ;;  %v5565_v10 = vpop.f32.mrb[73].mxu1 }
 0x911   : > { %v5566_v60 = vadd.f32 %v5565_v10, %v9414_v8  ;;  %v5567_v27 = vpop.f32.mrb[74].mxu1  ;;  %5957 = vmatprep.mubr.bf16.mxu0 %v5705_v2 }
 0x912   : > { %v5568_v14 = vadd.f32 %v5567_v27, %v9411_v53  ;;  %v5569_v35 = vpop.f32.mrb[75].mxu1  ;;  %5958 = vmatmul.mubr.bf16.gmra.mrb[4].mxu0 %v5704_v6  ;;  %v5662_v24 = vmax.f32 %v5564_v9, 0.0 }
 0x913   : > { %v5570_v15 = vadd.f32 %v5569_v35, %v9414_v8  ;;  %v5663_v32 = vmax.f32 %v5566_v60, 0.0 }
 0x914   : > { %v5664_v30 = vmax.f32 %v5568_v14, 0.0 }
 0x915   : > { %v5665_v29 = vmax.f32 %v5570_v15, 0.0 }
 0x916   : > { %v5706_v21 = vpack.c.bf16 %v5664_v30, %v5662_v24 }
 0x917   : > { %v5707_v23 = vpack.c.bf16 %v5665_v29, %v5663_v32  ;;  %v5573_v33 = vpop.f32.mrb[76].mxu1 }
 0x918   : > { %v5574_v54 = vadd.f32 %v5573_v33, %v9411_v53  ;;  %v5575_v56 = vpop.f32.mrb[77].mxu1 }
 0x919   : > { %v5576_v34 = vadd.f32 %v5575_v56, %v9414_v8  ;;  %v5577_v37 = vpop.f32.mrb[78].mxu1  ;;  %5965 = vmatprep.mubr.bf16.mxu0 %v5707_v23 }
 0x91a   : > { %v5578_v36 = vadd.f32 %v5577_v37, %v9411_v53  ;;  %v5579_v18 = vpop.f32.mrb[79].mxu1  ;;  %5966 = vmatmul.mubr.bf16.gmra.mrb[8].mxu0 %v5706_v21  ;;  %v5666_v16 = vmax.f32 %v5574_v54, 0.0 }
 0x91b   : > { %v5580_v38 = vadd.f32 %v5579_v18, %v9414_v8  ;;  %v5667_v39 = vmax.f32 %v5576_v34, 0.0 }
 0x91c   : > { %v5668_v25 = vmax.f32 %v5578_v36, 0.0 }
 0x91d   : > { %v5669_v45 = vmax.f32 %v5580_v38, 0.0 }
 0x91e   : > { %v5708_v20 = vpack.c.bf16 %v5668_v25, %v5666_v16 }
 0x91f   : > { %v5709_v26 = vpack.c.bf16 %v5669_v45, %v5667_v39  ;;  %v5583_v57 = vpop.f32.mrb[80].mxu1 }
 0x920   : > { %v5584_v12 = vadd.f32 %v5583_v57, %v9411_v53  ;;  %v5585_v13 = vpop.f32.mrb[81].mxu1 }
 0x921   : > { %v5586_v40 = vadd.f32 %v5585_v13, %v9414_v8  ;;  %v5587_v43 = vpop.f32.mrb[82].mxu1  ;;  %5973 = vmatprep.mubr.bf16.mxu0 %v5709_v26 }
 0x922   : > { %v5588_v44 = vadd.f32 %v5587_v43, %v9411_v53  ;;  %v5589_v46 = vpop.f32.mrb[83].mxu1  ;;  %5974 = vmatmul.mubr.bf16.gmra.mrb[12].mxu0 %v5708_v20  ;;  %v5670_v48 = vmax.f32 %v5584_v12, 0.0 }
 0x923   : > { %v5590_v47 = vadd.f32 %v5589_v46, %v9414_v8  ;;  %v5671_v51 = vmax.f32 %v5586_v40, 0.0 }
 0x924   : > { %v5672_v49 = vmax.f32 %v5588_v44, 0.0 }
 0x925   : > { %v5673_v52 = vmax.f32 %v5590_v47, 0.0 }
 0x926   : > { %v5710_v58 = vpack.c.bf16 %v5672_v49, %v5670_v48 }
 0x927   : > { %v5711_v11 = vpack.c.bf16 %v5673_v52, %v5671_v51  ;;  %v5593_v31 = vpop.f32.mrb[84].mxu1 }
 0x928   : > { %v5594_v50 = vadd.f32 %v5593_v31, %v9411_v53  ;;  %v5595_v0 = vpop.f32.mrb[85].mxu1 }
 0x929   : > { %v5596_v17 = vadd.f32 %v5595_v0, %v9414_v8  ;;  %v5597_v41 = vpop.f32.mrb[86].mxu1  ;;  %5981 = vmatprep.mubr.bf16.mxu0 %v5711_v11 }
 0x92a   : > { %v5598_v62 = vadd.f32 %v5597_v41, %v9411_v53  ;;  %v5599_v59 = vpop.f32.mrb[87].mxu1  ;;  %5982 = vmatmul.mubr.bf16.gmra.mrb[16].mxu0 %v5710_v58  ;;  %v5674_v19 = vmax.f32 %v5594_v50, 0.0 }
 0x92b   : > { %v5600_v61 = vadd.f32 %v5599_v59, %v9414_v8  ;;  %v5675_v22 = vmax.f32 %v5596_v17, 0.0 }
 0x92c   : > { %v5676_v7 = vmax.f32 %v5598_v62, 0.0 }
 0x92d   : > { %v5677_v3 = vmax.f32 %v5600_v61, 0.0 }
 0x92e   : > { %v5712_v28 = vpack.c.bf16 %v5676_v7, %v5674_v19 }
 0x92f   : > { %v5713_v55 = vpack.c.bf16 %v5677_v3, %v5675_v22  ;;  %v5603_v63 = vpop.f32.mrb[88].mxu1 }
 0x930   : > { %v5604_v4 = vadd.f32 %v5603_v63, %v9411_v53  ;;  %v5605_v1 = vpop.f32.mrb[89].mxu1 }
 0x931   : > { %v5606_v42 = vadd.f32 %v5605_v1, %v9414_v8  ;;  %v5607_v6 = vpop.f32.mrb[90].mxu1  ;;  %5989 = vmatprep.mubr.bf16.mxu0 %v5713_v55 }
 0x932   : > { %v5608_v2 = vadd.f32 %v5607_v6, %v9411_v53  ;;  %v5609_v5 = vpop.f32.mrb[91].mxu1  ;;  %5990 = vmatmul.mubr.bf16.gmra.mrb[20].mxu0 %v5712_v28  ;;  %v5678_v10 = vmax.f32 %v5604_v4, 0.0 }
 0x933   : > { %v5610_v9 = vadd.f32 %v5609_v5, %v9414_v8  ;;  %v5679_v27 = vmax.f32 %v5606_v42, 0.0 }
 0x934   : > { %v5680_v60 = vmax.f32 %v5608_v2, 0.0 }
 0x935   : > { %v5681_v14 = vmax.f32 %v5610_v9, 0.0 }
 0x936   : > { %v5714_v35 = vpack.c.bf16 %v5680_v60, %v5678_v10 }
 0x937   : > { %v5715_v15 = vpack.c.bf16 %v5681_v14, %v5679_v27  ;;  %v5613_v24 = vpop.f32.mrb[92].mxu1 }
 0x938   : > { %v5614_v30 = vadd.f32 %v5613_v24, %v9411_v53  ;;  %v5615_v32 = vpop.f32.mrb[93].mxu1 }
 0x939   : > { %v5616_v29 = vadd.f32 %v5615_v32, %v9414_v8  ;;  %v5617_v21 = vpop.f32.mrb[94].mxu1  ;;  %5997 = vmatprep.mubr.bf16.mxu0 %v5715_v15 }
 0x93a   : > { %v5618_v23 = vadd.f32 %v5617_v21, %v9411_v53  ;;  %v5619_v33 = vpop.f32.mrb[95].mxu1  ;;  %5998 = vmatmul.mubr.bf16.gmra.mrb[24].mxu0 %v5714_v35  ;;  %v5682_v56 = vmax.f32 %v5614_v30, 0.0  ;;  %v9492_v53 = vld [vmem:[%s9755_s0] ss:$0 sm:$0xff] }
 0x93b   : > { %v5620_v54 = vadd.f32 %v5619_v33, %v9414_v8  ;;  %v5683_v37 = vmax.f32 %v5616_v29, 0.0 }
 0x93c   : > { %v5684_v34 = vmax.f32 %v5618_v23, 0.0 }
 0x93d   : > { %v5685_v36 = vmax.f32 %v5620_v54, 0.0 }
 0x93e   : > { %v5716_v18 = vpack.c.bf16 %v5684_v34, %v5682_v56 }
 0x93f   : > { %v5717_v38 = vpack.c.bf16 %v5685_v36, %v5683_v37 }
 0x941   : > { %6005 = vmatprep.mubr.bf16.mxu0 %v5717_v38 }
 0x942   : > { %6006 = vmatmul.mubr.bf16.gmra.mrb[28].mxu0 %v5716_v18 }
 0x99d   : > { %v6799_v16 = vpop.f32.mrb[224].mxu0 }
 0x99e   : > { %v6800_v8 = vpop.f32.mrb[225].mxu0 }
 0x99f   : > { %v6801_v25 = vadd.f32 %v6800_v8, %v6799_v16  ;;  %v6802_v39 = vpop.f32.mrb[226].mxu0 }
 0x9a0   : > { %v6803_v45 = vpop.f32.mrb[227].mxu0 }
 0x9a1   : > { %7942 = shalt.err (!%p7939_p0)
}
 0x9a2   : > { %s7943_s15 = scalar_lea.hbm %s9487_s13, 4096  ;;  %s7947_s22 = scalar_lea.hbm %s9754_s16, 16384 }
 0x9a3   : > { %p7944_p5 = scmp.ne.s32.totalorder %s9487_s13, %s7943_s15  ;;  %p7948_p10 = scmp.lt.u32.totalorder %s9487_s13, %s9754_s16 }
 0x9a4   : > { %p7949_p4 = scmp.lt.u32.totalorder %s7947_s22, %s7943_s15  ;;  %p7951_p8 = scmp.lt.u32.totalorder %s7943_s15, %s9487_s13 }
 0x9a5   : > { %p7945_p2 = pnand %p7944_p5, %p9756_p7 }
 0x9a6   : > { %p7950_p6 = por %p7949_p4, %p7948_p10 }
 0x9a7   : > { %p7946_p9 = pneg %p7945_p2 }
 0x9a8   : > { %p7952_p11 = por %p7951_p8, %p7950_p6 }
 0x9aa   : > { %p7953_p3 = pnand %p7952_p11, %p7946_p9 }
 0x9ac   : > { %7956 = shalt.err (!%p7953_p3)
}
 0x9ad   : > { %s8077_s0 = smov 128   ;;  %s8078_s18 = smov 8   ;;  %v5888_v20 = vadd.f32 %v6801_v25, %v9492_v53  ;;  %v6804_v26 = vadd.f32 %v6803_v45, %v6802_v39  ;;  %v6805_v12 = vpop.f32.mrb[228].mxu0 }
 0x9ae   : > { %7019 = dma.vmem_to_hbm [thread:$0]  (%p9756_p7), %s9494_s7, 4096, %s9487_s13, %s6047_s12, %s8077_s0, %s8077_s0, %s8078_s18   ;;  %v6806_v13 = vpop.f32.mrb[229].mxu0 }
 0x9af   : > { %s9526_s5 = scalar_lea.vmem [#allocation23], %s6336_s1  ;;  %v5891_v57 = vadd.f32 %v6804_v26, %v9492_v53  ;;  %v6807_v40 = vadd.f32 %v6806_v13, %v6805_v12  ;;  %v6808_v43 = vpop.f32.mrb[230].mxu0  ;;  %s9757_s12 = sld [smem:[#allocation55_spill]] }
 0x9b0   : > { %6014 = vst [vmem:[%s9526_s5] sm:$0xff] %v5888_v20  ;;  %v6809_v44 = vpop.f32.mrb[231].mxu0  ;;  %s6081_s1 = sshll.u32 %s9526_s5, 4  ;;  %s6052_s27 = scalar_lea.sflag [#allocation24], %s8591_s21  ;;  %s9598_s1 = int_to_ptr.vmem [resolvable:$true] %s6081_s1 }
 0x9b1   : > { %6015 = vst [vmem:[%s9526_s5 + $0x8] sm:$0xff] %v5891_v57  ;;  %v5896_v46 = vadd.f32 %v6807_v40, %v9492_v53  ;;  %v6810_v47 = vadd.f32 %v6809_v44, %v6808_v43  ;;  %v6811_v49 = vpop.f32.mrb[232].mxu0  ;;  %s7957_s15 = scalar_lea.vmem %s9598_s1, 4096  ;;  %s8079_s24 = smov [#allocation23]  }
 0x9b2   : > { %v6812_v51 = vpop.f32.mrb[233].mxu0  ;;  %p7958_p12 = scmp.ne.s32.totalorder %s9598_s1, %s7957_s15  ;;  %s7961_s2 = sshll.u32 %s8079_s24, 4  ;;  %s7962_s2 = int_to_ptr.vmem [resolvable:$false] %s7961_s2 }
 0x9b3   : > { %6016 = vst [vmem:[%s9526_s5 + $0x10] sm:$0xff] %v5896_v46  ;;  %v5899_v48 = vadd.f32 %v6810_v47, %v9492_v53  ;;  %v6813_v52 = vadd.f32 %v6812_v51, %v6811_v49  ;;  %v6814_v58 = vpop.f32.mrb[234].mxu0  ;;  %s7963_s23 = scalar_lea.vmem %s7962_s2, 8192  ;;  %p7964_p0 = scmp.lt.s32.totalorder %s9598_s1, %s7962_s2 }
 0x9b4   : > { %v6815_v11 = vpop.f32.mrb[235].mxu0  ;;  %p7959_p1 = pnand %p7958_p12, %p9756_p7  ;;  %p7965_p5 = scmp.lt.s32.totalorder %s7963_s23, %s7957_s15 }
 0x9b5   : > { %6017 = vst [vmem:[%s9526_s5 + $0x18] sm:$0xff] %v5899_v48  ;;  %v5904_v31 = vadd.f32 %v6813_v52, %v9492_v53  ;;  %v6816_v50 = vadd.f32 %v6815_v11, %v6814_v58  ;;  %v6817_v17 = vpop.f32.mrb[236].mxu0  ;;  %s9596_s4 = scalar_lea.hbm %s9757_s12, %s6669_s11 }
 0x9b6   : > { %v6818_v41 = vpop.f32.mrb[237].mxu0  ;;  %p7960_p13 = pneg %p7959_p1  ;;  %p7966_p2 = por %p7965_p5, %p7964_p0 }
 0x9b7   : > { %6018 = vst [vmem:[%s9526_s5 + $0x20] sm:$0xff] %v5904_v31  ;;  %v5907_v0 = vadd.f32 %v6816_v50, %v9492_v53  ;;  %v6819_v62 = vadd.f32 %v6818_v41, %v6817_v17  ;;  %v6820_v59 = vpop.f32.mrb[238].mxu0 }
 0x9b8   : > { %v6821_v61 = vpop.f32.mrb[239].mxu0  ;;  %p7967_p9 = pnand %p7966_p2, %p7960_p13 }
 0x9b9   : > { %6019 = vst [vmem:[%s9526_s5 + $0x28] sm:$0xff] %v5907_v0  ;;  %v5912_v19 = vadd.f32 %v6819_v62, %v9492_v53  ;;  %v6822_v7 = vadd.f32 %v6821_v61, %v6820_v59 }
 0x9bb   : > { %6020 = vst [vmem:[%s9526_s5 + $0x30] sm:$0xff] %v5912_v19  ;;  %v5915_v22 = vadd.f32 %v6822_v7, %v9492_v53 }
 0x9bd   : > { %6021 = vst [vmem:[%s9526_s5 + $0x38] sm:$0xff] %v5915_v22  ;;  %v6823_v3 = vpop.f32.mrb[240].mxu0 }
 0x9be   : > { %v6824_v28 = vpop.f32.mrb[241].mxu0 }
 0x9bf   : > { %v6825_v55 = vadd.f32 %v6824_v28, %v6823_v3  ;;  %v6826_v63 = vpop.f32.mrb[242].mxu0 }
 0x9c0   : > { %v6827_v4 = vpop.f32.mrb[243].mxu0 }
 0x9c1   : > { %v5920_v1 = vadd.f32 %v6825_v55, %v9492_v53  ;;  %v6828_v42 = vadd.f32 %v6827_v4, %v6826_v63 }
 0x9c3   : > { %6022 = vst [vmem:[%s9526_s5 + $0x40] sm:$0xff] %v5920_v1  ;;  %v5923_v6 = vadd.f32 %v6828_v42, %v9492_v53 }
 0x9c5   : > { %6023 = vst [vmem:[%s9526_s5 + $0x48] sm:$0xff] %v5923_v6  ;;  %v6829_v2 = vpop.f32.mrb[244].mxu0 }
 0x9c6   : > { %v6830_v5 = vpop.f32.mrb[245].mxu0 }
 0x9c7   : > { %v6831_v9 = vadd.f32 %v6830_v5, %v6829_v2  ;;  %v6832_v10 = vpop.f32.mrb[246].mxu0 }
 0x9c8   : > { %v6833_v60 = vpop.f32.mrb[247].mxu0 }
 0x9c9   : > { %v5928_v27 = vadd.f32 %v6831_v9, %v9492_v53  ;;  %v6834_v14 = vadd.f32 %v6833_v60, %v6832_v10 }
 0x9cb   : > { %6024 = vst [vmem:[%s9526_s5 + $0x50] sm:$0xff] %v5928_v27  ;;  %v5931_v35 = vadd.f32 %v6834_v14, %v9492_v53 }
 0x9cd   : > { %6025 = vst [vmem:[%s9526_s5 + $0x58] sm:$0xff] %v5931_v35  ;;  %v6835_v15 = vpop.f32.mrb[248].mxu0 }
 0x9ce   : > { %v6836_v24 = vpop.f32.mrb[249].mxu0 }
 0x9cf   : > { %v6837_v30 = vadd.f32 %v6836_v24, %v6835_v15  ;;  %v6838_v32 = vpop.f32.mrb[250].mxu0 }
 0x9d0   : > { %v6839_v29 = vpop.f32.mrb[251].mxu0 }
 0x9d1   : > { %v5936_v21 = vadd.f32 %v6837_v30, %v9492_v53  ;;  %v6840_v23 = vadd.f32 %v6839_v29, %v6838_v32 }
 0x9d3   : > { %6026 = vst [vmem:[%s9526_s5 + $0x60] sm:$0xff] %v5936_v21  ;;  %v5939_v33 = vadd.f32 %v6840_v23, %v9492_v53 }
 0x9d5   : > { %6027 = vst [vmem:[%s9526_s5 + $0x68] sm:$0xff] %v5939_v33  ;;  %v6841_v54 = vpop.f32.mrb[252].mxu0 }
 0x9d6   : > { %v6842_v56 = vpop.f32.mrb[253].mxu0 }
 0x9d7   : > { %v6843_v34 = vadd.f32 %v6842_v56, %v6841_v54  ;;  %v6844_v37 = vpop.f32.mrb[254].mxu0 }
 0x9d8   : > { %v6845_v36 = vpop.f32.mrb[255].mxu0 }
 0x9d9   : > { %v5944_v18 = vadd.f32 %v6843_v34, %v9492_v53  ;;  %v6846_v38 = vadd.f32 %v6845_v36, %v6844_v37 }
 0x9db   : > { %6028 = vst [vmem:[%s9526_s5 + $0x70] sm:$0xff] %v5944_v18  ;;  %v5947_v16 = vadd.f32 %v6846_v38, %v9492_v53 }
 0x9dd   : > { %6029 = vst [vmem:[%s9526_s5 + $0x78] sm:$0xff] %v5947_v16  ;;  %v6847_v8 = vpop.f32.mrb[0].mxu0 }
 0x9de   : > { %v6848_v25 = vpop.f32.mrb[1].mxu0 }
 0x9df   : > { %v6849_v39 = vadd.f32 %v6848_v25, %v6847_v8  ;;  %v6850_v45 = vpop.f32.mrb[2].mxu0 }
 0x9e0   : > { %v6851_v20 = vpop.f32.mrb[3].mxu0 }
 0x9e1   : > { %v5952_v26 = vadd.f32 %v6849_v39, %v9492_v53  ;;  %v6852_v57 = vadd.f32 %v6851_v20, %v6850_v45 }
 0x9e3   : > { %6030 = vst [vmem:[%s9526_s5 + $0x80] sm:$0xff] %v5952_v26  ;;  %v5955_v12 = vadd.f32 %v6852_v57, %v9492_v53 }
 0x9e5   : > { %6031 = vst [vmem:[%s9526_s5 + $0x88] sm:$0xff] %v5955_v12  ;;  %v6853_v13 = vpop.f32.mrb[4].mxu0 }
 0x9e6   : > { %v6854_v40 = vpop.f32.mrb[5].mxu0 }
 0x9e7   : > { %v6855_v43 = vadd.f32 %v6854_v40, %v6853_v13  ;;  %v6856_v44 = vpop.f32.mrb[6].mxu0 }
 0x9e8   : > { %v6857_v46 = vpop.f32.mrb[7].mxu0 }
 0x9e9   : > { %v5960_v47 = vadd.f32 %v6855_v43, %v9492_v53  ;;  %v6858_v48 = vadd.f32 %v6857_v46, %v6856_v44 }
 0x9eb   : > { %6032 = vst [vmem:[%s9526_s5 + $0x90] sm:$0xff] %v5960_v47  ;;  %v5963_v49 = vadd.f32 %v6858_v48, %v9492_v53 }
 0x9ed   : > { %6033 = vst [vmem:[%s9526_s5 + $0x98] sm:$0xff] %v5963_v49  ;;  %v6859_v51 = vpop.f32.mrb[8].mxu0 }
 0x9ee   : > { %v6860_v52 = vpop.f32.mrb[9].mxu0 }
 0x9ef   : > { %v6861_v58 = vadd.f32 %v6860_v52, %v6859_v51  ;;  %v6862_v11 = vpop.f32.mrb[10].mxu0 }
 0x9f0   : > { %v6863_v31 = vpop.f32.mrb[11].mxu0 }
 0x9f1   : > { %v5968_v50 = vadd.f32 %v6861_v58, %v9492_v53  ;;  %v6864_v0 = vadd.f32 %v6863_v31, %v6862_v11 }
 0x9f3   : > { %6034 = vst [vmem:[%s9526_s5 + $0xa0] sm:$0xff] %v5968_v50  ;;  %v5971_v17 = vadd.f32 %v6864_v0, %v9492_v53 }
 0x9f5   : > { %6035 = vst [vmem:[%s9526_s5 + $0xa8] sm:$0xff] %v5971_v17  ;;  %v6865_v41 = vpop.f32.mrb[12].mxu0 }
 0x9f6   : > { %v6866_v62 = vpop.f32.mrb[13].mxu0 }
 0x9f7   : > { %v6867_v59 = vadd.f32 %v6866_v62, %v6865_v41  ;;  %v6868_v61 = vpop.f32.mrb[14].mxu0 }
 0x9f8   : > { %v6869_v19 = vpop.f32.mrb[15].mxu0 }
 0x9f9   : > { %v5976_v7 = vadd.f32 %v6867_v59, %v9492_v53  ;;  %v6870_v22 = vadd.f32 %v6869_v19, %v6868_v61 }
 0x9fb   : > { %6036 = vst [vmem:[%s9526_s5 + $0xb0] sm:$0xff] %v5976_v7  ;;  %v5979_v3 = vadd.f32 %v6870_v22, %v9492_v53 }
 0x9fd   : > { %6037 = vst [vmem:[%s9526_s5 + $0xb8] sm:$0xff] %v5979_v3  ;;  %v6871_v28 = vpop.f32.mrb[16].mxu0 }
 0x9fe   : > { %v6872_v55 = vpop.f32.mrb[17].mxu0 }
 0x9ff   : > { %v6873_v63 = vadd.f32 %v6872_v55, %v6871_v28  ;;  %v6874_v4 = vpop.f32.mrb[18].mxu0 }
 0xa00   : > { %v6875_v1 = vpop.f32.mrb[19].mxu0 }
 0xa01   : > { %v5984_v42 = vadd.f32 %v6873_v63, %v9492_v53  ;;  %v6876_v6 = vadd.f32 %v6875_v1, %v6874_v4 }
 0xa03   : > { %6038 = vst [vmem:[%s9526_s5 + $0xc0] sm:$0xff] %v5984_v42  ;;  %v5987_v2 = vadd.f32 %v6876_v6, %v9492_v53 }
 0xa05   : > { %6039 = vst [vmem:[%s9526_s5 + $0xc8] sm:$0xff] %v5987_v2  ;;  %v6877_v5 = vpop.f32.mrb[20].mxu0 }
 0xa06   : > { %v6878_v9 = vpop.f32.mrb[21].mxu0 }
 0xa07   : > { %v6879_v10 = vadd.f32 %v6878_v9, %v6877_v5  ;;  %v6880_v60 = vpop.f32.mrb[22].mxu0 }
 0xa08   : > { %v6881_v27 = vpop.f32.mrb[23].mxu0 }
 0xa09   : > { %v5992_v14 = vadd.f32 %v6879_v10, %v9492_v53  ;;  %v6882_v35 = vadd.f32 %v6881_v27, %v6880_v60 }
 0xa0b   : > { %6040 = vst [vmem:[%s9526_s5 + $0xd0] sm:$0xff] %v5992_v14  ;;  %v5995_v15 = vadd.f32 %v6882_v35, %v9492_v53 }
 0xa0d   : > { %6041 = vst [vmem:[%s9526_s5 + $0xd8] sm:$0xff] %v5995_v15  ;;  %v6883_v24 = vpop.f32.mrb[24].mxu0 }
 0xa0e   : > { %v6884_v30 = vpop.f32.mrb[25].mxu0 }
 0xa0f   : > { %v6885_v32 = vadd.f32 %v6884_v30, %v6883_v24  ;;  %v6886_v29 = vpop.f32.mrb[26].mxu0 }
 0xa10   : > { %v6887_v21 = vpop.f32.mrb[27].mxu0 }
 0xa11   : > { %v6000_v23 = vadd.f32 %v6885_v32, %v9492_v53  ;;  %v6888_v33 = vadd.f32 %v6887_v21, %v6886_v29 }
 0xa13   : > { %6042 = vst [vmem:[%s9526_s5 + $0xe0] sm:$0xff] %v6000_v23  ;;  %v6003_v54 = vadd.f32 %v6888_v33, %v9492_v53 }
 0xa15   : > { %6043 = vst [vmem:[%s9526_s5 + $0xe8] sm:$0xff] %v6003_v54  ;;  %v6889_v56 = vpop.f32.mrb[28].mxu0 }
 0xa16   : > { %v6890_v34 = vpop.f32.mrb[29].mxu0 }
 0xa17   : > { %v6891_v37 = vadd.f32 %v6890_v34, %v6889_v56  ;;  %v6892_v36 = vpop.f32.mrb[30].mxu0 }
 0xa18   : > { %v6893_v18 = vpop.f32.mrb[31].mxu0 }
 0xa19   : > { %v6008_v38 = vadd.f32 %v6891_v37, %v9492_v53  ;;  %v6894_v16 = vadd.f32 %v6893_v18, %v6892_v36 }
 0xa1b   : > { %6044 = vst [vmem:[%s9526_s5 + $0xf0] sm:$0xff] %v6008_v38  ;;  %v6011_v8 = vadd.f32 %v6894_v16, %v9492_v53 }
 0xa1d   : > { %6045 = vst [vmem:[%s9526_s5 + $0xf8] sm:$0xff] %v6011_v8 }
 0xa1e   : > { %7970 = shalt.err (!%p7967_p9)
}
 0xa1f   : > { %s7971_s11 = scalar_lea.hbm %s9596_s4, 4096  ;;  %s7975_s20 = scalar_lea.hbm %s9757_s12, 16384 }
 0xa20   : > { %p7972_p10 = scmp.ne.s32.totalorder %s9596_s4, %s7971_s11  ;;  %p7976_p8 = scmp.lt.u32.totalorder %s9596_s4, %s9757_s12 }
 0xa21   : > { %p7977_p11 = scmp.lt.u32.totalorder %s7975_s20, %s7971_s11  ;;  %p7979_p12 = scmp.lt.u32.totalorder %s7971_s11, %s9596_s4 }
 0xa22   : > { %p7973_p4 = pnand %p7972_p10, %p9756_p7 }
 0xa23   : > { %p7978_p3 = por %p7977_p11, %p7976_p8 }
 0xa24   : > { %p7974_p6 = pneg %p7973_p4 }
 0xa25   : > { %p7980_p1 = por %p7979_p12, %p7978_p3 }
 0xa27   : > { %p7981_p13 = pnand %p7980_p1, %p7974_p6 }
 0xa29   : > { %7984 = shalt.err (!%p7981_p13)
}
 0xa2a   : > { %7020 = dma.vmem_to_hbm [thread:$0]  (%p9756_p7), %s9598_s1, 4096, %s9596_s4, %s6052_s27, %s8077_s0, %s8077_s0, %s8078_s18  }
 0xa2b PF: > { %p7089_p0 = scmp.ge.s32.totalorder %s8055_s30, 2  ;;  %s6096_s13 = sand.u32 1, %s8043_s3  }
 0xa2c   : > { %p9758_p5 = scmp.ne.s32.totalorder %s9727_s26, 0  ;;  %s6097_s15 = scalar_lea.sflag [#allocation4], %s6096_s13 }
 0xa2e   : > { %p7062_p2 = pnand %p7089_p0, %p9758_p5 }
 0xa30   : > { %8034 = dma.done.wait (!%p7062_p2), %s6097_s15, 4096  }
 0xa31   : > { %8036 = vsyncadd (!%p7062_p2), %s6097_s15, 4294963200  ;;  %s6106_s8 = scalar_lea.sflag [#allocation24], %s6096_s13 }
 0xa32   : > { %8038 = dma.done.wait (!%p7062_p2), %s6106_s8, 4096  }
 0xa33   : > { %8040 = vsyncadd (!%p7062_p2), %s6106_s8, 4294963200  ;;  %p47_p7 = scmp.ge.s32.totalorder %s8469_s9, 6   ;;  %s9759_s3 = smov %s8047_s28 }
 0xa34   : > { %s9760_s28 = smov %s8051_s29  ;;  %s9761_s29 = smov %s8480_s6 }
 0xa35   : > { %s9762_s30 = smov %s8469_s9  ;;  %49 = sbr.rel (!%p47_p7) target bundleno = 36 (0x24), region = 219 }
 0xa3c   :  { %6111 = vsyncpa [#allocation3], 1 }
 0xa3d   :  { %6113 = vsyncpa [#allocation3 + $0x1], 1 }
 0xa3e   :  { %6114 = vsyncpa [#allocation6], 1 }
 0xa3f   :  { %6116 = vsyncpa [#allocation6 + $0x1], 1 }
 0xa40   :  { %6117 = vsyncpa [#allocation9], 1 }
 0xa41   :  { %6118 = vsyncpa [#allocation12], 1 }
 0xa42   :  { %6119 = vsyncpa [#allocation15], 1 }
 0xa43   :  { %6120 = vsyncpa [#allocation18], 1 }
 0xa44   :  { %6121 = vsyncpa [#allocation21], 1 }
 0xa45   :  { %6122 = vsyncpa [#allocation4], 1 }
 0xa46   :  { %6124 = vsyncpa [#allocation4 + $0x1], 1 }
 0xa47   :  { %6125 = vsyncpa [#allocation24], 1 }
 0xa48   :  { %6127 = vsyncpa [#allocation24 + $0x1], 1 }

</bundles_post_ra>
